<compile_context>
chip_gen: v5e
topology: v5e:2x2
jax: 0.10.0
libtpu: 0.0.40
codegen_flags: <defaults>
</compile_context>

<pallas_src>
import numpy as np
import jax
import jax.numpy as jnp
from jax.experimental import pallas as pl
from jax.experimental.pallas import tpu as pltpu

# MXU operand dtype.  jnp.bfloat16 on v6e/v7x cuts MXU passes ~3x and halves
# operand VMEM; keep float32 by default for tight numerical parity.
MXU_DTYPE = jnp.float32


# ---------------------------------------------------------------------------
# Host-side constant builders (numpy; all static / trace-time)
# ---------------------------------------------------------------------------
def adaptive_avg_pool_matrix(l_in, p):
    """Exact PyTorch AdaptiveAvgPool1d bin weights as an (l_in, p) matrix."""
    m = np.zeros((l_in, p), dtype=np.float32)
    for i in range(p):
        start = (i * l_in) // p
        end = -(-((i + 1) * l_in) // p)     # ceil
        m[start:end, i] = 1.0 / (end - start)
    return m


def _make_remap(batch, l_in, pin, pc, stride, k, l_out, pout):
    """0/1 matrix (wv, B*lp_out).

    Maps the stride-1 conv output computed over the segmented padded input
    layout (per-batch segments of width l_in + 2*pin) to the next layer's
    segmented padded layout: selects valid (non cross-batch) columns, applies
    the conv stride, and its all-zero columns yield exact zeros at the
    per-batch pad positions (so no mask multiply is needed downstream).
    """
    lp_in = l_in + 2 * pin
    lp_out = l_out + 2 * pout
    wv = batch * lp_in - k + 1
    r = np.zeros((wv, batch * lp_out), np.float32)
    for b in range(batch):
        for p in range(l_out):
            i = b * lp_in + (pin - pc) + p * stride
            j = b * lp_out + pout + p
            r[i, j] = 1.0
    return r


# ---------------------------------------------------------------------------
# Parameter initialization (deterministic; eval-mode BN as scale/shift)
# ---------------------------------------------------------------------------
def _init_conv(key, co, ci, k):
    return jax.random.normal(key, (co, ci, k), jnp.float32) / np.sqrt(ci * k)


def _init_bn(key, c):
    k1, k2, k3, k4 = jax.random.split(key, 4)
    gamma = 1.0 + 0.1 * jax.random.normal(k1, (c,), jnp.float32)
    beta = 0.1 * jax.random.normal(k2, (c,), jnp.float32)
    mean = 0.1 * jax.random.normal(k3, (c,), jnp.float32)
    var = jnp.abs(jax.random.normal(k4, (c,), jnp.float32)) + 1.0
    eps = 1e-5
    scale = gamma / jnp.sqrt(var + eps)
    shift = beta - mean * scale
    return scale, shift


def init_resnet1d_params(key, in_channels=2, num_blocks=(2, 2, 2),
                         base_channels=64, out_dim=64, adaptive_pool=16):
    keys = iter(jax.random.split(key, 256))
    params = {}
    params["conv1_w"] = _init_conv(next(keys), base_channels, in_channels, 7)
    params["bn1"] = _init_bn(next(keys), base_channels)

    def make_layer(cin, cout, blocks, stride):
        layer = []
        bcin, s = cin, stride
        for _ in range(blocks):
            blk = {"stride": s}
            blk["w1"] = _init_conv(next(keys), cout, bcin, 3)
            blk["s1"], blk["b1"] = _init_bn(next(keys), cout)
            blk["w2"] = _init_conv(next(keys), cout, cout, 3)
            blk["s2"], blk["b2"] = _init_bn(next(keys), cout)
            if s != 1 or bcin != cout:
                blk["wd"] = _init_conv(next(keys), cout, bcin, 1)
                blk["sd"], blk["bd"] = _init_bn(next(keys), cout)
            layer.append(blk)
            bcin, s = cout, 1
        return layer

    c = base_channels
    params["layer1"] = make_layer(c, c // 2, num_blocks[0], 1)
    params["layer2"] = make_layer(c // 2, c // 4, num_blocks[1], 1)
    params["layer3"] = make_layer(c // 4, c // 8, num_blocks[2], 2)
    params["fc_w"] = (jax.random.normal(next(keys), (out_dim, adaptive_pool),
                                        jnp.float32) / np.sqrt(adaptive_pool))
    params["fc_b"] = 0.1 * jax.random.normal(next(keys), (out_dim,), jnp.float32)
    params["adaptive_pool"] = adaptive_pool
    return params


# ---------------------------------------------------------------------------
# Fully fused forward pass: one pallas_call for the whole network
# ---------------------------------------------------------------------------
def resnet1d_forward(params, x):
    """x: (B, Cin, L) f32 -> (B, C_final, out_dim) f32."""
    B, c_in, L = x.shape
    P = int(params["adaptive_pool"])
    out_dim = params["fc_w"].shape[0]
    c_final = params["layer3"][-1]["w2"].shape[0]

    # ------------- host-side packing of all constants into slabs -----------
    w_blocks = []       # (Co, K*Ci) folded weights, stacked along columns
    m_blocks = []       # remap matrices / pre-masked shift rows, along rows
    shift_cols = []     # per-conv BN shift vectors (for remap convs)
    macs = [0]

    def conv_spec(w, scale, shift, *, stride, pad, l_in, pin, relu,
                  pout=1, pre_im2col=False):
        w = np.asarray(w, np.float32)
        scale = np.asarray(scale, np.float32)
        shift = np.asarray(shift, np.float32)
        co, ci, k = w.shape
        wf = w * scale[:, None, None]                     # fold BN scale
        w2d = np.concatenate([wf[:, :, t] for t in range(k)], axis=1)
        l_out = (l_in + 2 * pad - k) // stride + 1
        lp_in = l_in + 2 * pin
        w_in = B * lp_in
        wv = w_in - k + 1
        spec = dict(co=co, relu=relu, l_out=l_out,
                    w_idx=len(w_blocks), w_cols=w2d.shape[1])
        w_blocks.append(w2d)
        direct = (stride == 1 and k == 1 and pad == 0)    # 1x1: layout-identity
        spec["direct"] = direct
        if direct:
            mask = np.zeros((1, w_in), np.float32)
            for b in range(B):
                mask[0, b * lp_in + pin: b * lp_in + pin + l_in] = 1.0
            spec["m_idx"] = len(m_blocks)
            m_blocks.append(shift[:, None] * mask)        # pre-masked BN shift
            macs[0] += co * ci * w_in
        else:
            if pre_im2col:                                 # stem: host im2col
                spec["ci"], spec["k"], spec["wv"] = ci * k, 1, wv
            else:
                spec["ci"], spec["k"], spec["wv"] = ci, k, wv
            spec["m_idx"] = len(m_blocks)
            m_blocks.append(_make_remap(B, l_in, pin, pad, stride, k,
                                        l_out, pout))
            spec["s_idx"] = len(shift_cols)
            shift_cols.append(shift)
            macs[0] += co * ci * k * wv + co * wv * B * (l_out + 2 * pout)
        return spec

    # ---- stem: conv(k=7, s=2, p=3) + bn + relu; input im2col'd on host ----
    s1, b1 = params["bn1"]
    stem = conv_spec(params["conv1_w"], s1, b1, stride=2, pad=3,
                     l_in=L, pin=3, relu=True, pre_im2col=True)
    l_cur = stem["l_out"]

    # ---- residual blocks ----
    blocks = []
    for layer_name in ("layer1", "layer2", "layer3"):
        for blk in params[layer_name]:
            stride = blk["stride"]
            bs = {}
            bs["conv1"] = conv_spec(blk["w1"], blk["s1"], blk["b1"],
                                    stride=stride, pad=1, l_in=l_cur, pin=1,
                                    relu=True)
            l_mid = bs["conv1"]["l_out"]
            bs["conv2"] = conv_spec(blk["w2"], blk["s2"], blk["b2"],
                                    stride=1, pad=1, l_in=l_mid, pin=1,
                                    relu=False)
            if "wd" in blk:
                bs["ds"] = conv_spec(blk["wd"], blk["sd"], blk["bd"],
                                     stride=stride, pad=0, l_in=l_cur, pin=1,
                                     relu=False)
            blocks.append(bs)
            l_cur = l_mid

    # ---- fused AdaptiveAvgPool1d(P) + Linear(P, out_dim) head -------------
    l_f, lp_f = l_cur, l_cur + 2
    w_f = B * lp_f
    pool = adaptive_avg_pool_matrix(l_f, P)                   # (l_f, P)
    fcw = np.asarray(params["fc_w"], np.float32)              # (out_dim, P)
    fcb = np.asarray(params["fc_b"], np.float32)
    head = np.zeros((w_f + 1, B * out_dim), np.float32)
    head_blk = pool @ fcw.T                                   # (l_f, out_dim)
    for b in range(B):
        head[b * lp_f + 1: b * lp_f + 1 + l_f,
             b * out_dim:(b + 1) * out_dim] = head_blk
    head[w_f, :] = np.tile(fcb, B)                            # bias row
    macs[0] += c_final * w_f * B * out_dim

    # ---- slab assembly -----------------------------------------------------
    w_rows = max(b_.shape[0] for b_ in w_blocks)              # = 64
    w_off, padded, off = [], [], 0
    for b_ in w_blocks:
        w_off.append(off)
        off += b_.shape[1]
        padded.append(np.pad(b_, ((0, w_rows - b_.shape[0]), (0, 0))))
    w_slab = np.concatenate(padded, axis=1)                   # (64, sum_cols)

    m_cols = max(b_.shape[1] for b_ in m_blocks)              # = 68
    m_off, m_shapes, padded, off = [], [], [], 0
    for b_ in m_blocks:
        m_off.append(off)
        m_shapes.append(b_.shape)
        rpad = (-b_.shape[0]) % 8                             # sublane-align
        padded.append(np.pad(b_, ((0, rpad), (0, m_cols - b_.shape[1]))))
        off += b_.shape[0] + rpad
    m_slab = np.concatenate(padded, axis=0)                   # (rows, 68)

    s_slab = np.zeros((w_rows, len(shift_cols)), np.float32)
    for i, sc in enumerate(shift_cols):
        s_slab[:sc.shape[0], i] = sc

    # ---- kernel inputs (5 arrays total) ------------------------------------
    lp0 = L + 2 * 3
    wv0 = B * lp0 - 7 + 1
    x_seg = jnp.pad(jnp.transpose(x, (1, 0, 2)),
                    ((0, 0), (0, 0), (3, 3))).reshape(c_in, B * lp0)
    x_im2col = jnp.concatenate([x_seg[:, t:t + wv0] for t in range(7)],
                               axis=0).astype(MXU_DTYPE)      # (7*c_in, wv0)

    w_slab_j = jnp.asarray(w_slab).astype(MXU_DTYPE)
    m_slab_j = jnp.asarray(m_slab).astype(MXU_DTYPE)
    s_slab_j = jnp.asarray(s_slab)                            # added -> f32
    head_j = jnp.asarray(head).astype(MXU_DTYPE)

    # ---- the fused kernel ---------------------------------------------------
    def kernel(w_ref, m_ref, s_ref, head_ref, x_ref, o_ref):

        def mblock(spec):
            r0 = m_off[spec["m_idx"]]
            rows, cols = m_shapes[spec["m_idx"]]
            return m_ref[r0:r0 + rows, 0:cols]

        def conv_remap(x_val, spec):
            """Per-tap MXU matmuls over the segmented layout; BN shift (+ReLU)
            applied BEFORE the remap matmul; the remap's zero columns give the
            per-batch pad zeros exactly (no mask multiply)."""
            co, ci, k, wv = spec["co"], spec["ci"], spec["k"], spec["wv"]
            off0 = w_off[spec["w_idx"]]
            xq = x_val.astype(MXU_DTYPE)
            acc = None
            for t in range(k):                     # static unroll over taps
                w_t = w_ref[0:co, off0 + t * ci: off0 + (t + 1) * ci]
                d = jnp.dot(w_t, xq[:, t:t + wv],
                            preferred_element_type=jnp.float32)
                acc = d if acc is None else acc + d
            si = spec["s_idx"]
            acc = acc + s_ref[0:co, si:si + 1]     # BN shift (scale in weights)
            if spec["relu"]:
                acc = jnp.maximum(acc, 0.0)
            return jnp.dot(acc.astype(MXU_DTYPE), mblock(spec),
                           preferred_element_type=jnp.float32)

        def conv_direct(x_val, spec):
            """stride-1 1x1 downsample: layout identity, no remap; BN shift is
            pre-masked to data columns so pad columns stay exactly zero."""
            co = spec["co"]
            off0 = w_off[spec["w_idx"]]
            w_m = w_ref[0:co, off0: off0 + spec["w_cols"]]
            y = jnp.dot(w_m, x_val.astype(MXU_DTYPE),
                        preferred_element_type=jnp.float32)
            return y + mblock(spec)

        h = conv_remap(x_ref[...], stem)
        for bs in blocks:
            out1 = conv_remap(h, bs["conv1"])
            y2 = conv_remap(out1, bs["conv2"])
            if "ds" in bs:
                ds = bs["ds"]
                ident = conv_direct(h, ds) if ds["direct"] else conv_remap(h, ds)
            else:
                ident = h
            h = jnp.maximum(y2 + ident, 0.0)       # pad columns stay exactly 0

        # fused pool + fc: one block-diagonal matmul, single lane-dense
        # (c_final, B*out_dim) = (8, 128) store.
        hm = head_ref[0:w_f, :]
        bias = head_ref[w_f:w_f + 1, :]
        o_ref[...] = (jnp.dot(h.astype(MXU_DTYPE), hm,
                              preferred_element_type=jnp.float32)
                      + bias).astype(o_ref.dtype)

    inputs = (w_slab_j, m_slab_j, s_slab_j, head_j, x_im2col)
    in_bytes = sum(int(np.prod(a.shape)) * a.dtype.itemsize for a in inputs)
    out_bytes = c_final * B * out_dim * 4
    cost = pl.CostEstimate(flops=2 * int(macs[0]), transcendentals=0,
                           bytes_accessed=int(in_bytes + out_bytes))

    out2d = pl.pallas_call(
        kernel,
        out_shape=jax.ShapeDtypeStruct((c_final, B * out_dim), jnp.float32),
        compiler_params=pltpu.CompilerParams(
            vmem_limit_bytes=32 * 1024 * 1024),
        cost_estimate=cost,
    )(*inputs)

    # (c_final, B*out_dim) -> (B, c_final, out_dim): wrapper-side layout only.
    return jnp.transpose(out2d.reshape(c_final, B, out_dim), (1, 0, 2))


# ---------------------------------------------------------------------------
# Pure-XLA reference (same inference-mode-BN forward) for a numerical check
# ---------------------------------------------------------------------------
def _conv1d_ref(x, w, stride, pad):
    return jax.lax.conv_general_dilated(
        x, w, window_strides=(stride,), padding=[(pad, pad)],
        dimension_numbers=("NCH", "OIH", "NCH"),
        precision=jax.lax.Precision.HIGHEST)


def resnet1d_reference(params, x):
    def cbn(h, w, s, b, stride, pad, relu):
        y = _conv1d_ref(h, w, stride, pad)
        y = y * s[None, :, None] + b[None, :, None]
        return jnp.maximum(y, 0.0) if relu else y

    s1, b1 = params["bn1"]
    h = cbn(x, params["conv1_w"], s1, b1, 2, 3, True)
    for layer_name in ("layer1", "layer2", "layer3"):
        for blk in params[layer_name]:
            stride = blk["stride"]
            out = cbn(h, blk["w1"], blk["s1"], blk["b1"], stride, 1, True)
            out = cbn(out, blk["w2"], blk["s2"], blk["b2"], 1, 1, False)
            identity = (cbn(h, blk["wd"], blk["sd"], blk["bd"], stride, 0, False)
                        if "wd" in blk else h)
            h = jnp.maximum(out + identity, 0.0)
    l_f = h.shape[-1]
    pm = jnp.asarray(adaptive_avg_pool_matrix(l_f, int(params["adaptive_pool"])))
    pooled = jnp.einsum("bcl,lp->bcp", h, pm,
                        precision=jax.lax.Precision.HIGHEST)
    z = jnp.einsum("bcp,op->bco", pooled, params["fc_w"],
                   precision=jax.lax.Precision.HIGHEST)
    return z + params["fc_b"][None, None, :]


# ---------------------------------------------------------------------------
if __name__ == "__main__":
    key = jax.random.PRNGKey(0)
    pkey, xkey = jax.random.split(key)

    # small config: in_channels=2, base_channels=64 -> channels 64/32/16/8
    params = init_resnet1d_params(pkey, in_channels=2, num_blocks=(2, 2, 2),
                                  base_channels=64, out_dim=64,
                                  adaptive_pool=16)

    B, C_in, L = 2, 2, 64
    x = jax.random.normal(xkey, (B, C_in, L), jnp.float32)

    z = resnet1d_forward(params, x)
    jax.block_until_ready(z)

    assert z.shape == (B, 64 // 8, 64), z.shape   # (batch, final_channels, out_dim)
    assert bool(jnp.all(jnp.isfinite(z)))

    # numerical sanity check against the pure-XLA reference
    z_ref = resnet1d_reference(params, x)
    assert np.allclose(np.asarray(z), np.asarray(z_ref),
                       rtol=5e-2, atol=5e-2), float(jnp.max(jnp.abs(z - z_ref)))

    print("KERNEL_OK")
</pallas_src>

<mosaic_0001>
module attributes {stable_mosaic.version = 11 : i64} {
  func.func @kernel(%arg0: memref<64x966xf32, #tpu.memory_space<vmem>>, %arg1: memref<1024x68xf32, #tpu.memory_space<vmem>>, %arg2: memref<64x14xf32, #tpu.memory_space<vmem>>, %arg3: memref<37x128xf32, #tpu.memory_space<vmem>>, %arg4: memref<14x134xf32, #tpu.memory_space<vmem>>, %arg5: memref<8x128xf32, #tpu.memory_space<vmem>>) attributes {dimension_semantics = [], scalar_prefetch = 0 : i64, scratch_operands = 0 : i64, tpu.core_type = #tpu.core_type<tc>} {
    %c0 = arith.constant 0 : index
    %c0_0 = arith.constant 0 : index
    %0 = vector.load %arg4[%c0, %c0_0] : memref<14x134xf32, #tpu.memory_space<vmem>>, vector<14x134xf32>
    %c0_1 = arith.constant 0 : index
    %c0_2 = arith.constant 0 : index
    %1 = vector.load %arg0[%c0_1, %c0_2] : memref<64x966xf32, #tpu.memory_space<vmem>>, vector<64x14xf32>
    %cst = arith.constant dense<0.000000e+00> : vector<64x134xf32>
    %2 = tpu.matmul %1, %0, %cst {dimension_numbers = #tpu.dot_dimension_numbers<[1], [0], [0], [1], [0, 0, 1, 1], [], []>} : vector<64x14xf32>, vector<14x134xf32>, vector<64x134xf32> -> vector<64x134xf32>
    %c0_3 = arith.constant 0 : index
    %c0_4 = arith.constant 0 : index
    %3 = vector.load %arg2[%c0_3, %c0_4] : memref<64x14xf32, #tpu.memory_space<vmem>>, vector<64x1xf32>
    %4 = vector.broadcast %3 : vector<64x1xf32> to vector<64x134xf32>
    %5 = arith.addf %2, %4 : vector<64x134xf32>
    %cst_5 = arith.constant 0.000000e+00 : f32
    %6 = vector.broadcast %cst_5 : f32 to vector<64x134xf32>
    %7 = arith.maximumf %5, %6 : vector<64x134xf32>
    %c0_6 = arith.constant 0 : index
    %c0_7 = arith.constant 0 : index
    %8 = vector.load %arg1[%c0_6, %c0_7] : memref<1024x68xf32, #tpu.memory_space<vmem>>, vector<134x68xf32>
    %cst_8 = arith.constant dense<0.000000e+00> : vector<64x68xf32>
    %9 = tpu.matmul %7, %8, %cst_8 {dimension_numbers = #tpu.dot_dimension_numbers<[1], [0], [0], [1], [0, 0, 1, 1], [], []>} : vector<64x134xf32>, vector<134x68xf32>, vector<64x68xf32> -> vector<64x68xf32>
    %c0_9 = arith.constant 0 : index
    %c14 = arith.constant 14 : index
    %10 = vector.load %arg0[%c0_9, %c14] : memref<64x966xf32, #tpu.memory_space<vmem>>, vector<32x64xf32>
    %11 = vector.extract_strided_slice %9 {offsets = [0, 0], sizes = [64, 66], strides = [1, 1]} : vector<64x68xf32> to vector<64x66xf32>
    %cst_10 = arith.constant dense<0.000000e+00> : vector<32x66xf32>
    %12 = tpu.matmul %10, %11, %cst_10 {dimension_numbers = #tpu.dot_dimension_numbers<[1], [0], [0], [1], [0, 0, 1, 1], [], []>} : vector<32x64xf32>, vector<64x66xf32>, vector<32x66xf32> -> vector<32x66xf32>
    %c0_11 = arith.constant 0 : index
    %c78 = arith.constant 78 : index
    %13 = vector.load %arg0[%c0_11, %c78] : memref<64x966xf32, #tpu.memory_space<vmem>>, vector<32x64xf32>
    %14 = vector.extract_strided_slice %9 {offsets = [0, 1], sizes = [64, 66], strides = [1, 1]} : vector<64x68xf32> to vector<64x66xf32>
    %cst_12 = arith.constant dense<0.000000e+00> : vector<32x66xf32>
    %15 = tpu.matmul %13, %14, %cst_12 {dimension_numbers = #tpu.dot_dimension_numbers<[1], [0], [0], [1], [0, 0, 1, 1], [], []>} : vector<32x64xf32>, vector<64x66xf32>, vector<32x66xf32> -> vector<32x66xf32>
    %16 = arith.addf %12, %15 : vector<32x66xf32>
    %c0_13 = arith.constant 0 : index
    %c142 = arith.constant 142 : index
    %17 = vector.load %arg0[%c0_13, %c142] : memref<64x966xf32, #tpu.memory_space<vmem>>, vector<32x64xf32>
    %18 = vector.extract_strided_slice %9 {offsets = [0, 2], sizes = [64, 66], strides = [1, 1]} : vector<64x68xf32> to vector<64x66xf32>
    %cst_14 = arith.constant dense<0.000000e+00> : vector<32x66xf32>
    %19 = tpu.matmul %17, %18, %cst_14 {dimension_numbers = #tpu.dot_dimension_numbers<[1], [0], [0], [1], [0, 0, 1, 1], [], []>} : vector<32x64xf32>, vector<64x66xf32>, vector<32x66xf32> -> vector<32x66xf32>
    %20 = arith.addf %16, %19 : vector<32x66xf32>
    %c0_15 = arith.constant 0 : index
    %c1 = arith.constant 1 : index
    %21 = vector.load %arg2[%c0_15, %c1] : memref<64x14xf32, #tpu.memory_space<vmem>>, vector<32x1xf32>
    %22 = vector.broadcast %21 : vector<32x1xf32> to vector<32x66xf32>
    %23 = arith.addf %20, %22 : vector<32x66xf32>
    %cst_16 = arith.constant 0.000000e+00 : f32
    %24 = vector.broadcast %cst_16 : f32 to vector<32x66xf32>
    %25 = arith.maximumf %23, %24 : vector<32x66xf32>
    %c136 = arith.constant 136 : index
    %c0_17 = arith.constant 0 : index
    %26 = vector.load %arg1[%c136, %c0_17] : memref<1024x68xf32, #tpu.memory_space<vmem>>, vector<66x68xf32>
    %cst_18 = arith.constant dense<0.000000e+00> : vector<32x68xf32>
    %27 = tpu.matmul %25, %26, %cst_18 {dimension_numbers = #tpu.dot_dimension_numbers<[1], [0], [0], [1], [0, 0, 1, 1], [], []>} : vector<32x66xf32>, vector<66x68xf32>, vector<32x68xf32> -> vector<32x68xf32>
    %c0_19 = arith.constant 0 : index
    %c206 = arith.constant 206 : index
    %28 = vector.load %arg0[%c0_19, %c206] : memref<64x966xf32, #tpu.memory_space<vmem>>, vector<32x32xf32>
    %29 = vector.extract_strided_slice %27 {offsets = [0, 0], sizes = [32, 66], strides = [1, 1]} : vector<32x68xf32> to vector<32x66xf32>
    %cst_20 = arith.constant dense<0.000000e+00> : vector<32x66xf32>
    %30 = tpu.matmul %28, %29, %cst_20 {dimension_numbers = #tpu.dot_dimension_numbers<[1], [0], [0], [1], [0, 0, 1, 1], [], []>} : vector<32x32xf32>, vector<32x66xf32>, vector<32x66xf32> -> vector<32x66xf32>
    %c0_21 = arith.constant 0 : index
    %c238 = arith.constant 238 : index
    %31 = vector.load %arg0[%c0_21, %c238] : memref<64x966xf32, #tpu.memory_space<vmem>>, vector<32x32xf32>
    %32 = vector.extract_strided_slice %27 {offsets = [0, 1], sizes = [32, 66], strides = [1, 1]} : vector<32x68xf32> to vector<32x66xf32>
    %cst_22 = arith.constant dense<0.000000e+00> : vector<32x66xf32>
    %33 = tpu.matmul %31, %32, %cst_22 {dimension_numbers = #tpu.dot_dimension_numbers<[1], [0], [0], [1], [0, 0, 1, 1], [], []>} : vector<32x32xf32>, vector<32x66xf32>, vector<32x66xf32> -> vector<32x66xf32>
    %34 = arith.addf %30, %33 : vector<32x66xf32>
    %c0_23 = arith.constant 0 : index
    %c270 = arith.constant 270 : index
    %35 = vector.load %arg0[%c0_23, %c270] : memref<64x966xf32, #tpu.memory_space<vmem>>, vector<32x32xf32>
    %36 = vector.extract_strided_slice %27 {offsets = [0, 2], sizes = [32, 66], strides = [1, 1]} : vector<32x68xf32> to vector<32x66xf32>
    %cst_24 = arith.constant dense<0.000000e+00> : vector<32x66xf32>
    %37 = tpu.matmul %35, %36, %cst_24 {dimension_numbers = #tpu.dot_dimension_numbers<[1], [0], [0], [1], [0, 0, 1, 1], [], []>} : vector<32x32xf32>, vector<32x66xf32>, vector<32x66xf32> -> vector<32x66xf32>
    %38 = arith.addf %34, %37 : vector<32x66xf32>
    %c0_25 = arith.constant 0 : index
    %c2 = arith.constant 2 : index
    %39 = vector.load %arg2[%c0_25, %c2] : memref<64x14xf32, #tpu.memory_space<vmem>>, vector<32x1xf32>
    %40 = vector.broadcast %39 : vector<32x1xf32> to vector<32x66xf32>
    %41 = arith.addf %38, %40 : vector<32x66xf32>
    %c208 = arith.constant 208 : index
    %c0_26 = arith.constant 0 : index
    %42 = vector.load %arg1[%c208, %c0_26] : memref<1024x68xf32, #tpu.memory_space<vmem>>, vector<66x68xf32>
    %cst_27 = arith.constant dense<0.000000e+00> : vector<32x68xf32>
    %43 = tpu.matmul %41, %42, %cst_27 {dimension_numbers = #tpu.dot_dimension_numbers<[1], [0], [0], [1], [0, 0, 1, 1], [], []>} : vector<32x66xf32>, vector<66x68xf32>, vector<32x68xf32> -> vector<32x68xf32>
    %c0_28 = arith.constant 0 : index
    %c302 = arith.constant 302 : index
    %44 = vector.load %arg0[%c0_28, %c302] : memref<64x966xf32, #tpu.memory_space<vmem>>, vector<32x64xf32>
    %cst_29 = arith.constant dense<0.000000e+00> : vector<32x68xf32>
    %45 = tpu.matmul %44, %9, %cst_29 {dimension_numbers = #tpu.dot_dimension_numbers<[1], [0], [0], [1], [0, 0, 1, 1], [], []>} : vector<32x64xf32>, vector<64x68xf32>, vector<32x68xf32> -> vector<32x68xf32>
    %c280 = arith.constant 280 : index
    %c0_30 = arith.constant 0 : index
    %46 = vector.load %arg1[%c280, %c0_30] : memref<1024x68xf32, #tpu.memory_space<vmem>>, vector<32x68xf32>
    %47 = arith.addf %45, %46 : vector<32x68xf32>
    %48 = arith.addf %43, %47 : vector<32x68xf32>
    %cst_31 = arith.constant 0.000000e+00 : f32
    %49 = vector.broadcast %cst_31 : f32 to vector<32x68xf32>
    %50 = arith.maximumf %48, %49 : vector<32x68xf32>
    %c0_32 = arith.constant 0 : index
    %c366 = arith.constant 366 : index
    %51 = vector.load %arg0[%c0_32, %c366] : memref<64x966xf32, #tpu.memory_space<vmem>>, vector<32x32xf32>
    %52 = vector.extract_strided_slice %50 {offsets = [0, 0], sizes = [32, 66], strides = [1, 1]} : vector<32x68xf32> to vector<32x66xf32>
    %cst_33 = arith.constant dense<0.000000e+00> : vector<32x66xf32>
    %53 = tpu.matmul %51, %52, %cst_33 {dimension_numbers = #tpu.dot_dimension_numbers<[1], [0], [0], [1], [0, 0, 1, 1], [], []>} : vector<32x32xf32>, vector<32x66xf32>, vector<32x66xf32> -> vector<32x66xf32>
    %c0_34 = arith.constant 0 : index
    %c398 = arith.constant 398 : index
    %54 = vector.load %arg0[%c0_34, %c398] : memref<64x966xf32, #tpu.memory_space<vmem>>, vector<32x32xf32>
    %55 = vector.extract_strided_slice %50 {offsets = [0, 1], sizes = [32, 66], strides = [1, 1]} : vector<32x68xf32> to vector<32x66xf32>
    %cst_35 = arith.constant dense<0.000000e+00> : vector<32x66xf32>
    %56 = tpu.matmul %54, %55, %cst_35 {dimension_numbers = #tpu.dot_dimension_numbers<[1], [0], [0], [1], [0, 0, 1, 1], [], []>} : vector<32x32xf32>, vector<32x66xf32>, vector<32x66xf32> -> vector<32x66xf32>
    %57 = arith.addf %53, %56 : vector<32x66xf32>
    %c0_36 = arith.constant 0 : index
    %c430 = arith.constant 430 : index
    %58 = vector.load %arg0[%c0_36, %c430] : memref<64x966xf32, #tpu.memory_space<vmem>>, vector<32x32xf32>
    %59 = vector.extract_strided_slice %50 {offsets = [0, 2], sizes = [32, 66], strides = [1, 1]} : vector<32x68xf32> to vector<32x66xf32>
    %cst_37 = arith.constant dense<0.000000e+00> : vector<32x66xf32>
    %60 = tpu.matmul %58, %59, %cst_37 {dimension_numbers = #tpu.dot_dimension_numbers<[1], [0], [0], [1], [0, 0, 1, 1], [], []>} : vector<32x32xf32>, vector<32x66xf32>, vector<32x66xf32> -> vector<32x66xf32>
    %61 = arith.addf %57, %60 : vector<32x66xf32>
    %c0_38 = arith.constant 0 : index
    %c3 = arith.constant 3 : index
    %62 = vector.load %arg2[%c0_38, %c3] : memref<64x14xf32, #tpu.memory_space<vmem>>, vector<32x1xf32>
    %63 = vector.broadcast %62 : vector<32x1xf32> to vector<32x66xf32>
    %64 = arith.addf %61, %63 : vector<32x66xf32>
    %cst_39 = arith.constant 0.000000e+00 : f32
    %65 = vector.broadcast %cst_39 : f32 to vector<32x66xf32>
    %66 = arith.maximumf %64, %65 : vector<32x66xf32>
    %c312 = arith.constant 312 : index
    %c0_40 = arith.constant 0 : index
    %67 = vector.load %arg1[%c312, %c0_40] : memref<1024x68xf32, #tpu.memory_space<vmem>>, vector<66x68xf32>
    %cst_41 = arith.constant dense<0.000000e+00> : vector<32x68xf32>
    %68 = tpu.matmul %66, %67, %cst_41 {dimension_numbers = #tpu.dot_dimension_numbers<[1], [0], [0], [1], [0, 0, 1, 1], [], []>} : vector<32x66xf32>, vector<66x68xf32>, vector<32x68xf32> -> vector<32x68xf32>
    %c0_42 = arith.constant 0 : index
    %c462 = arith.constant 462 : index
    %69 = vector.load %arg0[%c0_42, %c462] : memref<64x966xf32, #tpu.memory_space<vmem>>, vector<32x32xf32>
    %70 = vector.extract_strided_slice %68 {offsets = [0, 0], sizes = [32, 66], strides = [1, 1]} : vector<32x68xf32> to vector<32x66xf32>
    %cst_43 = arith.constant dense<0.000000e+00> : vector<32x66xf32>
    %71 = tpu.matmul %69, %70, %cst_43 {dimension_numbers = #tpu.dot_dimension_numbers<[1], [0], [0], [1], [0, 0, 1, 1], [], []>} : vector<32x32xf32>, vector<32x66xf32>, vector<32x66xf32> -> vector<32x66xf32>
    %c0_44 = arith.constant 0 : index
    %c494 = arith.constant 494 : index
    %72 = vector.load %arg0[%c0_44, %c494] : memref<64x966xf32, #tpu.memory_space<vmem>>, vector<32x32xf32>
    %73 = vector.extract_strided_slice %68 {offsets = [0, 1], sizes = [32, 66], strides = [1, 1]} : vector<32x68xf32> to vector<32x66xf32>
    %cst_45 = arith.constant dense<0.000000e+00> : vector<32x66xf32>
    %74 = tpu.matmul %72, %73, %cst_45 {dimension_numbers = #tpu.dot_dimension_numbers<[1], [0], [0], [1], [0, 0, 1, 1], [], []>} : vector<32x32xf32>, vector<32x66xf32>, vector<32x66xf32> -> vector<32x66xf32>
    %75 = arith.addf %71, %74 : vector<32x66xf32>
    %c0_46 = arith.constant 0 : index
    %c526 = arith.constant 526 : index
    %76 = vector.load %arg0[%c0_46, %c526] : memref<64x966xf32, #tpu.memory_space<vmem>>, vector<32x32xf32>
    %77 = vector.extract_strided_slice %68 {offsets = [0, 2], sizes = [32, 66], strides = [1, 1]} : vector<32x68xf32> to vector<32x66xf32>
    %cst_47 = arith.constant dense<0.000000e+00> : vector<32x66xf32>
    %78 = tpu.matmul %76, %77, %cst_47 {dimension_numbers = #tpu.dot_dimension_numbers<[1], [0], [0], [1], [0, 0, 1, 1], [], []>} : vector<32x32xf32>, vector<32x66xf32>, vector<32x66xf32> -> vector<32x66xf32>
    %79 = arith.addf %75, %78 : vector<32x66xf32>
    %c0_48 = arith.constant 0 : index
    %c4 = arith.constant 4 : index
    %80 = vector.load %arg2[%c0_48, %c4] : memref<64x14xf32, #tpu.memory_space<vmem>>, vector<32x1xf32>
    %81 = vector.broadcast %80 : vector<32x1xf32> to vector<32x66xf32>
    %82 = arith.addf %79, %81 : vector<32x66xf32>
    %c384 = arith.constant 384 : index
    %c0_49 = arith.constant 0 : index
    %83 = vector.load %arg1[%c384, %c0_49] : memref<1024x68xf32, #tpu.memory_space<vmem>>, vector<66x68xf32>
    %cst_50 = arith.constant dense<0.000000e+00> : vector<32x68xf32>
    %84 = tpu.matmul %82, %83, %cst_50 {dimension_numbers = #tpu.dot_dimension_numbers<[1], [0], [0], [1], [0, 0, 1, 1], [], []>} : vector<32x66xf32>, vector<66x68xf32>, vector<32x68xf32> -> vector<32x68xf32>
    %85 = arith.addf %84, %50 : vector<32x68xf32>
    %cst_51 = arith.constant 0.000000e+00 : f32
    %86 = vector.broadcast %cst_51 : f32 to vector<32x68xf32>
    %87 = arith.maximumf %85, %86 : vector<32x68xf32>
    %c0_52 = arith.constant 0 : index
    %c558 = arith.constant 558 : index
    %88 = vector.load %arg0[%c0_52, %c558] : memref<64x966xf32, #tpu.memory_space<vmem>>, vector<16x32xf32>
    %89 = vector.extract_strided_slice %87 {offsets = [0, 0], sizes = [32, 66], strides = [1, 1]} : vector<32x68xf32> to vector<32x66xf32>
    %cst_53 = arith.constant dense<0.000000e+00> : vector<16x66xf32>
    %90 = tpu.matmul %88, %89, %cst_53 {dimension_numbers = #tpu.dot_dimension_numbers<[1], [0], [0], [1], [0, 0, 1, 1], [], []>} : vector<16x32xf32>, vector<32x66xf32>, vector<16x66xf32> -> vector<16x66xf32>
    %c0_54 = arith.constant 0 : index
    %c590 = arith.constant 590 : index
    %91 = vector.load %arg0[%c0_54, %c590] : memref<64x966xf32, #tpu.memory_space<vmem>>, vector<16x32xf32>
    %92 = vector.extract_strided_slice %87 {offsets = [0, 1], sizes = [32, 66], strides = [1, 1]} : vector<32x68xf32> to vector<32x66xf32>
    %cst_55 = arith.constant dense<0.000000e+00> : vector<16x66xf32>
    %93 = tpu.matmul %91, %92, %cst_55 {dimension_numbers = #tpu.dot_dimension_numbers<[1], [0], [0], [1], [0, 0, 1, 1], [], []>} : vector<16x32xf32>, vector<32x66xf32>, vector<16x66xf32> -> vector<16x66xf32>
    %94 = arith.addf %90, %93 : vector<16x66xf32>
    %c0_56 = arith.constant 0 : index
    %c622 = arith.constant 622 : index
    %95 = vector.load %arg0[%c0_56, %c622] : memref<64x966xf32, #tpu.memory_space<vmem>>, vector<16x32xf32>
    %96 = vector.extract_strided_slice %87 {offsets = [0, 2], sizes = [32, 66], strides = [1, 1]} : vector<32x68xf32> to vector<32x66xf32>
    %cst_57 = arith.constant dense<0.000000e+00> : vector<16x66xf32>
    %97 = tpu.matmul %95, %96, %cst_57 {dimension_numbers = #tpu.dot_dimension_numbers<[1], [0], [0], [1], [0, 0, 1, 1], [], []>} : vector<16x32xf32>, vector<32x66xf32>, vector<16x66xf32> -> vector<16x66xf32>
    %98 = arith.addf %94, %97 : vector<16x66xf32>
    %c0_58 = arith.constant 0 : index
    %c5 = arith.constant 5 : index
    %99 = vector.load %arg2[%c0_58, %c5] : memref<64x14xf32, #tpu.memory_space<vmem>>, vector<16x1xf32>
    %100 = vector.broadcast %99 : vector<16x1xf32> to vector<16x66xf32>
    %101 = arith.addf %98, %100 : vector<16x66xf32>
    %cst_59 = arith.constant 0.000000e+00 : f32
    %102 = vector.broadcast %cst_59 : f32 to vector<16x66xf32>
    %103 = arith.maximumf %101, %102 : vector<16x66xf32>
    %c456 = arith.constant 456 : index
    %c0_60 = arith.constant 0 : index
    %104 = vector.load %arg1[%c456, %c0_60] : memref<1024x68xf32, #tpu.memory_space<vmem>>, vector<66x68xf32>
    %cst_61 = arith.constant dense<0.000000e+00> : vector<16x68xf32>
    %105 = tpu.matmul %103, %104, %cst_61 {dimension_numbers = #tpu.dot_dimension_numbers<[1], [0], [0], [1], [0, 0, 1, 1], [], []>} : vector<16x66xf32>, vector<66x68xf32>, vector<16x68xf32> -> vector<16x68xf32>
    %c0_62 = arith.constant 0 : index
    %c654 = arith.constant 654 : index
    %106 = vector.load %arg0[%c0_62, %c654] : memref<64x966xf32, #tpu.memory_space<vmem>>, vector<16x16xf32>
    %107 = vector.extract_strided_slice %105 {offsets = [0, 0], sizes = [16, 66], strides = [1, 1]} : vector<16x68xf32> to vector<16x66xf32>
    %cst_63 = arith.constant dense<0.000000e+00> : vector<16x66xf32>
    %108 = tpu.matmul %106, %107, %cst_63 {dimension_numbers = #tpu.dot_dimension_numbers<[1], [0], [0], [1], [0, 0, 1, 1], [], []>} : vector<16x16xf32>, vector<16x66xf32>, vector<16x66xf32> -> vector<16x66xf32>
    %c0_64 = arith.constant 0 : index
    %c670 = arith.constant 670 : index
    %109 = vector.load %arg0[%c0_64, %c670] : memref<64x966xf32, #tpu.memory_space<vmem>>, vector<16x16xf32>
    %110 = vector.extract_strided_slice %105 {offsets = [0, 1], sizes = [16, 66], strides = [1, 1]} : vector<16x68xf32> to vector<16x66xf32>
    %cst_65 = arith.constant dense<0.000000e+00> : vector<16x66xf32>
    %111 = tpu.matmul %109, %110, %cst_65 {dimension_numbers = #tpu.dot_dimension_numbers<[1], [0], [0], [1], [0, 0, 1, 1], [], []>} : vector<16x16xf32>, vector<16x66xf32>, vector<16x66xf32> -> vector<16x66xf32>
    %112 = arith.addf %108, %111 : vector<16x66xf32>
    %c0_66 = arith.constant 0 : index
    %c686 = arith.constant 686 : index
    %113 = vector.load %arg0[%c0_66, %c686] : memref<64x966xf32, #tpu.memory_space<vmem>>, vector<16x16xf32>
    %114 = vector.extract_strided_slice %105 {offsets = [0, 2], sizes = [16, 66], strides = [1, 1]} : vector<16x68xf32> to vector<16x66xf32>
    %cst_67 = arith.constant dense<0.000000e+00> : vector<16x66xf32>
    %115 = tpu.matmul %113, %114, %cst_67 {dimension_numbers = #tpu.dot_dimension_numbers<[1], [0], [0], [1], [0, 0, 1, 1], [], []>} : vector<16x16xf32>, vector<16x66xf32>, vector<16x66xf32> -> vector<16x66xf32>
    %116 = arith.addf %112, %115 : vector<16x66xf32>
    %c0_68 = arith.constant 0 : index
    %c6 = arith.constant 6 : index
    %117 = vector.load %arg2[%c0_68, %c6] : memref<64x14xf32, #tpu.memory_space<vmem>>, vector<16x1xf32>
    %118 = vector.broadcast %117 : vector<16x1xf32> to vector<16x66xf32>
    %119 = arith.addf %116, %118 : vector<16x66xf32>
    %c528 = arith.constant 528 : index
    %c0_69 = arith.constant 0 : index
    %120 = vector.load %arg1[%c528, %c0_69] : memref<1024x68xf32, #tpu.memory_space<vmem>>, vector<66x68xf32>
    %cst_70 = arith.constant dense<0.000000e+00> : vector<16x68xf32>
    %121 = tpu.matmul %119, %120, %cst_70 {dimension_numbers = #tpu.dot_dimension_numbers<[1], [0], [0], [1], [0, 0, 1, 1], [], []>} : vector<16x66xf32>, vector<66x68xf32>, vector<16x68xf32> -> vector<16x68xf32>
    %c0_71 = arith.constant 0 : index
    %c702 = arith.constant 702 : index
    %122 = vector.load %arg0[%c0_71, %c702] : memref<64x966xf32, #tpu.memory_space<vmem>>, vector<16x32xf32>
    %cst_72 = arith.constant dense<0.000000e+00> : vector<16x68xf32>
    %123 = tpu.matmul %122, %87, %cst_72 {dimension_numbers = #tpu.dot_dimension_numbers<[1], [0], [0], [1], [0, 0, 1, 1], [], []>} : vector<16x32xf32>, vector<32x68xf32>, vector<16x68xf32> -> vector<16x68xf32>
    %c600 = arith.constant 600 : index
    %c0_73 = arith.constant 0 : index
    %124 = vector.load %arg1[%c600, %c0_73] : memref<1024x68xf32, #tpu.memory_space<vmem>>, vector<16x68xf32>
    %125 = arith.addf %123, %124 : vector<16x68xf32>
    %126 = arith.addf %121, %125 : vector<16x68xf32>
    %cst_74 = arith.constant 0.000000e+00 : f32
    %127 = vector.broadcast %cst_74 : f32 to vector<16x68xf32>
    %128 = arith.maximumf %126, %127 : vector<16x68xf32>
    %c0_75 = arith.constant 0 : index
    %c734 = arith.constant 734 : index
    %129 = vector.load %arg0[%c0_75, %c734] : memref<64x966xf32, #tpu.memory_space<vmem>>, vector<16x16xf32>
    %130 = vector.extract_strided_slice %128 {offsets = [0, 0], sizes = [16, 66], strides = [1, 1]} : vector<16x68xf32> to vector<16x66xf32>
    %cst_76 = arith.constant dense<0.000000e+00> : vector<16x66xf32>
    %131 = tpu.matmul %129, %130, %cst_76 {dimension_numbers = #tpu.dot_dimension_numbers<[1], [0], [0], [1], [0, 0, 1, 1], [], []>} : vector<16x16xf32>, vector<16x66xf32>, vector<16x66xf32> -> vector<16x66xf32>
    %c0_77 = arith.constant 0 : index
    %c750 = arith.constant 750 : index
    %132 = vector.load %arg0[%c0_77, %c750] : memref<64x966xf32, #tpu.memory_space<vmem>>, vector<16x16xf32>
    %133 = vector.extract_strided_slice %128 {offsets = [0, 1], sizes = [16, 66], strides = [1, 1]} : vector<16x68xf32> to vector<16x66xf32>
    %cst_78 = arith.constant dense<0.000000e+00> : vector<16x66xf32>
    %134 = tpu.matmul %132, %133, %cst_78 {dimension_numbers = #tpu.dot_dimension_numbers<[1], [0], [0], [1], [0, 0, 1, 1], [], []>} : vector<16x16xf32>, vector<16x66xf32>, vector<16x66xf32> -> vector<16x66xf32>
    %135 = arith.addf %131, %134 : vector<16x66xf32>
    %c0_79 = arith.constant 0 : index
    %c766 = arith.constant 766 : index
    %136 = vector.load %arg0[%c0_79, %c766] : memref<64x966xf32, #tpu.memory_space<vmem>>, vector<16x16xf32>
    %137 = vector.extract_strided_slice %128 {offsets = [0, 2], sizes = [16, 66], strides = [1, 1]} : vector<16x68xf32> to vector<16x66xf32>
    %cst_80 = arith.constant dense<0.000000e+00> : vector<16x66xf32>
    %138 = tpu.matmul %136, %137, %cst_80 {dimension_numbers = #tpu.dot_dimension_numbers<[1], [0], [0], [1], [0, 0, 1, 1], [], []>} : vector<16x16xf32>, vector<16x66xf32>, vector<16x66xf32> -> vector<16x66xf32>
    %139 = arith.addf %135, %138 : vector<16x66xf32>
    %c0_81 = arith.constant 0 : index
    %c7 = arith.constant 7 : index
    %140 = vector.load %arg2[%c0_81, %c7] : memref<64x14xf32, #tpu.memory_space<vmem>>, vector<16x1xf32>
    %141 = vector.broadcast %140 : vector<16x1xf32> to vector<16x66xf32>
    %142 = arith.addf %139, %141 : vector<16x66xf32>
    %cst_82 = arith.constant 0.000000e+00 : f32
    %143 = vector.broadcast %cst_82 : f32 to vector<16x66xf32>
    %144 = arith.maximumf %142, %143 : vector<16x66xf32>
    %c616 = arith.constant 616 : index
    %c0_83 = arith.constant 0 : index
    %145 = vector.load %arg1[%c616, %c0_83] : memref<1024x68xf32, #tpu.memory_space<vmem>>, vector<66x68xf32>
    %cst_84 = arith.constant dense<0.000000e+00> : vector<16x68xf32>
    %146 = tpu.matmul %144, %145, %cst_84 {dimension_numbers = #tpu.dot_dimension_numbers<[1], [0], [0], [1], [0, 0, 1, 1], [], []>} : vector<16x66xf32>, vector<66x68xf32>, vector<16x68xf32> -> vector<16x68xf32>
    %c0_85 = arith.constant 0 : index
    %c782 = arith.constant 782 : index
    %147 = vector.load %arg0[%c0_85, %c782] : memref<64x966xf32, #tpu.memory_space<vmem>>, vector<16x16xf32>
    %148 = vector.extract_strided_slice %146 {offsets = [0, 0], sizes = [16, 66], strides = [1, 1]} : vector<16x68xf32> to vector<16x66xf32>
    %cst_86 = arith.constant dense<0.000000e+00> : vector<16x66xf32>
    %149 = tpu.matmul %147, %148, %cst_86 {dimension_numbers = #tpu.dot_dimension_numbers<[1], [0], [0], [1], [0, 0, 1, 1], [], []>} : vector<16x16xf32>, vector<16x66xf32>, vector<16x66xf32> -> vector<16x66xf32>
    %c0_87 = arith.constant 0 : index
    %c798 = arith.constant 798 : index
    %150 = vector.load %arg0[%c0_87, %c798] : memref<64x966xf32, #tpu.memory_space<vmem>>, vector<16x16xf32>
    %151 = vector.extract_strided_slice %146 {offsets = [0, 1], sizes = [16, 66], strides = [1, 1]} : vector<16x68xf32> to vector<16x66xf32>
    %cst_88 = arith.constant dense<0.000000e+00> : vector<16x66xf32>
    %152 = tpu.matmul %150, %151, %cst_88 {dimension_numbers = #tpu.dot_dimension_numbers<[1], [0], [0], [1], [0, 0, 1, 1], [], []>} : vector<16x16xf32>, vector<16x66xf32>, vector<16x66xf32> -> vector<16x66xf32>
    %153 = arith.addf %149, %152 : vector<16x66xf32>
    %c0_89 = arith.constant 0 : index
    %c814 = arith.constant 814 : index
    %154 = vector.load %arg0[%c0_89, %c814] : memref<64x966xf32, #tpu.memory_space<vmem>>, vector<16x16xf32>
    %155 = vector.extract_strided_slice %146 {offsets = [0, 2], sizes = [16, 66], strides = [1, 1]} : vector<16x68xf32> to vector<16x66xf32>
    %cst_90 = arith.constant dense<0.000000e+00> : vector<16x66xf32>
    %156 = tpu.matmul %154, %155, %cst_90 {dimension_numbers = #tpu.dot_dimension_numbers<[1], [0], [0], [1], [0, 0, 1, 1], [], []>} : vector<16x16xf32>, vector<16x66xf32>, vector<16x66xf32> -> vector<16x66xf32>
    %157 = arith.addf %153, %156 : vector<16x66xf32>
    %c0_91 = arith.constant 0 : index
    %c8 = arith.constant 8 : index
    %158 = vector.load %arg2[%c0_91, %c8] : memref<64x14xf32, #tpu.memory_space<vmem>>, vector<16x1xf32>
    %159 = vector.broadcast %158 : vector<16x1xf32> to vector<16x66xf32>
    %160 = arith.addf %157, %159 : vector<16x66xf32>
    %c688 = arith.constant 688 : index
    %c0_92 = arith.constant 0 : index
    %161 = vector.load %arg1[%c688, %c0_92] : memref<1024x68xf32, #tpu.memory_space<vmem>>, vector<66x68xf32>
    %cst_93 = arith.constant dense<0.000000e+00> : vector<16x68xf32>
    %162 = tpu.matmul %160, %161, %cst_93 {dimension_numbers = #tpu.dot_dimension_numbers<[1], [0], [0], [1], [0, 0, 1, 1], [], []>} : vector<16x66xf32>, vector<66x68xf32>, vector<16x68xf32> -> vector<16x68xf32>
    %163 = arith.addf %162, %128 : vector<16x68xf32>
    %cst_94 = arith.constant 0.000000e+00 : f32
    %164 = vector.broadcast %cst_94 : f32 to vector<16x68xf32>
    %165 = arith.maximumf %163, %164 : vector<16x68xf32>
    %c0_95 = arith.constant 0 : index
    %c830 = arith.constant 830 : index
    %166 = vector.load %arg0[%c0_95, %c830] : memref<64x966xf32, #tpu.memory_space<vmem>>, vector<8x16xf32>
    %167 = vector.extract_strided_slice %165 {offsets = [0, 0], sizes = [16, 66], strides = [1, 1]} : vector<16x68xf32> to vector<16x66xf32>
    %cst_96 = arith.constant dense<0.000000e+00> : vector<8x66xf32>
    %168 = tpu.matmul %166, %167, %cst_96 {dimension_numbers = #tpu.dot_dimension_numbers<[1], [0], [0], [1], [0, 0, 1, 1], [], []>} : vector<8x16xf32>, vector<16x66xf32>, vector<8x66xf32> -> vector<8x66xf32>
    %c0_97 = arith.constant 0 : index
    %c846 = arith.constant 846 : index
    %169 = vector.load %arg0[%c0_97, %c846] : memref<64x966xf32, #tpu.memory_space<vmem>>, vector<8x16xf32>
    %170 = vector.extract_strided_slice %165 {offsets = [0, 1], sizes = [16, 66], strides = [1, 1]} : vector<16x68xf32> to vector<16x66xf32>
    %cst_98 = arith.constant dense<0.000000e+00> : vector<8x66xf32>
    %171 = tpu.matmul %169, %170, %cst_98 {dimension_numbers = #tpu.dot_dimension_numbers<[1], [0], [0], [1], [0, 0, 1, 1], [], []>} : vector<8x16xf32>, vector<16x66xf32>, vector<8x66xf32> -> vector<8x66xf32>
    %172 = arith.addf %168, %171 : vector<8x66xf32>
    %c0_99 = arith.constant 0 : index
    %c862 = arith.constant 862 : index
    %173 = vector.load %arg0[%c0_99, %c862] : memref<64x966xf32, #tpu.memory_space<vmem>>, vector<8x16xf32>
    %174 = vector.extract_strided_slice %165 {offsets = [0, 2], sizes = [16, 66], strides = [1, 1]} : vector<16x68xf32> to vector<16x66xf32>
    %cst_100 = arith.constant dense<0.000000e+00> : vector<8x66xf32>
    %175 = tpu.matmul %173, %174, %cst_100 {dimension_numbers = #tpu.dot_dimension_numbers<[1], [0], [0], [1], [0, 0, 1, 1], [], []>} : vector<8x16xf32>, vector<16x66xf32>, vector<8x66xf32> -> vector<8x66xf32>
    %176 = arith.addf %172, %175 : vector<8x66xf32>
    %c0_101 = arith.constant 0 : index
    %c9 = arith.constant 9 : index
    %177 = vector.load %arg2[%c0_101, %c9] : memref<64x14xf32, #tpu.memory_space<vmem>>, vector<8x1xf32>
    %178 = vector.broadcast %177 : vector<8x1xf32> to vector<8x66xf32>
    %179 = arith.addf %176, %178 : vector<8x66xf32>
    %cst_102 = arith.constant 0.000000e+00 : f32
    %180 = vector.broadcast %cst_102 : f32 to vector<8x66xf32>
    %181 = arith.maximumf %179, %180 : vector<8x66xf32>
    %c760 = arith.constant 760 : index
    %c0_103 = arith.constant 0 : index
    %182 = vector.load %arg1[%c760, %c0_103] : memref<1024x68xf32, #tpu.memory_space<vmem>>, vector<66x36xf32>
    %cst_104 = arith.constant dense<0.000000e+00> : vector<8x36xf32>
    %183 = tpu.matmul %181, %182, %cst_104 {dimension_numbers = #tpu.dot_dimension_numbers<[1], [0], [0], [1], [0, 0, 1, 1], [], []>} : vector<8x66xf32>, vector<66x36xf32>, vector<8x36xf32> -> vector<8x36xf32>
    %c0_105 = arith.constant 0 : index
    %c878 = arith.constant 878 : index
    %184 = vector.load %arg0[%c0_105, %c878] : memref<64x966xf32, #tpu.memory_space<vmem>>, vector<8x8xf32>
    %185 = vector.extract_strided_slice %183 {offsets = [0, 0], sizes = [8, 34], strides = [1, 1]} : vector<8x36xf32> to vector<8x34xf32>
    %cst_106 = arith.constant dense<0.000000e+00> : vector<8x34xf32>
    %186 = tpu.matmul %184, %185, %cst_106 {dimension_numbers = #tpu.dot_dimension_numbers<[1], [0], [0], [1], [0, 0, 1, 1], [], []>} : vector<8x8xf32>, vector<8x34xf32>, vector<8x34xf32> -> vector<8x34xf32>
    %c0_107 = arith.constant 0 : index
    %c886 = arith.constant 886 : index
    %187 = vector.load %arg0[%c0_107, %c886] : memref<64x966xf32, #tpu.memory_space<vmem>>, vector<8x8xf32>
    %188 = vector.extract_strided_slice %183 {offsets = [0, 1], sizes = [8, 34], strides = [1, 1]} : vector<8x36xf32> to vector<8x34xf32>
    %cst_108 = arith.constant dense<0.000000e+00> : vector<8x34xf32>
    %189 = tpu.matmul %187, %188, %cst_108 {dimension_numbers = #tpu.dot_dimension_numbers<[1], [0], [0], [1], [0, 0, 1, 1], [], []>} : vector<8x8xf32>, vector<8x34xf32>, vector<8x34xf32> -> vector<8x34xf32>
    %190 = arith.addf %186, %189 : vector<8x34xf32>
    %c0_109 = arith.constant 0 : index
    %c894 = arith.constant 894 : index
    %191 = vector.load %arg0[%c0_109, %c894] : memref<64x966xf32, #tpu.memory_space<vmem>>, vector<8x8xf32>
    %192 = vector.extract_strided_slice %183 {offsets = [0, 2], sizes = [8, 34], strides = [1, 1]} : vector<8x36xf32> to vector<8x34xf32>
    %cst_110 = arith.constant dense<0.000000e+00> : vector<8x34xf32>
    %193 = tpu.matmul %191, %192, %cst_110 {dimension_numbers = #tpu.dot_dimension_numbers<[1], [0], [0], [1], [0, 0, 1, 1], [], []>} : vector<8x8xf32>, vector<8x34xf32>, vector<8x34xf32> -> vector<8x34xf32>
    %194 = arith.addf %190, %193 : vector<8x34xf32>
    %c0_111 = arith.constant 0 : index
    %c10 = arith.constant 10 : index
    %195 = vector.load %arg2[%c0_111, %c10] : memref<64x14xf32, #tpu.memory_space<vmem>>, vector<8x1xf32>
    %196 = vector.broadcast %195 : vector<8x1xf32> to vector<8x34xf32>
    %197 = arith.addf %194, %196 : vector<8x34xf32>
    %c832 = arith.constant 832 : index
    %c0_112 = arith.constant 0 : index
    %198 = vector.load %arg1[%c832, %c0_112] : memref<1024x68xf32, #tpu.memory_space<vmem>>, vector<34x36xf32>
    %cst_113 = arith.constant dense<0.000000e+00> : vector<8x36xf32>
    %199 = tpu.matmul %197, %198, %cst_113 {dimension_numbers = #tpu.dot_dimension_numbers<[1], [0], [0], [1], [0, 0, 1, 1], [], []>} : vector<8x34xf32>, vector<34x36xf32>, vector<8x36xf32> -> vector<8x36xf32>
    %c0_114 = arith.constant 0 : index
    %c902 = arith.constant 902 : index
    %200 = vector.load %arg0[%c0_114, %c902] : memref<64x966xf32, #tpu.memory_space<vmem>>, vector<8x16xf32>
    %cst_115 = arith.constant dense<0.000000e+00> : vector<8x68xf32>
    %201 = tpu.matmul %200, %165, %cst_115 {dimension_numbers = #tpu.dot_dimension_numbers<[1], [0], [0], [1], [0, 0, 1, 1], [], []>} : vector<8x16xf32>, vector<16x68xf32>, vector<8x68xf32> -> vector<8x68xf32>
    %c0_116 = arith.constant 0 : index
    %c11 = arith.constant 11 : index
    %202 = vector.load %arg2[%c0_116, %c11] : memref<64x14xf32, #tpu.memory_space<vmem>>, vector<8x1xf32>
    %203 = vector.broadcast %202 : vector<8x1xf32> to vector<8x68xf32>
    %204 = arith.addf %201, %203 : vector<8x68xf32>
    %c872 = arith.constant 872 : index
    %c0_117 = arith.constant 0 : index
    %205 = vector.load %arg1[%c872, %c0_117] : memref<1024x68xf32, #tpu.memory_space<vmem>>, vector<68x36xf32>
    %cst_118 = arith.constant dense<0.000000e+00> : vector<8x36xf32>
    %206 = tpu.matmul %204, %205, %cst_118 {dimension_numbers = #tpu.dot_dimension_numbers<[1], [0], [0], [1], [0, 0, 1, 1], [], []>} : vector<8x68xf32>, vector<68x36xf32>, vector<8x36xf32> -> vector<8x36xf32>
    %207 = arith.addf %199, %206 : vector<8x36xf32>
    %cst_119 = arith.constant 0.000000e+00 : f32
    %208 = vector.broadcast %cst_119 : f32 to vector<8x36xf32>
    %209 = arith.maximumf %207, %208 : vector<8x36xf32>
    %c0_120 = arith.constant 0 : index
    %c918 = arith.constant 918 : index
    %210 = vector.load %arg0[%c0_120, %c918] : memref<64x966xf32, #tpu.memory_space<vmem>>, vector<8x8xf32>
    %211 = vector.extract_strided_slice %209 {offsets = [0, 0], sizes = [8, 34], strides = [1, 1]} : vector<8x36xf32> to vector<8x34xf32>
    %cst_121 = arith.constant dense<0.000000e+00> : vector<8x34xf32>
    %212 = tpu.matmul %210, %211, %cst_121 {dimension_numbers = #tpu.dot_dimension_numbers<[1], [0], [0], [1], [0, 0, 1, 1], [], []>} : vector<8x8xf32>, vector<8x34xf32>, vector<8x34xf32> -> vector<8x34xf32>
    %c0_122 = arith.constant 0 : index
    %c926 = arith.constant 926 : index
    %213 = vector.load %arg0[%c0_122, %c926] : memref<64x966xf32, #tpu.memory_space<vmem>>, vector<8x8xf32>
    %214 = vector.extract_strided_slice %209 {offsets = [0, 1], sizes = [8, 34], strides = [1, 1]} : vector<8x36xf32> to vector<8x34xf32>
    %cst_123 = arith.constant dense<0.000000e+00> : vector<8x34xf32>
    %215 = tpu.matmul %213, %214, %cst_123 {dimension_numbers = #tpu.dot_dimension_numbers<[1], [0], [0], [1], [0, 0, 1, 1], [], []>} : vector<8x8xf32>, vector<8x34xf32>, vector<8x34xf32> -> vector<8x34xf32>
    %216 = arith.addf %212, %215 : vector<8x34xf32>
    %c0_124 = arith.constant 0 : index
    %c934 = arith.constant 934 : index
    %217 = vector.load %arg0[%c0_124, %c934] : memref<64x966xf32, #tpu.memory_space<vmem>>, vector<8x8xf32>
    %218 = vector.extract_strided_slice %209 {offsets = [0, 2], sizes = [8, 34], strides = [1, 1]} : vector<8x36xf32> to vector<8x34xf32>
    %cst_125 = arith.constant dense<0.000000e+00> : vector<8x34xf32>
    %219 = tpu.matmul %217, %218, %cst_125 {dimension_numbers = #tpu.dot_dimension_numbers<[1], [0], [0], [1], [0, 0, 1, 1], [], []>} : vector<8x8xf32>, vector<8x34xf32>, vector<8x34xf32> -> vector<8x34xf32>
    %220 = arith.addf %216, %219 : vector<8x34xf32>
    %c0_126 = arith.constant 0 : index
    %c12 = arith.constant 12 : index
    %221 = vector.load %arg2[%c0_126, %c12] : memref<64x14xf32, #tpu.memory_space<vmem>>, vector<8x1xf32>
    %222 = vector.broadcast %221 : vector<8x1xf32> to vector<8x34xf32>
    %223 = arith.addf %220, %222 : vector<8x34xf32>
    %cst_127 = arith.constant 0.000000e+00 : f32
    %224 = vector.broadcast %cst_127 : f32 to vector<8x34xf32>
    %225 = arith.maximumf %223, %224 : vector<8x34xf32>
    %c944 = arith.constant 944 : index
    %c0_128 = arith.constant 0 : index
    %226 = vector.load %arg1[%c944, %c0_128] : memref<1024x68xf32, #tpu.memory_space<vmem>>, vector<34x36xf32>
    %cst_129 = arith.constant dense<0.000000e+00> : vector<8x36xf32>
    %227 = tpu.matmul %225, %226, %cst_129 {dimension_numbers = #tpu.dot_dimension_numbers<[1], [0], [0], [1], [0, 0, 1, 1], [], []>} : vector<8x34xf32>, vector<34x36xf32>, vector<8x36xf32> -> vector<8x36xf32>
    %c0_130 = arith.constant 0 : index
    %c942 = arith.constant 942 : index
    %228 = vector.load %arg0[%c0_130, %c942] : memref<64x966xf32, #tpu.memory_space<vmem>>, vector<8x8xf32>
    %229 = vector.extract_strided_slice %227 {offsets = [0, 0], sizes = [8, 34], strides = [1, 1]} : vector<8x36xf32> to vector<8x34xf32>
    %cst_131 = arith.constant dense<0.000000e+00> : vector<8x34xf32>
    %230 = tpu.matmul %228, %229, %cst_131 {dimension_numbers = #tpu.dot_dimension_numbers<[1], [0], [0], [1], [0, 0, 1, 1], [], []>} : vector<8x8xf32>, vector<8x34xf32>, vector<8x34xf32> -> vector<8x34xf32>
    %c0_132 = arith.constant 0 : index
    %c950 = arith.constant 950 : index
    %231 = vector.load %arg0[%c0_132, %c950] : memref<64x966xf32, #tpu.memory_space<vmem>>, vector<8x8xf32>
    %232 = vector.extract_strided_slice %227 {offsets = [0, 1], sizes = [8, 34], strides = [1, 1]} : vector<8x36xf32> to vector<8x34xf32>
    %cst_133 = arith.constant dense<0.000000e+00> : vector<8x34xf32>
    %233 = tpu.matmul %231, %232, %cst_133 {dimension_numbers = #tpu.dot_dimension_numbers<[1], [0], [0], [1], [0, 0, 1, 1], [], []>} : vector<8x8xf32>, vector<8x34xf32>, vector<8x34xf32> -> vector<8x34xf32>
    %234 = arith.addf %230, %233 : vector<8x34xf32>
    %c0_134 = arith.constant 0 : index
    %c958 = arith.constant 958 : index
    %235 = vector.load %arg0[%c0_134, %c958] : memref<64x966xf32, #tpu.memory_space<vmem>>, vector<8x8xf32>
    %236 = vector.extract_strided_slice %227 {offsets = [0, 2], sizes = [8, 34], strides = [1, 1]} : vector<8x36xf32> to vector<8x34xf32>
    %cst_135 = arith.constant dense<0.000000e+00> : vector<8x34xf32>
    %237 = tpu.matmul %235, %236, %cst_135 {dimension_numbers = #tpu.dot_dimension_numbers<[1], [0], [0], [1], [0, 0, 1, 1], [], []>} : vector<8x8xf32>, vector<8x34xf32>, vector<8x34xf32> -> vector<8x34xf32>
    %238 = arith.addf %234, %237 : vector<8x34xf32>
    %c0_136 = arith.constant 0 : index
    %c13 = arith.constant 13 : index
    %239 = vector.load %arg2[%c0_136, %c13] : memref<64x14xf32, #tpu.memory_space<vmem>>, vector<8x1xf32>
    %240 = vector.broadcast %239 : vector<8x1xf32> to vector<8x34xf32>
    %241 = arith.addf %238, %240 : vector<8x34xf32>
    %c984 = arith.constant 984 : index
    %c0_137 = arith.constant 0 : index
    %242 = vector.load %arg1[%c984, %c0_137] : memref<1024x68xf32, #tpu.memory_space<vmem>>, vector<34x36xf32>
    %cst_138 = arith.constant dense<0.000000e+00> : vector<8x36xf32>
    %243 = tpu.matmul %241, %242, %cst_138 {dimension_numbers = #tpu.dot_dimension_numbers<[1], [0], [0], [1], [0, 0, 1, 1], [], []>} : vector<8x34xf32>, vector<34x36xf32>, vector<8x36xf32> -> vector<8x36xf32>
    %244 = arith.addf %243, %209 : vector<8x36xf32>
    %cst_139 = arith.constant 0.000000e+00 : f32
    %245 = vector.broadcast %cst_139 : f32 to vector<8x36xf32>
    %246 = arith.maximumf %244, %245 : vector<8x36xf32>
    %c0_140 = arith.constant 0 : index
    %c0_141 = arith.constant 0 : index
    %247 = vector.load %arg3[%c0_140, %c0_141] : memref<37x128xf32, #tpu.memory_space<vmem>>, vector<36x128xf32>
    %c36 = arith.constant 36 : index
    %c0_142 = arith.constant 0 : index
    %248 = vector.load %arg3[%c36, %c0_142] : memref<37x128xf32, #tpu.memory_space<vmem>>, vector<1x128xf32>
    %cst_143 = arith.constant dense<0.000000e+00> : vector<8x128xf32>
    %249 = tpu.matmul %246, %247, %cst_143 {dimension_numbers = #tpu.dot_dimension_numbers<[1], [0], [0], [1], [0, 0, 1, 1], [], []>} : vector<8x36xf32>, vector<36x128xf32>, vector<8x128xf32> -> vector<8x128xf32>
    %250 = vector.broadcast %248 : vector<1x128xf32> to vector<8x128xf32>
    %251 = arith.addf %249, %250 : vector<8x128xf32>
    %c0_144 = arith.constant 0 : index
    %c0_145 = arith.constant 0 : index
    %252 = vector.load %arg5[%c0_144, %c0_145] : memref<8x128xf32, #tpu.memory_space<vmem>>, vector<8x128xf32>
    tpu.vector_store %arg5[%c0_144, %c0_145], %251 {strides = array<i32>} : memref<8x128xf32, #tpu.memory_space<vmem>>, vector<8x128xf32>,
    return
  }
}

</mosaic_0001>

<bundles_post_ra>
// kernel: tpu_custom_call.1
= control target key start
LH: loop header
LB: loop body
LE: loop exit
PB: predicated region body
PF: predicated region fallthrough
CT: control target
= control target key end

     0   :  { %vm106_vm0 = vcmask 1045504   ;;  %v3263_v2 = vmov 0   ;;  %vm81_vm1 = vcmask 113664   ;;  %s4484_s0 = inlined_call_operand.vmem [shape: f32[64,966], index: 0, kind: input, shape index: {}]   ;;  %s4485_s1 = inlined_call_operand.vmem [shape: f32[1024,68], index: 1, kind: input, shape index: {}]   ;;  %s4486_s2 = inlined_call_operand.vmem [shape: f32[64,14], index: 2, kind: input, shape index: {}]   ;;  %s4487_s3 = inlined_call_operand.vmem [shape: f32[37,128], index: 3, kind: input, shape index: {}]   ;;  %s4488_s4 = inlined_call_operand.vmem [shape: f32[14,134], index: 4, kind: input, shape index: {}]   ;;  %s4489_s5 = inlined_call_operand.hbm [shape: f32[8,128], index: 5, kind: output, shape index: {}]  }
   0x1   :  { %v23_v0 = vld [vmem:[%s4488_s4 + $0x10] sm:$0x3f]  ;;  %v24_v1 = vld [vmem:[%s4488_s4 + $0x18] sm:$0x3f]  ;;  %3042 = vset.pattern.permute.xlu0 %v3263_v2  ;;  %v3333_v3 = vld [vmem:[%s4486_s2] sm:$0xff]  ;;  %3043 = vset.pattern.permute.xlu1 %v3263_v2 }
   0x2   :  { %2846 = vmatpush.msk.msra.mxu0 %vm106_vm0, %v23_v0  ;;  %v21_v4 = vld [vmem:[%s4488_s4] sm:$0xff]  ;;  %v22_v5 = vld [vmem:[%s4488_s4 + $0x8] sm:$0xff]  ;;  %2855 = vmatpush.msk.msra.mxu1 %vm106_vm0, %v24_v1  ;;  %v3351_v7 = vld [vmem:[%s4486_s2 + $0x10] sm:$0xff] }
   0x3   :  { %43 = vperm.xlu0 %3042, %v3333_v3   ;;  %v3346_v6 = vld [vmem:[%s4484_s0] sm:$0xff]  ;;  %53 = vperm.xlu1 %3043, %v3351_v7  }
   0x4   :  { %128 = vmatpush.msra.mxu0 %v21_v4  ;;  %169 = vmatpush.msra.mxu1 %v22_v5 }
   0x5   :  { %2847 = vmatmul.msk.f32.vlgmr.msra.gmra.mxu0 %vm81_vm1, %v3346_v6  ;;  %2856 = vmatmul.msk.f32.vlgmr.msra.gmra.mxu1 %vm81_vm1, %v3346_v6 }
   0x6   :  { %3044 = vset.pattern.permute.xlu2 %v3263_v2 }
   0x7   :  { %10 = vsyncpa [#allocation3], 0  ;;  %v3361_v8 = vld [vmem:[%s4486_s2 + $0x8] sm:$0xff]  ;;  %v3366_v9 = vld [vmem:[%s4484_s0 + $0x40] sm:$0xff]  ;;  %vm228_vm2 = vcmask 48128   ;;  %s3264_s14 = smov 50  }
   0x8   :  { %v3372_v10 = vld [vmem:[%s4486_s2 + $0x18] sm:$0xff]  ;;  %v39_v11 = vld [vmem:[%s4486_s2 + $0x30] sm:$0xff]  ;;  %v3385_v12 = vld [vmem:[%s4484_s0 + $0x80] sm:$0xff]  ;;  %vm617_vm3 = vcmask 1041408   ;;  %s3265_s19 = smov 126   ;;  %s3266_s20 = smov 127  }
   0x9   :  { %v40_v13 = vld [vmem:[%s4486_s2 + $0x38] sm:$0xff]  ;;  %v3397_v14 = vld [vmem:[%s4484_s0 + $0xc0] sm:$0xff]  ;;  %v225_v17 = vld [vmem:[%s4485_s1 + $0x70] sm:$0xff]  ;;  %s3267_s11 = smov 114   ;;  %vm370_vm4 = vcmask 408576   ;;  %vm407_vm5 = vcmask 523264  }
   0xa   :  { %v37_v15 = vld [vmem:[%s4486_s2 + $0x20] sm:$0xff]  ;;  %v226_v16 = vld [vmem:[%s4485_s1 + $0x78] sm:$0xff]  ;;  %v224_v18 = vld [vmem:[%s4485_s1 + $0x68] sm:$0xff]  ;;  %vm604_vm6 = vcmask 539648   ;;  %s3269_s21 = smov 18   ;;  %vm703_vm7 = vcmask 261120  }
   0xb   :  { %48 = vperm.xlu0 %3042, %v3361_v8   ;;  %58 = vperm.xlu1 %3043, %v3372_v10   ;;  %v29_v19 = vld [vmem:[%s4484_s0 + $0x100] sm:$0xff]  ;;  %v38_v21 = vld [vmem:[%s4486_s2 + $0x28] sm:$0xff]  ;;  %v222_v22 = vld [vmem:[%s4485_s1 + $0x58] sm:$0xff]  ;;  %s3270_s28 = smov 82   ;;  %vm682_vm8 = vcmask 146432   ;;  %s3275_s22 = smov 98  }
   0xc   :  { %63 = vperm.xlu2 %3044, %v37_v15   ;;  %256 = vmatpush.msra.mxu2 %v226_v16  ;;  %v223_v20 = vld [vmem:[%s4485_s1 + $0x60] sm:$0xff]  ;;  %v221_v23 = vld [vmem:[%s4485_s1 + $0x50] sm:$0xff]  ;;  %v220_v24 = vld [vmem:[%s4485_s1 + $0x48] sm:$0xff]  ;;  %s3276_s23 = smov 66   ;;  %vm1719_vm9 = vcmask 130048   ;;  %s3278_s24 = smov 34  }
   0xd   :  { %2848 = vmatmul.msk.f32.gmra.mxu0 %vm81_vm1, %v3366_v9  ;;  %2857 = vmatmul.msk.f32.gmra.mxu1 %vm81_vm1, %v3366_v9  ;;  %v30_v25 = vld [vmem:[%s4484_s0 + $0x140] sm:$0xff]  ;;  %v218_v29 = vld [vmem:[%s4485_s1 + $0x38] sm:$0xff]  ;;  %v217_v30 = vld [vmem:[%s4485_s1 + $0x30] sm:$0xff]  ;;  %s3279_s4 = smov 2   ;;  %vm1985_vm10 = vcmask 15360   ;;  %s3284_s9 = smov 122  }
   0xe   :  { %257 = vmatpush.msra.mxu2 %v225_v17  ;;  %v31_v26 = vld [vmem:[%s4484_s0 + $0x180] sm:$0xff]  ;;  %v216_v31 = vld [vmem:[%s4485_s1 + $0x28] sm:$0xff]  ;;  %v214_v33 = vld [vmem:[%s4485_s1 + $0x18] sm:$0xff]  ;;  %vm2376_vm11 = vcmask 64512   ;;  %vm2509_vm12 = vcmask 1043456   ;;  %vm2533_vm13 = vcmask 277504  }
   0xf   :  { %v32_v27 = vld [vmem:[%s4484_s0 + $0x1c0] sm:$0xff]  ;;  %v213_v34 = vld [vmem:[%s4485_s1 + $0x10] sm:$0xff]  ;;  %v212_v35 = vld [vmem:[%s4485_s1 + $0x8] sm:$0xff]  ;;  %vm2505_vm14 = vcmask 556032   ;;  %s3288_s13 = smov 90   ;;  %s3290_s6 = smov 74  }
  0x10   :  { %258 = vmatpush.msra.mxu2 %v224_v18  ;;  %v219_v28 = vld [vmem:[%s4485_s1 + $0x40] sm:$0xff]  ;;  %vm2802_vm15 = vcmask 293888  }
  0x11   :  { %v215_v32 = vld [vmem:[%s4485_s1 + $0x20] sm:$0xff] }
  0x12   :  { %259 = vmatpush.msra.mxu2 %v223_v20  ;;  %v211_v36 = vld [vmem:[%s4485_s1] sm:$0xff] }
  0x13   :  { %73 = vperm.xlu0 %3042, %v39_v11   ;;  %78 = vperm.xlu1 %3043, %v40_v13   ;;  %v227_v37 = vld [vmem:[%s4485_s1 + $0x80] sm:$0x3f] }
  0x14   :  { %68 = vperm.xlu2 %3044, %v38_v21   ;;  %260 = vmatpush.msra.mxu2 %v222_v22 }
  0x15   :  { %2849 = vmatmul.msk.f32.gmra.mxu0 %vm81_vm1, %v3385_v12  ;;  %2858 = vmatmul.msk.f32.gmra.mxu1 %vm81_vm1, %v3385_v12 }
  0x16   :  { %261 = vmatpush.msra.mxu2 %v221_v23  ;;  %2864 = vmatpush.msk.msra.mxu3 %vm106_vm0, %v227_v37 }
  0x18   :  { %262 = vmatpush.msra.mxu2 %v220_v24 }
  0x1a   :  { %263 = vmatpush.msra.mxu2 %v219_v28 }
  0x1c   :  { %264 = vmatpush.msra.mxu2 %v218_v29  ;;  %354 = vrot.lane.b32.xlu2 %v3346_v6, %s3264_s14 }
  0x1d   :  { %2850 = vmatmul.msk.f32.gmra.mxu0 %vm81_vm1, %v3397_v14  ;;  %2859 = vmatmul.msk.f32.gmra.mxu1 %vm81_vm1, %v3397_v14 }
  0x1e   :  { %265 = vmatpush.msra.mxu2 %v217_v30 }
  0x20   :  { %266 = vmatpush.msra.mxu2 %v216_v31 }
  0x22   :  { %267 = vmatpush.msra.mxu2 %v215_v32 }
  0x24   :  { %268 = vmatpush.msra.mxu2 %v214_v33 }
  0x25   :  { %2851 = vmatmul.msk.f32.gmra.mxu0 %vm81_vm1, %v29_v19  ;;  %2860 = vmatmul.msk.f32.gmra.mxu1 %vm81_vm1, %v29_v19 }
  0x26   :  { %269 = vmatpush.msra.mxu2 %v213_v34 }
  0x28   :  { %270 = vmatpush.msra.mxu2 %v212_v35 }
  0x2a   :  { %271 = vmatpush.msra.mxu2 %v211_v36 }
  0x2d   :  { %2852 = vmatmul.msk.f32.gmra.mxu0 %vm81_vm1, %v30_v25  ;;  %2861 = vmatmul.msk.f32.gmra.mxu1 %vm81_vm1, %v30_v25 }
  0x35   :  { %2853 = vmatmul.msk.f32.gmra.mxu0 %vm81_vm1, %v31_v26  ;;  %2862 = vmatmul.msk.f32.gmra.mxu1 %vm81_vm1, %v31_v26 }
  0x3d   :  { %2854 = vmatmul.msk.f32.gmra.mxu0 %vm81_vm1, %v32_v27  ;;  %2863 = vmatmul.msk.f32.gmra.mxu1 %vm81_vm1, %v32_v27 }
  0x66   :  { %v64_v2 = vpop.permute.xlu2 %63 }
  0x6e   :  { %v69_v17 = vpop.permute.xlu2 %68 }
  0x75   :  { %v44_v38 = vpop.permute.xlu0 %43  ;;  %v54_v52 = vpop.permute.xlu1 %53 }
  0x7d   :  { %v49_v45 = vpop.permute.xlu0 %48  ;;  %v59_v59 = vpop.permute.xlu1 %58 }
  0x82   :  { %v130_v39 = vpop.f32.mrf.mxu0  ;;  %v171_v41 = vpop.f32.mrf.mxu1 }
  0x83   :  { %v131_v40 = vadd.f32 %v130_v39, %v44_v38  ;;  %v172_v42 = vadd.f32 %v171_v41, %v44_v38 }
  0x85   :  { %v195_v43 = vmax.f32 %v131_v40, 0.0  ;;  %v196_v44 = vmax.f32 %v172_v42, 0.0  ;;  %v74_v24 = vpop.permute.xlu0 %73  ;;  %v79_v31 = vpop.permute.xlu1 %78 }
  0x87   :  { %272 = vmatmul.f32.vlgmr.msra.gmra.mxu2 %v195_v43  ;;  %2865 = vmatmul.msk.f32.vlgmr.msra.gmra.mxu3 %vm228_vm2, %v196_v44  ;;  %v603_v44 = vld [vmem:[%s4485_s1 + $0xc8] sm:$0x3] }
  0x88   :  { %2885 = vmatpush.msk.msrb.mxu2 %vm617_vm3, %v603_v44  ;;  %v3268_v44 = vmov 1  }
  0x89   :  { %3086 = vset.pattern.permute.xlu0 %v3268_v44  ;;  %3087 = vset.pattern.permute.xlu1 %v3268_v44 }
  0x8a   :  { %v133_v46 = vpop.f32.mrf.mxu0  ;;  %v174_v48 = vpop.f32.mrf.mxu1  ;;  %3085 = vset.pattern.permute.xlu2 %v3268_v44 }
  0x8b   :  { %v134_v47 = vadd.f32 %v133_v46, %v49_v45  ;;  %v175_v49 = vadd.f32 %v174_v48, %v49_v45  ;;  %v602_v45 = vld [vmem:[%s4485_s1 + $0xc0] sm:$0xff] }
  0x8c   :  { %629 = vmatpush.msrb.mxu2 %v602_v45 }
  0x8d   :  { %v197_v50 = vmax.f32 %v134_v47, 0.0  ;;  %v198_v51 = vmax.f32 %v175_v49, 0.0  ;;  %v601_v47 = vld [vmem:[%s4485_s1 + $0xb8] sm:$0xff]  ;;  %v600_v49 = vld [vmem:[%s4485_s1 + $0xb0] sm:$0xff] }
  0x8e   :  { %630 = vmatpush.msrb.mxu2 %v601_v47 }
  0x8f   :  { %275 = vmatmul.f32.gmra.mxu2 %v197_v50  ;;  %2866 = vmatmul.msk.f32.gmra.mxu3 %vm228_vm2, %v198_v51  ;;  %v599_v51 = vld [vmem:[%s4485_s1 + $0xa8] sm:$0xff] }
  0x90   :  { %631 = vmatpush.msrb.mxu2 %v600_v49 }
  0x92   :  { %v136_v53 = vpop.f32.mrf.mxu0  ;;  %v177_v55 = vpop.f32.mrf.mxu1  ;;  %632 = vmatpush.msrb.mxu2 %v599_v51 }
  0x93   :  { %v137_v54 = vadd.f32 %v136_v53, %v54_v52  ;;  %v178_v56 = vadd.f32 %v177_v55, %v54_v52  ;;  %v598_v52 = vld [vmem:[%s4485_s1 + $0xa0] sm:$0xff]  ;;  %v597_v53 = vld [vmem:[%s4485_s1 + $0x98] sm:$0xff]  ;;  %v596_v55 = vld [vmem:[%s4485_s1 + $0x90] sm:$0xff] }
  0x94   :  { %633 = vmatpush.msrb.mxu2 %v598_v52 }
  0x95   :  { %v199_v57 = vmax.f32 %v137_v54, 0.0  ;;  %v200_v58 = vmax.f32 %v178_v56, 0.0 }
  0x96   :  { %634 = vmatpush.msrb.mxu2 %v597_v53 }
  0x97   :  { %278 = vmatmul.f32.gmra.mxu2 %v199_v57  ;;  %2867 = vmatmul.msk.f32.gmra.mxu3 %vm228_vm2, %v200_v58 }
  0x98   :  { %635 = vmatpush.msrb.mxu2 %v596_v55 }
  0x9a   :  { %v139_v60 = vpop.f32.mrf.mxu0  ;;  %v180_v62 = vpop.f32.mrf.mxu1 }
  0x9b   :  { %v140_v61 = vadd.f32 %v139_v60, %v59_v59  ;;  %v181_v63 = vadd.f32 %v180_v62, %v59_v59  ;;  %v595_v59 = vld [vmem:[%s4485_s1 + $0x88] sm:$0xff] }
  0x9c   :  { %636 = vmatpush.msrb.mxu2 %v595_v59 }
  0x9d   :  { %v201_v0 = vmax.f32 %v140_v61, 0.0  ;;  %v202_v1 = vmax.f32 %v181_v63, 0.0 }
  0x9f   :  { %281 = vmatmul.f32.gmra.mxu2 %v201_v0  ;;  %2868 = vmatmul.msk.f32.gmra.mxu3 %vm228_vm2, %v202_v1 }
  0xa2   :  { %v142_v4 = vpop.f32.mrf.mxu0  ;;  %v183_v11 = vpop.f32.mrf.mxu1 }
  0xa3   :  { %v143_v5 = vadd.f32 %v142_v4, %v64_v2  ;;  %v184_v13 = vadd.f32 %v183_v11, %v64_v2 }
  0xa5   :  { %v203_v15 = vmax.f32 %v143_v5, 0.0  ;;  %v204_v16 = vmax.f32 %v184_v13, 0.0  ;;  %v3534_v13 = vld [vmem:[%s4484_s0 + $0x8] sm:$0xff] }
  0xa7   :  { %284 = vmatmul.f32.gmra.mxu2 %v203_v15  ;;  %2869 = vmatmul.msk.f32.gmra.mxu3 %vm228_vm2, %v204_v16 }
  0xaa   :  { %v145_v18 = vpop.f32.mrf.mxu0  ;;  %v186_v20 = vpop.f32.mrf.mxu1 }
  0xab   :  { %v146_v19 = vadd.f32 %v145_v18, %v69_v17  ;;  %v187_v21 = vadd.f32 %v186_v20, %v69_v17  ;;  %v3548_v20 = vld [vmem:[%s4484_s0 + $0x48] sm:$0xff] }
  0xad   :  { %v205_v22 = vmax.f32 %v146_v19, 0.0  ;;  %v206_v23 = vmax.f32 %v187_v21, 0.0  ;;  %v355_v21 = vpop.permute.xlu2 %354 }
  0xaf   :  { %287 = vmatmul.f32.gmra.mxu2 %v205_v22  ;;  %2870 = vmatmul.msk.f32.gmra.mxu3 %vm228_vm2, %v206_v23 }
  0xb2   :  { %v148_v25 = vpop.f32.mrf.mxu0  ;;  %v189_v27 = vpop.f32.mrf.mxu1 }
  0xb3   :  { %v149_v26 = vadd.f32 %v148_v25, %v74_v24  ;;  %v190_v28 = vadd.f32 %v189_v27, %v74_v24 }
  0xb5   :  { %v207_v29 = vmax.f32 %v149_v26, 0.0  ;;  %v208_v30 = vmax.f32 %v190_v28, 0.0 }
  0xb7   :  { %290 = vmatmul.f32.gmra.mxu2 %v207_v29  ;;  %2871 = vmatmul.msk.f32.gmra.mxu3 %vm228_vm2, %v208_v30 }
  0xba   :  { %v151_v32 = vpop.f32.mrf.mxu0  ;;  %v192_v34 = vpop.f32.mrf.mxu1 }
  0xbb   :  { %v152_v33 = vadd.f32 %v151_v32, %v79_v31  ;;  %v193_v35 = vadd.f32 %v192_v34, %v79_v31 }
  0xbd   :  { %v209_v36 = vmax.f32 %v152_v33, 0.0  ;;  %v210_v37 = vmax.f32 %v193_v35, 0.0 }
  0xbf   :  { %293 = vmatmul.f32.gmra.mxu2 %v209_v36  ;;  %2872 = vmatmul.msk.f32.gmra.mxu3 %vm228_vm2, %v210_v37 }
 0x10a   :  { %v273_v38 = vpop.f32.mrf.mxu2  ;;  %v314_v39 = vpop.f32.mrf.mxu3 }
 0x10b   :  { %v3491_v42 = vadd.f32 %v314_v39, %v273_v38 }
 0x112   :  { %v276_v40 = vpop.f32.mrf.mxu2  ;;  %v317_v41 = vpop.f32.mrf.mxu3 }
 0x113   :  { %v3493_v43 = vadd.f32 %v317_v41, %v276_v40 }
 0x115   :  { %v3065_v46 = vpack.i.bf16 %v3491_v42, %v3493_v43 }
 0x117   :  { %3066 = vrot.lane.b32.xlu2 %v3065_v46, %s3265_s19  ;;  %3046 = vrot.lane.b32.xlu0 %v3065_v46, %s3266_s20 }
 0x11a   :  { %v279_v48 = vpop.f32.mrf.mxu2  ;;  %v320_v50 = vpop.f32.mrf.mxu3 }
 0x11b   :  { %v321_v57 = vadd.f32 %v320_v50, %v279_v48 }
 0x122   :  { %v282_v54 = vpop.f32.mrf.mxu2  ;;  %v323_v56 = vpop.f32.mrf.mxu3 }
 0x123   :  { %v324_v58 = vadd.f32 %v323_v56, %v282_v54 }
 0x125   :  { %v3050_v60 = vpack.i.bf16 %v321_v57, %v324_v58 }
 0x127   :  { %3051 = vrot.lane.b32.xlu1 %v3050_v60, %s3266_s20 }
 0x12a   :  { %v285_v61 = vpop.f32.mrf.mxu2  ;;  %v326_v62 = vpop.f32.mrf.mxu3 }
 0x12b   :  { %v327_v1 = vadd.f32 %v326_v62, %v285_v61 }
 0x12f   :  { %3061 = vrot.lane.b32.xlu1 %v3050_v60, %s3265_s19 }
 0x132   :  { %v288_v63 = vpop.f32.mrf.mxu2  ;;  %v329_v0 = vpop.f32.mrf.mxu3 }
 0x133   :  { %v330_v2 = vadd.f32 %v329_v0, %v288_v63 }
 0x135   :  { %v3070_v4 = vpack.i.bf16 %v327_v1, %v330_v2 }
 0x137   :  { %3071 = vrot.lane.b32.xlu1 %v3070_v4, %s3265_s19  ;;  %3056 = vrot.lane.b32.xlu0 %v3070_v4, %s3266_s20 }
 0x13a   :  { %v291_v5 = vpop.f32.mrf.mxu2  ;;  %v332_v11 = vpop.f32.mrf.mxu3 }
 0x13b   :  { %v333_v17 = vadd.f32 %v332_v11, %v291_v5 }
 0x13f   :  { %356 = vrot.lane.b32.xlu0 %v3534_v13, %s3264_s14  ;;  %358 = vrot.lane.b32.xlu1 %v3366_v9, %s3264_s14 }
 0x142   :  { %v294_v15 = vpop.f32.mrf.mxu2  ;;  %v335_v16 = vpop.f32.mrf.mxu3 }
 0x143   :  { %v336_v18 = vadd.f32 %v335_v16, %v294_v15 }
 0x145   :  { %469 = vmatpush.msrb.mxu0 %v336_v18  ;;  %896 = vmatpush.msra.mxu2 %v336_v18  ;;  %v3075_v19 = vpack.i.bf16 %v333_v17, %v336_v18 }
 0x147   :  { %445 = vrot.lane.b32.xlu0 %v3346_v6, %s3267_s11  ;;  %3076 = vrot.lane.b32.xlu2 %v3075_v19, %s3266_s20  ;;  %v3562_v6 = vld [vmem:[%s4484_s0 + $0x88] sm:$0xff] }
 0x148   :  { %470 = vmatpush.msrb.mxu0 %v333_v17  ;;  %897 = vmatpush.msra.mxu2 %v333_v17 }
 0x149   :  { %447 = vrot.lane.b32.xlu1 %v3366_v9, %s3267_s11  ;;  %v3567_v9 = vld [vmem:[%s4484_s0 + $0xc8] sm:$0xff] }
 0x14a   :  { %471 = vmatpush.msrb.mxu0 %v330_v2  ;;  %898 = vmatpush.msra.mxu2 %v330_v2 }
 0x14c   :  { %472 = vmatpush.msrb.mxu0 %v327_v1  ;;  %899 = vmatpush.msra.mxu2 %v327_v1 }
 0x14e   :  { %473 = vmatpush.msrb.mxu0 %v324_v58  ;;  %900 = vmatpush.msra.mxu2 %v324_v58 }
 0x14f   :  { %490 = vrot.lane.b32.xlu0 %v3534_v13, %s3267_s11  ;;  %3081 = vrot.lane.b32.xlu2 %v3075_v19, %s3265_s19 }
 0x150   :  { %474 = vmatpush.msrb.mxu0 %v321_v57  ;;  %901 = vmatpush.msra.mxu2 %v321_v57 }
 0x151   :  { %492 = vrot.lane.b32.xlu1 %v3548_v20, %s3267_s11 }
 0x152   :  { %475 = vmatpush.msrb.mxu0 %v3493_v43  ;;  %902 = vmatpush.msra.mxu2 %v3493_v43 }
 0x154   :  { %476 = vmatpush.msrb.mxu0 %v3491_v42  ;;  %903 = vmatpush.msra.mxu2 %v3491_v42 }
 0x157   :  { %364 = vrot.lane.b32.xlu0 %v3562_v6, %s3264_s14  ;;  %360 = vrot.lane.b32.xlu2 %v3548_v20, %s3264_s14 }
 0x159   :  { %368 = vrot.lane.b32.xlu1 %v3567_v9, %s3264_s14 }
 0x15f   :  { %366 = vrot.lane.b32.xlu0 %v3397_v14, %s3264_s14  ;;  %362 = vrot.lane.b32.xlu2 %v3385_v12, %s3264_s14 }
 0x161   :  { %496 = vrot.lane.b32.xlu1 %v3567_v9, %s3267_s11 }
 0x167   :  { %451 = vrot.lane.b32.xlu0 %v3397_v14, %s3267_s11  ;;  %449 = vrot.lane.b32.xlu2 %v3385_v12, %s3267_s11 }
 0x169   :  { %579 = vperm.xlu1 %3087, %v3351_v7  }
 0x16f   :  { %494 = vrot.lane.b32.xlu2 %v3562_v6, %s3267_s11  ;;  %574 = vperm.xlu0 %3086, %v3361_v8  }
 0x171   :  { %v3067_v22 = vpop.permute.xlu2 %3066 }
 0x172   :  { %v3068_v47 = vunpack.i.l.bf16 %v3067_v22  ;;  %v3069_v49 = vunpack.i.h.bf16 %v3067_v22 }
 0x177   :  { %569 = vperm.xlu2 %3085, %v3333_v3   ;;  %666 = vrot.lane.b32.xlu0 %v3534_v13, %s3269_s21 }
 0x17f   :  { %584 = vperm.xlu2 %3085, %v3372_v10  }
 0x189   :  { %v3047_v24 = vpop.permute.xlu0 %3046 }
 0x18a   :  { %v3048_v40 = vunpack.i.l.bf16 %v3047_v24  ;;  %v3049_v43 = vunpack.i.h.bf16 %v3047_v24 }
 0x199   :  { %v3052_v23 = vpop.permute.xlu1 %3051 }
 0x19a   :  { %v3053_v34 = vunpack.i.l.bf16 %v3052_v23  ;;  %v3054_v36 = vunpack.i.h.bf16 %v3052_v23 }
 0x1a1   :  { %v3062_v25 = vpop.permute.xlu1 %3061  ;;  %v3077_v26 = vpop.permute.xlu2 %3076 }
 0x1a2   :  { %v3078_v27 = vunpack.i.l.bf16 %v3077_v26  ;;  %v3079_v28 = vunpack.i.h.bf16 %v3077_v26  ;;  %v3063_v42 = vunpack.i.l.bf16 %v3062_v25  ;;  %v3064_v45 = vunpack.i.h.bf16 %v3062_v25 }
 0x1a4   :  { %424 = vmatpush.msrb.mxu3 %v3078_v27 }
 0x1a6   :  { %425 = vmatpush.msrb.mxu3 %v3079_v28 }
 0x1a9   :  { %v3072_v29 = vpop.permute.xlu1 %3071  ;;  %v3057_v30 = vpop.permute.xlu0 %3056 }
 0x1aa   :  { %v3082_v31 = vpop.permute.xlu2 %3081  ;;  %v3058_v14 = vunpack.i.l.bf16 %v3057_v30  ;;  %v3059_v12 = vunpack.i.h.bf16 %v3057_v30  ;;  %v3073_v35 = vunpack.i.l.bf16 %v3072_v29  ;;  %v3074_v38 = vunpack.i.h.bf16 %v3072_v29 }
 0x1ab   :  { %v3083_v32 = vunpack.i.l.bf16 %v3082_v31  ;;  %v3084_v33 = vunpack.i.h.bf16 %v3082_v31 }
 0x1ac   :  { %426 = vmatpush.msrb.mxu3 %v3058_v14 }
 0x1ad   :  { %538 = vmatpush.msrb.mxu1 %v3083_v32 }
 0x1ae   :  { %427 = vmatpush.msrb.mxu3 %v3059_v12 }
 0x1af   :  { %539 = vmatpush.msrb.mxu1 %v3084_v33 }
 0x1b0   :  { %428 = vmatpush.msrb.mxu3 %v3053_v34 }
 0x1b1   :  { %540 = vmatpush.msrb.mxu1 %v3073_v35  ;;  %v3587_v37 = vpop.permute.xlu0 %356  ;;  %v359_v39 = vpop.permute.xlu1 %358 }
 0x1b2   :  { %429 = vmatpush.msrb.mxu3 %v3054_v36  ;;  %v3589_v41 = vpop.permute.xlu2 %360  ;;  %v371_v46 = vsel %vm370_vm4, %v355_v21, %v3587_v37 }
 0x1b3   :  { %541 = vmatpush.msrb.mxu1 %v3074_v38  ;;  %v372_v52 = vsel %vm370_vm4, %v359_v39, %v3589_v41 }
 0x1b4   :  { %430 = vmatpush.msrb.mxu3 %v3048_v40 }
 0x1b5   :  { %542 = vmatpush.msrb.mxu1 %v3063_v42 }
 0x1b6   :  { %431 = vmatpush.msrb.mxu3 %v3049_v43 }
 0x1b7   :  { %543 = vmatpush.msrb.mxu1 %v3064_v45  ;;  %2873 = vmatmul.msk.f32.vlgmr.msrb.gmra.mxu3 %vm407_vm5, %v371_v46  ;;  %v3630_v45 = vld [vmem:[%s4484_s0 + $0x10] sm:$0xff] }
 0x1b8   :  { %v3637_v46 = vld [vmem:[%s4484_s0 + $0x50] sm:$0xff] }
 0x1b9   :  { %544 = vmatpush.msrb.mxu1 %v3068_v47  ;;  %v446_v48 = vpop.permute.xlu0 %445 }
 0x1ba   :  { %2877 = vmatmul.msk.f32.vlgmr.msrb.gmra.mxu0 %vm407_vm5, %v446_v48  ;;  %v363_v51 = vpop.permute.xlu2 %362 }
 0x1bb   :  { %545 = vmatpush.msrb.mxu1 %v3069_v49  ;;  %v448_v50 = vpop.permute.xlu1 %447  ;;  %v3646_v49 = vld [vmem:[%s4484_s0 + $0x90] sm:$0xff] }
 0x1bf   :  { %2874 = vmatmul.msk.f32.gmra.mxu3 %vm407_vm5, %v372_v52 }
 0x1c1   :  { %v491_v53 = vpop.permute.xlu0 %490 }
 0x1c2   :  { %2881 = vmatmul.msk.f32.vlgmr.msrb.gmra.mxu1 %vm407_vm5, %v491_v53  ;;  %2878 = vmatmul.msk.f32.gmra.mxu0 %vm407_vm5, %v448_v50  ;;  %v450_v55 = vpop.permute.xlu2 %449 }
 0x1c3   :  { %v493_v54 = vpop.permute.xlu1 %492 }
 0x1c9   :  { %v3604_v56 = vpop.permute.xlu0 %364 }
 0x1ca   :  { %2882 = vmatmul.msk.f32.gmra.mxu1 %vm407_vm5, %v493_v54  ;;  %v373_v57 = vsel %vm370_vm4, %v363_v51, %v3604_v56  ;;  %2879 = vmatmul.msk.f32.gmra.mxu0 %vm407_vm5, %v450_v55  ;;  %v495_v59 = vpop.permute.xlu2 %494 }
 0x1cb   :  { %2875 = vmatmul.msk.f32.gmra.mxu3 %vm407_vm5, %v373_v57  ;;  %v3611_v58 = vpop.permute.xlu1 %368 }
 0x1d1   :  { %v367_v60 = vpop.permute.xlu0 %366 }
 0x1d2   :  { %v374_v61 = vsel %vm370_vm4, %v367_v60, %v3611_v58  ;;  %2883 = vmatmul.msk.f32.gmra.mxu1 %vm407_vm5, %v495_v59  ;;  %v570_v11 = vpop.permute.xlu2 %569  ;;  %v3271_v59 = vmov 2  }
 0x1d3   :  { %2876 = vmatmul.msk.f32.gmra.mxu3 %vm407_vm5, %v374_v61  ;;  %v497_v62 = vpop.permute.xlu1 %496  ;;  %3109 = vset.pattern.permute.xlu1 %v3271_v59 }
 0x1d4   :  { %3110 = vset.pattern.permute.xlu0 %v3271_v59  ;;  %3108 = vset.pattern.permute.xlu2 %v3271_v59 }
 0x1d9   :  { %v452_v63 = vpop.permute.xlu0 %451 }
 0x1da   :  { %2880 = vmatmul.msk.f32.gmra.mxu0 %vm407_vm5, %v452_v63  ;;  %2884 = vmatmul.msk.f32.gmra.mxu1 %vm407_vm5, %v497_v62  ;;  %v585_v38 = vpop.permute.xlu2 %584 }
 0x1db   :  { %v580_v30 = vpop.permute.xlu1 %579 }
 0x1e1   :  { %v575_v22 = vpop.permute.xlu0 %574 }
 0x237   :  { %v478_v1 = vpop.f32.mrf.mxu0 }
 0x23a   :  { %v433_v0 = vpop.f32.mrf.mxu3 }
 0x23b   :  { %v479_v2 = vadd.f32 %v478_v1, %v433_v0  ;;  %v866_v1 = vld [vmem:[%s4485_s1 + $0x108] sm:$0xff] }
 0x23f   :  { %v547_v4 = vpop.f32.mrf.mxu1  ;;  %v481_v18 = vpop.f32.mrf.mxu0 }
 0x240   :  { %v559_v5 = vadd.f32 %v547_v4, %v479_v2  ;;  %v864_v2 = vld [vmem:[%s4485_s1 + $0xf8] sm:$0xff] }
 0x242   :  { %v587_v15 = vadd.f32 %v570_v11, %v559_v5  ;;  %v436_v16 = vpop.f32.mrf.mxu3  ;;  %v863_v5 = vld [vmem:[%s4485_s1 + $0xf0] sm:$0xff] }
 0x243   :  { %v482_v19 = vadd.f32 %v481_v18, %v436_v16 }
 0x244   :  { %v591_v17 = vmax.f32 %v587_v15, 0.0 }
 0x246   :  { %2886 = vmatmul.msk.f32.vlgmr.msrb.gmra.mxu2 %vm604_vm6, %v591_v17 }
 0x247   :  { %v550_v21 = vpop.f32.mrf.mxu1  ;;  %v484_v27 = vpop.f32.mrf.mxu0 }
 0x248   :  { %v560_v23 = vadd.f32 %v550_v21, %v482_v19 }
 0x24a   :  { %v588_v24 = vadd.f32 %v575_v22, %v560_v23  ;;  %v861_v23 = vld [vmem:[%s4485_s1 + $0xe0] sm:$0xff] }
 0x24c   :  { %v592_v25 = vmax.f32 %v588_v24, 0.0 }
 0x24e   :  { %2887 = vmatmul.msk.f32.gmra.mxu2 %vm604_vm6, %v592_v25  ;;  %v439_v26 = vpop.f32.mrf.mxu3  ;;  %v860_v25 = vld [vmem:[%s4485_s1 + $0xd8] sm:$0xff] }
 0x24f   :  { %v485_v28 = vadd.f32 %v484_v27, %v439_v26  ;;  %v553_v29 = vpop.f32.mrf.mxu1  ;;  %v859_v27 = vld [vmem:[%s4485_s1 + $0xd0] sm:$0xff] }
 0x251   :  { %v561_v31 = vadd.f32 %v553_v29, %v485_v28 }
 0x253   :  { %v589_v14 = vadd.f32 %v580_v30, %v561_v31 }
 0x255   :  { %v593_v32 = vmax.f32 %v589_v14, 0.0 }
 0x256   :  { %v442_v12 = vpop.f32.mrf.mxu3 }
 0x257   :  { %v487_v33 = vpop.f32.mrf.mxu0  ;;  %2888 = vmatmul.msk.f32.gmra.mxu2 %vm604_vm6, %v593_v32  ;;  %v556_v34 = vpop.f32.mrf.mxu1 }
 0x258   :  { %v488_v35 = vadd.f32 %v487_v33, %v442_v12 }
 0x25a   :  { %v562_v36 = vadd.f32 %v556_v34, %v488_v35 }
 0x25c   :  { %v590_v13 = vadd.f32 %v585_v38, %v562_v36 }
 0x25e   :  { %v594_v39 = vmax.f32 %v590_v13, 0.0 }
 0x260   :  { %2889 = vmatmul.msk.f32.gmra.mxu2 %vm604_vm6, %v594_v39 }
 0x2c9   :  { %v638_v40 = vpop.f32.mrf.mxu2 }
 0x2d1   :  { %v641_v42 = vpop.f32.mrf.mxu2 }
 0x2d2   :  { %v3098_v43 = vpack.i.bf16 %v638_v40, %v641_v42 }
 0x2d4   :  { %3099 = vrot.lane.b32.xlu0 %v3098_v43, %s3265_s19  ;;  %3089 = vrot.lane.b32.xlu2 %v3098_v43, %s3266_s20 }
 0x2da   :  { %v644_v44 = vpop.f32.mrf.mxu2 }
 0x2dc   :  { %778 = vrot.lane.b32.xlu0 %v3630_v45, %s3267_s11 }
 0x2e3   :  { %v647_v47 = vpop.f32.mrf.mxu2 }
 0x2e4   :  { %761 = vmatpush.msra.mxu0 %v647_v47  ;;  %v3103_v48 = vpack.i.bf16 %v644_v44, %v647_v47  ;;  %780 = vrot.lane.b32.xlu0 %v3637_v46, %s3267_s11 }
 0x2e6   :  { %3104 = vrot.lane.b32.xlu2 %v3103_v48, %s3265_s19  ;;  %3094 = vrot.lane.b32.xlu1 %v3103_v48, %s3266_s20 }
 0x2e7   :  { %762 = vmatpush.msra.mxu0 %v644_v44 }
 0x2e9   :  { %763 = vmatpush.msra.mxu0 %v641_v42 }
 0x2eb   :  { %764 = vmatpush.msra.mxu0 %v638_v40 }
 0x2ec   :  { %2894 = vmatmul.msk.f32.vlgmr.msra.gmra.mxu0 %vm703_vm7, %v3587_v37  ;;  %782 = vrot.lane.b32.xlu0 %v3646_v49, %s3267_s11  ;;  %v3669_v37 = vld [vmem:[%s4484_s0 + $0xd0] sm:$0xff] }
 0x2ee   :  { %668 = vrot.lane.b32.xlu1 %v3630_v45, %s3269_s21  ;;  %672 = vrot.lane.b32.xlu2 %v3637_v46, %s3269_s21 }
 0x2f4   :  { %2895 = vmatmul.msk.f32.gmra.mxu0 %vm703_vm7, %v3589_v41  ;;  %872 = vrot.lane.b32.xlu0 %v3630_v45, %s3270_s28  ;;  %v667_v41 = vpop.permute.xlu0 %666 }
 0x2f6   :  { %670 = vrot.lane.b32.xlu1 %v3548_v20, %s3269_s21  ;;  %676 = vrot.lane.b32.xlu2 %v3646_v49, %s3269_s21 }
 0x2fc   :  { %2896 = vmatmul.msk.f32.gmra.mxu0 %vm703_vm7, %v3604_v56  ;;  %848 = vperm.xlu0 %3110, %v3351_v7  }
 0x2fe   :  { %674 = vrot.lane.b32.xlu1 %v3562_v6, %s3269_s21  ;;  %680 = vrot.lane.b32.xlu2 %v3669_v37, %s3269_s21 }
 0x304   :  { %2897 = vmatmul.msk.f32.gmra.mxu0 %vm703_vm7, %v3611_v58 }
 0x306   :  { %678 = vrot.lane.b32.xlu1 %v3567_v9, %s3269_s21  ;;  %840 = vperm.xlu2 %3108, %v3333_v3   ;;  %v865_v3 = vld [vmem:[%s4485_s1 + $0x100] sm:$0xff] }
 0x30e   :  { %784 = vrot.lane.b32.xlu1 %v3669_v37, %s3267_s11  ;;  %874 = vrot.lane.b32.xlu2 %v3637_v46, %s3270_s28 }
 0x316   :  { %844 = vperm.xlu1 %3109, %v3361_v8   ;;  %v867_v8 = vld [vmem:[%s4485_s1 + $0x110] sm:$0x3]  ;;  %852 = vperm.xlu2 %3108, %v3372_v10   ;;  %v862_v10 = vld [vmem:[%s4485_s1 + $0xe8] sm:$0xff] }
 0x31e   :  { %876 = vrot.lane.b32.xlu1 %v3646_v49, %s3270_s28 }
 0x326   :  { %878 = vrot.lane.b32.xlu1 %v3669_v37, %s3270_s28 }
 0x32e   :  { %v3090_v20 = vpop.permute.xlu2 %3089  ;;  %1042 = vrot.lane.b32.xlu1 %v3630_v45, %s3269_s21 }
 0x32f   :  { %v3091_v60 = vunpack.i.l.bf16 %v3090_v20  ;;  %v3092_v62 = vunpack.i.h.bf16 %v3090_v20 }
 0x340   :  { %v3105_v50 = vpop.permute.xlu2 %3104 }
 0x341   :  { %v3106_v51 = vunpack.i.l.bf16 %v3105_v50  ;;  %v3107_v52 = vunpack.i.h.bf16 %v3105_v50 }
 0x343   :  { %818 = vmatpush.msra.mxu1 %v3106_v51 }
 0x345   :  { %819 = vmatpush.msra.mxu1 %v3107_v52 }
 0x346   :  { %v3100_v6 = vpop.permute.xlu0 %3099 }
 0x347   :  { %v3101_v53 = vunpack.i.l.bf16 %v3100_v6  ;;  %v3102_v54 = vunpack.i.h.bf16 %v3100_v6 }
 0x348   :  { %v673_v7 = vpop.permute.xlu2 %672 }
 0x349   :  { %820 = vmatpush.msra.mxu1 %v3101_v53 }
 0x34b   :  { %821 = vmatpush.msra.mxu1 %v3102_v54 }
 0x34e   :  { %v779_v55 = vpop.permute.xlu0 %778 }
 0x34f   :  { %2898 = vmatmul.msk.f32.vlgmr.msra.gmra.mxu1 %vm703_vm7, %v779_v55 }
 0x350   :  { %v677_v15 = vpop.permute.xlu2 %676 }
 0x356   :  { %v781_v56 = vpop.permute.xlu0 %780 }
 0x357   :  { %2899 = vmatmul.msk.f32.gmra.mxu1 %vm703_vm7, %v781_v56  ;;  %v3744_v56 = vld [vmem:[%s4484_s0 + $0x18] sm:$0xff] }
 0x358   :  { %v3095_v9 = vpop.permute.xlu1 %3094  ;;  %v681_v18 = vpop.permute.xlu2 %680  ;;  %1099 = vrot.lane.b32.xlu2 %v3744_v56, %s3270_s28 }
 0x359   :  { %v3096_v57 = vunpack.i.l.bf16 %v3095_v9  ;;  %v3097_v58 = vunpack.i.h.bf16 %v3095_v9 }
 0x35b   :  { %724 = vmatpush.msra.mxu3 %v3096_v57 }
 0x35d   :  { %725 = vmatpush.msra.mxu3 %v3097_v58  ;;  %v868_v58 = vld [vmem:[%s4485_s1 + $0x118] sm:$0xff] }
 0x35e   :  { %v783_v61 = vpop.permute.xlu0 %782 }
 0x35f   :  { %726 = vmatpush.msra.mxu3 %v3091_v60  ;;  %2900 = vmatmul.msk.f32.gmra.mxu1 %vm703_vm7, %v783_v61  ;;  %v869_v60 = vld [vmem:[%s4485_s1 + $0x120] sm:$0xff] }
 0x360   :  { %v669_v63 = vpop.permute.xlu1 %668  ;;  %v841_v24 = vpop.permute.xlu2 %840 }
 0x361   :  { %v683_v0 = vsel %vm682_vm8, %v667_v41, %v669_v63  ;;  %727 = vmatpush.msra.mxu3 %v3092_v62 }
 0x362   :  { %2890 = vmatmul.msk.f32.vlgmr.msra.gmra.mxu3 %vm703_vm7, %v683_v0 }
 0x363   :  { %2906 = vmatpush.msk.msrb.mxu3 %vm617_vm3, %v867_v8 }
 0x365   :  { %940 = vmatpush.msrb.mxu3 %v866_v1 }
 0x366   :  { %v873_v26 = vpop.permute.xlu0 %872 }
 0x367   :  { %941 = vmatpush.msrb.mxu3 %v865_v3  ;;  %2902 = vmatmul.msk.f32.vlgmr.msra.gmra.mxu2 %vm407_vm5, %v873_v26  ;;  %v3811_v26 = vld [vmem:[%s4484_s0 + $0xd8] sm:$0xff] }
 0x368   :  { %v671_v4 = vpop.permute.xlu1 %670  ;;  %v875_v29 = vpop.permute.xlu2 %874 }
 0x369   :  { %v684_v11 = vsel %vm682_vm8, %v671_v4, %v673_v7  ;;  %942 = vmatpush.msrb.mxu3 %v864_v2  ;;  %v766_v31 = vpop.f32.mrf.mxu0  ;;  %v870_v4 = vld [vmem:[%s4485_s1 + $0x128] sm:$0xff] }
 0x36a   :  { %2891 = vmatmul.msk.f32.gmra.mxu3 %vm703_vm7, %v684_v11  ;;  %v871_v11 = vld [vmem:[%s4485_s1 + $0x130] sm:$0xff] }
 0x36b   :  { %943 = vmatpush.msrb.mxu3 %v863_v5 }
 0x36d   :  { %944 = vmatpush.msrb.mxu3 %v862_v10 }
 0x36e   :  { %v849_v48 = vpop.permute.xlu0 %848 }
 0x36f   :  { %945 = vmatpush.msrb.mxu3 %v861_v23  ;;  %2903 = vmatmul.msk.f32.gmra.mxu2 %vm407_vm5, %v875_v29 }
 0x370   :  { %v675_v16 = vpop.permute.xlu1 %674  ;;  %v853_v54 = vpop.permute.xlu2 %852 }
 0x371   :  { %v685_v17 = vsel %vm682_vm8, %v675_v16, %v677_v15  ;;  %946 = vmatpush.msrb.mxu3 %v860_v25  ;;  %v769_v35 = vpop.f32.mrf.mxu0  ;;  %v3794_v25 = vld [vmem:[%s4484_s0 + $0x98] sm:$0xff] }
 0x372   :  { %2892 = vmatmul.msk.f32.gmra.mxu3 %vm703_vm7, %v685_v17  ;;  %v3771_v17 = vld [vmem:[%s4484_s0 + $0x58] sm:$0xff] }
 0x373   :  { %947 = vmatpush.msrb.mxu3 %v859_v27 }
 0x378   :  { %v679_v19 = vpop.permute.xlu1 %678 }
 0x379   :  { %v686_v21 = vsel %vm682_vm8, %v679_v19, %v681_v18  ;;  %v772_v43 = vpop.f32.mrf.mxu0 }
 0x37a   :  { %2893 = vmatmul.msk.f32.gmra.mxu3 %vm703_vm7, %v686_v21 }
 0x380   :  { %v785_v22 = vpop.permute.xlu1 %784 }
 0x381   :  { %2901 = vmatmul.msk.f32.gmra.mxu1 %vm703_vm7, %v785_v22  ;;  %v775_v50 = vpop.f32.mrf.mxu0 }
 0x388   :  { %v845_v28 = vpop.permute.xlu1 %844 }
 0x390   :  { %v877_v30 = vpop.permute.xlu1 %876 }
 0x391   :  { %2904 = vmatmul.msk.f32.gmra.mxu2 %vm407_vm5, %v877_v30 }
 0x398   :  { %v879_v32 = vpop.permute.xlu1 %878 }
 0x399   :  { %2905 = vmatmul.msk.f32.gmra.mxu2 %vm407_vm5, %v879_v32  ;;  %v3272_v32 = vmov 3  }
 0x39a   :  { %3131 = vset.pattern.permute.xlu1 %v3272_v32  ;;  %3133 = vset.pattern.permute.xlu0 %v3272_v32 }
 0x39b   :  { %3132 = vset.pattern.permute.xlu2 %v3272_v32 }
 0x3cc   :  { %v823_v14 = vpop.f32.mrf.mxu1 }
 0x3d4   :  { %v826_v38 = vpop.f32.mrf.mxu1 }
 0x3dc   :  { %v829_v44 = vpop.f32.mrf.mxu1 }
 0x3e5   :  { %v729_v12 = vpop.f32.mrf.mxu3 }
 0x3e6   :  { %v767_v33 = vadd.f32 %v766_v31, %v729_v12 }
 0x3e8   :  { %v835_v34 = vadd.f32 %v823_v14, %v767_v33  ;;  %v3827_v33 = vld [vmem:[%s4486_s2] sm:$0xff] }
 0x3ea   :  { %v855_v36 = vadd.f32 %v841_v24, %v835_v34  ;;  %v905_v9 = vpop.f32.mrf.mxu2  ;;  %v3833_v34 = vld [vmem:[%s4486_s2 + $0x10] sm:$0xff] }
 0x3eb   :  { %v906_v61 = vadd.f32 %v905_v9, %v868_v58 }
 0x3ec   :  { %2907 = vmatmul.msk.f32.vlgmr.msrb.gmra.mxu3 %vm604_vm6, %v855_v36  ;;  %v3840_v36 = vld [vmem:[%s4486_s2 + $0x8] sm:$0xff] }
 0x3ed   :  { %v732_v13 = vpop.f32.mrf.mxu3 }
 0x3ee   :  { %v770_v39 = vadd.f32 %v769_v35, %v732_v13 }
 0x3f0   :  { %v836_v40 = vadd.f32 %v826_v38, %v770_v39 }
 0x3f2   :  { %v856_v42 = vadd.f32 %v845_v28, %v836_v40  ;;  %v908_v57 = vpop.f32.mrf.mxu2  ;;  %v3847_v40 = vld [vmem:[%s4486_s2 + $0x18] sm:$0xff] }
 0x3f3   :  { %v909_v62 = vadd.f32 %v908_v57, %v869_v60 }
 0x3f4   :  { %2908 = vmatmul.msk.f32.gmra.mxu3 %vm604_vm6, %v856_v42 }
 0x3f5   :  { %v735_v45 = vpop.f32.mrf.mxu3 }
 0x3f6   :  { %v773_v47 = vadd.f32 %v772_v43, %v735_v45 }
 0x3f8   :  { %v837_v20 = vadd.f32 %v829_v44, %v773_v47  ;;  %v1192_v47 = vld [vmem:[%s4485_s1 + $0x178] sm:$0x3] }
 0x3f9   :  { %2923 = vmatpush.msk.msra.mxu3 %vm617_vm3, %v1192_v47 }
 0x3fa   :  { %v857_v41 = vadd.f32 %v849_v48, %v837_v20  ;;  %v1191_v20 = vld [vmem:[%s4485_s1 + $0x170] sm:$0xff] }
 0x3fb   :  { %1216 = vmatpush.msra.mxu3 %v1191_v20 }
 0x3fc   :  { %2909 = vmatmul.msk.f32.gmra.mxu3 %vm604_vm6, %v857_v41 }
 0x3fd   :  { %v738_v51 = vpop.f32.mrf.mxu3 }
 0x3fe   :  { %v776_v52 = vadd.f32 %v775_v50, %v738_v51  ;;  %v832_v6 = vpop.f32.mrf.mxu1 }
 0x400   :  { %v838_v53 = vadd.f32 %v832_v6, %v776_v52 }
 0x402   :  { %v858_v55 = vadd.f32 %v853_v54, %v838_v53 }
 0x404   :  { %2910 = vmatmul.msk.f32.gmra.mxu3 %vm604_vm6, %v858_v55 }
 0x414   :  { %v911_v8 = vpop.f32.mrf.mxu2 }
 0x415   :  { %v912_v16 = vadd.f32 %v911_v8, %v870_v4  ;;  %v1186_v8 = vld [vmem:[%s4485_s1 + $0x148] sm:$0xff] }
 0x41c   :  { %v914_v15 = vpop.f32.mrf.mxu2 }
 0x41d   :  { %v915_v18 = vadd.f32 %v914_v15, %v871_v11 }
 0x46f   :  { %v949_v59 = vpop.f32.mrf.mxu3 }
 0x470   :  { %v950_v63 = vadd.f32 %v949_v59, %v906_v61  ;;  %v1190_v61 = vld [vmem:[%s4485_s1 + $0x168] sm:$0xff] }
 0x471   :  { %1217 = vmatpush.msra.mxu3 %v1190_v61 }
 0x472   :  { %v3754_v1 = vmax.f32 %v950_v63, 0.0  ;;  %v1188_v63 = vld [vmem:[%s4485_s1 + $0x158] sm:$0xff] }
 0x477   :  { %v952_v0 = vpop.f32.mrf.mxu3 }
 0x478   :  { %v953_v7 = vadd.f32 %v952_v0, %v909_v62  ;;  %v1189_v62 = vld [vmem:[%s4485_s1 + $0x160] sm:$0xff]  ;;  %v1187_v0 = vld [vmem:[%s4485_s1 + $0x150] sm:$0xff] }
 0x479   :  { %1218 = vmatpush.msra.mxu3 %v1189_v62 }
 0x47a   :  { %v3756_v3 = vmax.f32 %v953_v7, 0.0  ;;  %v1185_v7 = vld [vmem:[%s4485_s1 + $0x140] sm:$0xff] }
 0x47b   :  { %1219 = vmatpush.msra.mxu3 %v1188_v63 }
 0x47c   :  { %v3116_v2 = vpack.i.bf16 %v3754_v1, %v3756_v3 }
 0x47d   :  { %1220 = vmatpush.msra.mxu3 %v1187_v0 }
 0x47e   :  { %3117 = vrot.lane.b32.xlu0 %v3116_v2, %s3266_s20  ;;  %3112 = vrot.lane.b32.xlu1 %v3116_v2, %s3265_s19  ;;  %v1184_v2 = vld [vmem:[%s4485_s1 + $0x138] sm:$0xff] }
 0x47f   :  { %v955_v5 = vpop.f32.mrf.mxu3  ;;  %1221 = vmatpush.msra.mxu3 %v1186_v8 }
 0x480   :  { %v956_v19 = vadd.f32 %v955_v5, %v912_v16 }
 0x481   :  { %1222 = vmatpush.msra.mxu3 %v1185_v7 }
 0x482   :  { %v3777_v10 = vmax.f32 %v956_v19, 0.0 }
 0x483   :  { %1223 = vmatpush.msra.mxu3 %v1184_v2 }
 0x486   :  { %977 = vrot.lane.b32.xlu0 %v3744_v56, %s3267_s11  ;;  %1101 = vrot.lane.b32.xlu1 %v3771_v17, %s3270_s28 }
 0x487   :  { %v958_v21 = vpop.f32.mrf.mxu3 }
 0x488   :  { %v959_v22 = vadd.f32 %v958_v21, %v915_v18 }
 0x48a   :  { %v3779_v23 = vmax.f32 %v959_v22, 0.0 }
 0x48c   :  { %1082 = vmatpush.msrb.mxu1 %v3779_v23  ;;  %v3121_v24 = vpack.i.bf16 %v3777_v10, %v3779_v23 }
 0x48e   :  { %3122 = vrot.lane.b32.xlu2 %v3121_v24, %s3265_s19  ;;  %1083 = vmatpush.msrb.mxu1 %v3777_v10 }
 0x48f   :  { %3127 = vrot.lane.b32.xlu0 %v3121_v24, %s3266_s20  ;;  %979 = vrot.lane.b32.xlu1 %v3771_v17, %s3267_s11 }
 0x490   :  { %1084 = vmatpush.msrb.mxu1 %v3756_v3 }
 0x492   :  { %1085 = vmatpush.msrb.mxu1 %v3754_v1 }
 0x496   :  { %1044 = vrot.lane.b32.xlu2 %v3744_v56, %s3269_s21 }
 0x497   :  { %1048 = vrot.lane.b32.xlu0 %v3771_v17, %s3269_s21  ;;  %1052 = vrot.lane.b32.xlu1 %v3794_v25, %s3269_s21 }
 0x49e   :  { %1046 = vrot.lane.b32.xlu2 %v3637_v46, %s3269_s21  ;;  %v1100_v46 = vpop.permute.xlu2 %1099 }
 0x49f   :  { %1050 = vrot.lane.b32.xlu0 %v3646_v49, %s3269_s21  ;;  %1054 = vrot.lane.b32.xlu1 %v3669_v37, %s3269_s21  ;;  %v1043_v49 = vpop.permute.xlu1 %1042 }
 0x4a6   :  { %1103 = vrot.lane.b32.xlu2 %v3794_v25, %s3270_s28 }
 0x4a7   :  { %1105 = vrot.lane.b32.xlu0 %v3811_v26, %s3270_s28  ;;  %1161 = vperm.xlu1 %3131, %v3827_v33  }
 0x4ae   :  { %981 = vrot.lane.b32.xlu2 %v3794_v25, %s3267_s11 }
 0x4af   :  { %983 = vrot.lane.b32.xlu0 %v3811_v26, %s3267_s11  ;;  %1173 = vperm.xlu1 %3131, %v3847_v40  }
 0x4b6   :  { %1056 = vrot.lane.b32.xlu2 %v3811_v26, %s3269_s21 }
 0x4b7   :  { %1169 = vperm.xlu0 %3133, %v3833_v34  }
 0x4be   :  { %1165 = vperm.xlu2 %3132, %v3840_v36  }
 0x4e8   :  { %v3123_v37 = vpop.permute.xlu2 %3122 }
 0x4e9   :  { %v3124_v27 = vunpack.i.l.bf16 %v3123_v37  ;;  %v3125_v28 = vunpack.i.h.bf16 %v3123_v37 }
 0x4eb   :  { %1139 = vmatpush.msrb.mxu2 %v3124_v27 }
 0x4ed   :  { %1140 = vmatpush.msrb.mxu2 %v3125_v28 }
 0x4f0   :  { %v3118_v29 = vpop.permute.xlu0 %3117  ;;  %v3113_v30 = vpop.permute.xlu1 %3112 }
 0x4f1   :  { %v3114_v31 = vunpack.i.l.bf16 %v3113_v30  ;;  %v1045_v14 = vpop.permute.xlu2 %1044  ;;  %v3115_v35 = vunpack.i.h.bf16 %v3113_v30  ;;  %v3119_v41 = vunpack.i.l.bf16 %v3118_v29  ;;  %v3120_v50 = vunpack.i.h.bf16 %v3118_v29 }
 0x4f2   :  { %v1058_v12 = vsel %vm682_vm8, %v1043_v49, %v1045_v14 }
 0x4f3   :  { %1141 = vmatpush.msrb.mxu2 %v3114_v31  ;;  %2915 = vmatmul.msk.f32.vlgmr.msrb.gmra.mxu1 %vm703_vm7, %v1058_v12 }
 0x4f5   :  { %1142 = vmatpush.msrb.mxu2 %v3115_v35 }
 0x4f6   :  { %2919 = vmatmul.msk.f32.vlgmr.msrb.gmra.mxu2 %vm703_vm7, %v1100_v46 }
 0x4f8   :  { %v978_v38 = vpop.permute.xlu0 %977  ;;  %v1102_v39 = vpop.permute.xlu1 %1101 }
 0x4f9   :  { %v1047_v13 = vpop.permute.xlu2 %1046 }
 0x4fe   :  { %2920 = vmatmul.msk.f32.gmra.mxu2 %vm703_vm7, %v1102_v39 }
 0x501   :  { %v3128_v42 = vpop.permute.xlu0 %3127  ;;  %v1104_v43 = vpop.permute.xlu2 %1103 }
 0x502   :  { %v3129_v44 = vunpack.i.l.bf16 %v3128_v42  ;;  %v980_v45 = vpop.permute.xlu1 %979  ;;  %v3130_v48 = vunpack.i.h.bf16 %v3128_v42 }
 0x504   :  { %1021 = vmatpush.msrb.mxu0 %v3129_v44 }
 0x506   :  { %1022 = vmatpush.msrb.mxu0 %v3130_v48  ;;  %2921 = vmatmul.msk.f32.gmra.mxu2 %vm703_vm7, %v1104_v43 }
 0x508   :  { %1023 = vmatpush.msrb.mxu0 %v3119_v41  ;;  %v3898_v41 = vld [vmem:[%s4484_s0 + $0x20] sm:$0xff] }
 0x509   :  { %v1049_v51 = vpop.permute.xlu0 %1048  ;;  %v982_v6 = vpop.permute.xlu2 %981  ;;  %1371 = vrot.lane.b32.xlu0 %v3898_v41, %s3267_s11 }
 0x50a   :  { %1024 = vmatpush.msrb.mxu0 %v3120_v50  ;;  %v1059_v52 = vsel %vm682_vm8, %v1047_v13, %v1049_v51  ;;  %v1053_v53 = vpop.permute.xlu1 %1052  ;;  %v1242_v51 = vld [vmem:[%s4484_s0 + $0xa0] sm:$0xff] }
 0x50b   :  { %2911 = vmatmul.msk.f32.vlgmr.msrb.gmra.mxu0 %vm703_vm7, %v978_v38  ;;  %2916 = vmatmul.msk.f32.gmra.mxu1 %vm703_vm7, %v1059_v52 }
 0x511   :  { %v1051_v54 = vpop.permute.xlu0 %1050  ;;  %v1057_v9 = vpop.permute.xlu2 %1056  ;;  %1255 = vrot.lane.b32.xlu0 %v3898_v41, %s3269_s21 }
 0x512   :  { %v1060_v55 = vsel %vm682_vm8, %v1051_v54, %v1053_v53  ;;  %v1055_v57 = vpop.permute.xlu1 %1054 }
 0x513   :  { %2912 = vmatmul.msk.f32.gmra.mxu0 %vm703_vm7, %v980_v45  ;;  %2917 = vmatmul.msk.f32.gmra.mxu1 %vm703_vm7, %v1060_v55  ;;  %v1061_v58 = vsel %vm682_vm8, %v1055_v57, %v1057_v9  ;;  %v1244_v55 = vld [vmem:[%s4484_s0 + $0xe0] sm:$0xff] }
 0x514   :  { %v3925_v57 = vld [vmem:[%s4484_s0 + $0x60] sm:$0xff] }
 0x519   :  { %v1106_v59 = vpop.permute.xlu0 %1105  ;;  %v1166_v37 = vpop.permute.xlu2 %1165  ;;  %1257 = vrot.lane.b32.xlu0 %v3771_v17, %s3269_s21 }
 0x51a   :  { %2922 = vmatmul.msk.f32.gmra.mxu2 %vm703_vm7, %v1106_v59  ;;  %v1162_v18 = vpop.permute.xlu1 %1161 }
 0x51b   :  { %2913 = vmatmul.msk.f32.gmra.mxu0 %vm703_vm7, %v982_v6  ;;  %2918 = vmatmul.msk.f32.gmra.mxu1 %vm703_vm7, %v1061_v58 }
 0x521   :  { %v984_v60 = vpop.permute.xlu0 %983  ;;  %1375 = vrot.lane.b32.xlu0 %v1242_v51, %s3267_s11 }
 0x522   :  { %v1174_v47 = vpop.permute.xlu1 %1173 }
 0x523   :  { %2914 = vmatmul.msk.f32.gmra.mxu0 %vm703_vm7, %v984_v60 }
 0x529   :  { %v1170_v12 = vpop.permute.xlu0 %1169  ;;  %1330 = vrot.lane.b32.xlu0 %v3794_v25, %s3264_s14 }
 0x531   :  { %1267 = vrot.lane.b32.xlu0 %v1244_v55, %s3269_s21 }
 0x570   :  { %v1087_v4 = vpop.f32.mrf.mxu1 }
 0x579   :  { %v1144_v5 = vpop.f32.mrf.mxu2 }
 0x581   :  { %v1147_v22 = vpop.f32.mrf.mxu2 }
 0x588   :  { %v1026_v11 = vpop.f32.mrf.mxu0  ;;  %v1090_v19 = vpop.f32.mrf.mxu1 }
 0x589   :  { %v1088_v15 = vadd.f32 %v1087_v4, %v1026_v11  ;;  %v1150_v14 = vpop.f32.mrf.mxu2 }
 0x58b   :  { %v1156_v16 = vadd.f32 %v1144_v5, %v1088_v15 }
 0x58d   :  { %v1176_v21 = vadd.f32 %v1162_v18, %v1156_v16  ;;  %v1460_v16 = vld [vmem:[%s4485_s1 + $0x1c0] sm:$0x3] }
 0x58e   :  { %2940 = vmatpush.msk.msrb.mxu3 %vm617_vm3, %v1460_v16 }
 0x58f   :  { %v1180_v24 = vmax.f32 %v1176_v21, 0.0 }
 0x590   :  { %v1029_v46 = vpop.f32.mrf.mxu0  ;;  %v1093_v29 = vpop.f32.mrf.mxu1 }
 0x591   :  { %v1091_v49 = vadd.f32 %v1090_v19, %v1029_v46  ;;  %2924 = vmatmul.msk.f32.vlgmr.msra.gmra.mxu3 %vm604_vm6, %v1180_v24 }
 0x593   :  { %v1157_v27 = vadd.f32 %v1147_v22, %v1091_v49  ;;  %v1457_v22 = vld [vmem:[%s4485_s1 + $0x1a8] sm:$0xff] }
 0x595   :  { %v1177_v28 = vadd.f32 %v1166_v37, %v1157_v27 }
 0x597   :  { %v1181_v30 = vmax.f32 %v1177_v28, 0.0 }
 0x598   :  { %v1032_v31 = vpop.f32.mrf.mxu0  ;;  %v1096_v13 = vpop.f32.mrf.mxu1 }
 0x599   :  { %v1094_v32 = vadd.f32 %v1093_v29, %v1032_v31  ;;  %2925 = vmatmul.msk.f32.gmra.mxu3 %vm604_vm6, %v1181_v30 }
 0x59b   :  { %v1158_v35 = vadd.f32 %v1150_v14, %v1094_v32  ;;  %v1456_v32 = vld [vmem:[%s4485_s1 + $0x1a0] sm:$0xff] }
 0x59d   :  { %v1178_v38 = vadd.f32 %v1170_v12, %v1158_v35  ;;  %v1153_v44 = vpop.f32.mrf.mxu2  ;;  %v1455_v12 = vld [vmem:[%s4485_s1 + $0x198] sm:$0xff]  ;;  %v1454_v35 = vld [vmem:[%s4485_s1 + $0x190] sm:$0xff] }
 0x59f   :  { %v1182_v39 = vmax.f32 %v1178_v38, 0.0  ;;  %v1453_v38 = vld [vmem:[%s4485_s1 + $0x188] sm:$0xff] }
 0x5a0   :  { %v1035_v42 = vpop.f32.mrf.mxu0 }
 0x5a1   :  { %v1097_v43 = vadd.f32 %v1096_v13, %v1035_v42  ;;  %2926 = vmatmul.msk.f32.gmra.mxu3 %vm604_vm6, %v1182_v39  ;;  %v1452_v13 = vld [vmem:[%s4485_s1 + $0x180] sm:$0xff] }
 0x5a3   :  { %v1159_v45 = vadd.f32 %v1153_v44, %v1097_v43 }
 0x5a5   :  { %v1179_v48 = vadd.f32 %v1174_v47, %v1159_v45 }
 0x5a7   :  { %v1183_v20 = vmax.f32 %v1179_v48, 0.0 }
 0x5a9   :  { %2927 = vmatmul.msk.f32.gmra.mxu3 %vm604_vm6, %v1183_v20 }
 0x614   :  { %v1225_v50 = vpop.f32.mrf.mxu3 }
 0x61c   :  { %v1228_v52 = vpop.f32.mrf.mxu3 }
 0x61d   :  { %v3139_v6 = vpack.i.bf16 %v1225_v50, %v1228_v52 }
 0x61f   :  { %3140 = vrot.lane.b32.xlu1 %v3139_v6, %s3266_s20  ;;  %3135 = vrot.lane.b32.xlu2 %v3139_v6, %s3265_s19 }
 0x624   :  { %v1231_v53 = vpop.f32.mrf.mxu3 }
 0x627   :  { %1326 = vrot.lane.b32.xlu1 %v3744_v56, %s3264_s14 }
 0x62c   :  { %v1234_v54 = vpop.f32.mrf.mxu3 }
 0x62d   :  { %v3149_v9 = vpack.i.bf16 %v1231_v53, %v1234_v54  ;;  %1354 = vmatpush.msra.mxu1 %v1234_v54 }
 0x62f   :  { %3150 = vrot.lane.b32.xlu1 %v3149_v9, %s3266_s20  ;;  %3145 = vrot.lane.b32.xlu2 %v3149_v9, %s3265_s19 }
 0x630   :  { %1355 = vmatpush.msra.mxu1 %v1231_v53 }
 0x632   :  { %1356 = vmatpush.msra.mxu1 %v1228_v52 }
 0x634   :  { %1357 = vmatpush.msra.mxu1 %v1225_v50 }
 0x637   :  { %1259 = vrot.lane.b32.xlu1 %v3925_v57, %s3269_s21  ;;  %1253 = vrot.lane.b32.xlu2 %v3744_v56, %s3269_s21  ;;  %v1372_v56 = vpop.permute.xlu0 %1371 }
 0x63f   :  { %1261 = vrot.lane.b32.xlu1 %v3794_v25, %s3269_s21  ;;  %1373 = vrot.lane.b32.xlu2 %v3925_v57, %s3267_s11  ;;  %v1256_v25 = vpop.permute.xlu0 %1255 }
 0x647   :  { %1377 = vrot.lane.b32.xlu1 %v1244_v55, %s3267_s11  ;;  %1328 = vrot.lane.b32.xlu2 %v3771_v17, %s3264_s14  ;;  %v1258_v8 = vpop.permute.xlu0 %1257 }
 0x64f   :  { %1332 = vrot.lane.b32.xlu1 %v3811_v26, %s3264_s14  ;;  %1263 = vrot.lane.b32.xlu2 %v1242_v51, %s3269_s21  ;;  %v1376_v4 = vpop.permute.xlu0 %1375 }
 0x657   :  { %1265 = vrot.lane.b32.xlu2 %v3811_v26, %s3269_s21  ;;  %v3273_v26 = vmov 4   ;;  %v1331_v19 = vpop.permute.xlu0 %1330 }
 0x658   :  { %3155 = vset.pattern.permute.xlu0 %v3273_v26  ;;  %3156 = vset.pattern.permute.xlu1 %v3273_v26 }
 0x659   :  { %1437 = vperm.xlu0 %3155, %v3840_v36   ;;  %1441 = vperm.xlu1 %3156, %v3833_v34   ;;  %v1459_v36 = vld [vmem:[%s4485_s1 + $0x1b8] sm:$0xff] }
 0x65a   :  { %3154 = vset.pattern.permute.xlu2 %v3273_v26  ;;  %1484 = vmatpush.msrb.mxu3 %v1459_v36 }
 0x65f   :  { %1433 = vperm.xlu2 %3154, %v3827_v33   ;;  %v1458_v33 = vld [vmem:[%s4485_s1 + $0x1b0] sm:$0xff]  ;;  %v1268_v29 = vpop.permute.xlu0 %1267 }
 0x660   :  { %1485 = vmatpush.msrb.mxu3 %v1458_v33 }
 0x661   :  { %1515 = vrot.lane.b32.xlu0 %v3925_v57, %s3264_s14 }
 0x662   :  { %1486 = vmatpush.msrb.mxu3 %v1457_v22  ;;  %v4025_v22 = vld [vmem:[%s4484_s0 + $0x68] sm:$0xff] }
 0x664   :  { %1487 = vmatpush.msrb.mxu3 %v1456_v32 }
 0x666   :  { %1488 = vmatpush.msrb.mxu3 %v1455_v12 }
 0x667   :  { %1445 = vperm.xlu2 %3154, %v3847_v40  }
 0x668   :  { %1489 = vmatpush.msrb.mxu3 %v1454_v35 }
 0x66a   :  { %1490 = vmatpush.msrb.mxu3 %v1453_v38 }
 0x66c   :  { %1491 = vmatpush.msrb.mxu3 %v1452_v13  ;;  %v1674_v13 = vld [vmem:[%s4485_s1 + $0x208] sm:$0x3] }
 0x679   :  { %v3136_v58 = vpop.permute.xlu2 %3135 }
 0x67a   :  { %v3137_v62 = vunpack.i.l.bf16 %v3136_v58  ;;  %v3138_v63 = vunpack.i.h.bf16 %v3136_v58 }
 0x689   :  { %v3146_v59 = vpop.permute.xlu2 %3145 }
 0x68a   :  { %v3147_v60 = vunpack.i.l.bf16 %v3146_v59  ;;  %v3148_v61 = vunpack.i.h.bf16 %v3146_v59 }
 0x68c   :  { %1411 = vmatpush.msra.mxu2 %v3147_v60 }
 0x68e   :  { %1412 = vmatpush.msra.mxu2 %v3148_v61 }
 0x690   :  { %1413 = vmatpush.msra.mxu2 %v3137_v62 }
 0x691   :  { %v3141_v17 = vpop.permute.xlu1 %3140  ;;  %v1254_v0 = vpop.permute.xlu2 %1253 }
 0x692   :  { %1414 = vmatpush.msra.mxu2 %v3138_v63  ;;  %v3142_v34 = vunpack.i.l.bf16 %v3141_v17  ;;  %v3143_v21 = vunpack.i.h.bf16 %v3141_v17  ;;  %v1269_v46 = vsel %vm682_vm8, %v1254_v0, %v1256_v25 }
 0x693   :  { %2936 = vmatmul.msk.f32.vlgmr.msra.gmra.mxu2 %vm703_vm7, %v1372_v56 }
 0x699   :  { %v1327_v7 = vpop.permute.xlu1 %1326  ;;  %v1374_v2 = vpop.permute.xlu2 %1373 }
 0x69a   :  { %2932 = vmatmul.msk.f32.vlgmr.msra.gmra.mxu1 %vm703_vm7, %v1327_v7 }
 0x69b   :  { %2937 = vmatmul.msk.f32.gmra.mxu2 %vm703_vm7, %v1374_v2 }
 0x6a1   :  { %v3151_v5 = vpop.permute.xlu1 %3150  ;;  %v1329_v11 = vpop.permute.xlu2 %1328 }
 0x6a2   :  { %v3152_v15 = vunpack.i.l.bf16 %v3151_v5  ;;  %2933 = vmatmul.msk.f32.gmra.mxu1 %vm703_vm7, %v1329_v11  ;;  %v3153_v18 = vunpack.i.h.bf16 %v3151_v5 }
 0x6a3   :  { %2938 = vmatmul.msk.f32.gmra.mxu2 %vm703_vm7, %v1376_v4 }
 0x6a4   :  { %1309 = vmatpush.msra.mxu0 %v3152_v15 }
 0x6a6   :  { %1310 = vmatpush.msra.mxu0 %v3153_v18  ;;  %v4010_v18 = vld [vmem:[%s4484_s0 + $0x28] sm:$0xff] }
 0x6a8   :  { %1311 = vmatpush.msra.mxu0 %v3142_v34 }
 0x6a9   :  { %v1260_v24 = vpop.permute.xlu1 %1259  ;;  %v1264_v40 = vpop.permute.xlu2 %1263 }
 0x6aa   :  { %1312 = vmatpush.msra.mxu0 %v3143_v21  ;;  %2934 = vmatmul.msk.f32.gmra.mxu1 %vm703_vm7, %v1331_v19  ;;  %v1270_v37 = vsel %vm682_vm8, %v1258_v8, %v1260_v24 }
 0x6ab   :  { %2928 = vmatmul.msk.f32.vlgmr.msra.gmra.mxu0 %vm703_vm7, %v1269_v46  ;;  %v4044_v46 = vld [vmem:[%s4486_s2] sm:$0xff] }
 0x6b1   :  { %v1262_v49 = vpop.permute.xlu1 %1261  ;;  %v1266_v30 = vpop.permute.xlu2 %1265 }
 0x6b2   :  { %v1271_v28 = vsel %vm682_vm8, %v1262_v49, %v1264_v40  ;;  %v1272_v31 = vsel %vm682_vm8, %v1266_v30, %v1268_v29 }
 0x6b3   :  { %2929 = vmatmul.msk.f32.gmra.mxu0 %vm703_vm7, %v1270_v37  ;;  %v3274_v37 = vmov 5  }
 0x6b4   :  { %3177 = vset.pattern.permute.xlu1 %v3274_v37  ;;  %3178 = vset.pattern.permute.xlu2 %v3274_v37 }
 0x6b9   :  { %v1378_v27 = vpop.permute.xlu1 %1377  ;;  %v1434_v48 = vpop.permute.xlu2 %1433 }
 0x6ba   :  { %2939 = vmatmul.msk.f32.gmra.mxu2 %vm703_vm7, %v1378_v27 }
 0x6bb   :  { %2930 = vmatmul.msk.f32.gmra.mxu0 %vm703_vm7, %v1271_v28 }
 0x6c1   :  { %v1333_v14 = vpop.permute.xlu1 %1332  ;;  %v1446_v8 = vpop.permute.xlu2 %1445 }
 0x6c2   :  { %2935 = vmatmul.msk.f32.gmra.mxu1 %vm703_vm7, %v1333_v14 }
 0x6c3   :  { %2931 = vmatmul.msk.f32.gmra.mxu0 %vm703_vm7, %v1272_v31  ;;  %v4050_v31 = vld [vmem:[%s4486_s2 + $0x8] sm:$0xff] }
 0x6cb   :  { %v1438_v6 = vpop.permute.xlu0 %1437  ;;  %v1442_v59 = vpop.permute.xlu1 %1441 }
 0x716   :  { %v1416_v42 = vpop.f32.mrf.mxu2 }
 0x717   :  { %v1359_v39 = vpop.f32.mrf.mxu1 }
 0x71e   :  { %v1419_v50 = vpop.f32.mrf.mxu2 }
 0x71f   :  { %v1362_v47 = vpop.f32.mrf.mxu1 }
 0x726   :  { %v1422_v56 = vpop.f32.mrf.mxu2 }
 0x727   :  { %v1365_v55 = vpop.f32.mrf.mxu1 }
 0x728   :  { %v1314_v43 = vpop.f32.mrf.mxu0 }
 0x729   :  { %v1360_v44 = vadd.f32 %v1359_v39, %v1314_v43  ;;  %v1673_v43 = vld [vmem:[%s4485_s1 + $0x200] sm:$0xff] }
 0x72b   :  { %v1428_v45 = vadd.f32 %v1416_v42, %v1360_v44  ;;  %v1672_v44 = vld [vmem:[%s4485_s1 + $0x1f8] sm:$0xff] }
 0x72d   :  { %v1448_v20 = vadd.f32 %v1434_v48, %v1428_v45  ;;  %v1671_v45 = vld [vmem:[%s4485_s1 + $0x1f0] sm:$0xff] }
 0x72f   :  { %2941 = vmatmul.msk.f32.vlgmr.msrb.gmra.mxu3 %vm604_vm6, %v1448_v20  ;;  %v1670_v20 = vld [vmem:[%s4485_s1 + $0x1e8] sm:$0xff] }
 0x730   :  { %v1317_v51 = vpop.f32.mrf.mxu0 }
 0x731   :  { %v1363_v52 = vadd.f32 %v1362_v47, %v1317_v51 }
 0x733   :  { %v1429_v53 = vadd.f32 %v1419_v50, %v1363_v52  ;;  %v1669_v52 = vld [vmem:[%s4485_s1 + $0x1e0] sm:$0xff] }
 0x735   :  { %v1449_v54 = vadd.f32 %v1438_v6, %v1429_v53  ;;  %v1668_v6 = vld [vmem:[%s4485_s1 + $0x1d8] sm:$0xff]  ;;  %v1667_v53 = vld [vmem:[%s4485_s1 + $0x1d0] sm:$0xff] }
 0x737   :  { %2942 = vmatmul.msk.f32.gmra.mxu3 %vm604_vm6, %v1449_v54  ;;  %v1666_v54 = vld [vmem:[%s4485_s1 + $0x1c8] sm:$0xff] }
 0x738   :  { %v1320_v9 = vpop.f32.mrf.mxu0 }
 0x739   :  { %v1366_v58 = vadd.f32 %v1365_v55, %v1320_v9 }
 0x73b   :  { %v1430_v25 = vadd.f32 %v1422_v56, %v1366_v58 }
 0x73d   :  { %v1450_v60 = vadd.f32 %v1442_v59, %v1430_v25  ;;  %v1425_v17 = vpop.f32.mrf.mxu2 }
 0x73f   :  { %2943 = vmatmul.msk.f32.gmra.mxu3 %vm604_vm6, %v1450_v60  ;;  %v1368_v61 = vpop.f32.mrf.mxu1 }
 0x740   :  { %v1323_v62 = vpop.f32.mrf.mxu0 }
 0x741   :  { %v1369_v63 = vadd.f32 %v1368_v61, %v1323_v62 }
 0x743   :  { %v1431_v0 = vadd.f32 %v1425_v17, %v1369_v63 }
 0x745   :  { %v1451_v7 = vadd.f32 %v1446_v8, %v1431_v0 }
 0x747   :  { %2944 = vmatmul.msk.f32.gmra.mxu3 %vm604_vm6, %v1451_v7 }
 0x7b2   :  { %v1493_v2 = vpop.f32.mrf.mxu3 }
 0x7b3   :  { %v1494_v26 = vadd.f32 %v1493_v2, %v3754_v1 }
 0x7b5   :  { %v3999_v11 = vmax.f32 %v1494_v26, 0.0 }
 0x7ba   :  { %v1496_v4 = vpop.f32.mrf.mxu3 }
 0x7bb   :  { %v1497_v5 = vadd.f32 %v1496_v4, %v3756_v3 }
 0x7bd   :  { %v4001_v15 = vmax.f32 %v1497_v5, 0.0 }
 0x7bf   :  { %v3167_v16 = vpack.i.bf16 %v3999_v11, %v4001_v15 }
 0x7c1   :  { %3168 = vrot.lane.b32.xlu0 %v3167_v16, %s3265_s19  ;;  %3158 = vrot.lane.b32.xlu2 %v3167_v16, %s3266_s20 }
 0x7c2   :  { %v1499_v36 = vpop.f32.mrf.mxu3 }
 0x7c3   :  { %v1500_v1 = vadd.f32 %v1499_v36, %v3777_v10  ;;  %v1516_v10 = vpop.permute.xlu0 %1515  ;;  %v3277_v36 = vmov 6  }
 0x7c5   :  { %v4016_v34 = vmax.f32 %v1500_v1, 0.0 }
 0x7c9   :  { %1601 = vrot.lane.b32.xlu0 %v4010_v18, %s3269_s21 }
 0x7ca   :  { %v1502_v3 = vpop.f32.mrf.mxu3 }
 0x7cb   :  { %v1503_v33 = vadd.f32 %v1502_v3, %v3779_v23 }
 0x7cd   :  { %v4018_v19 = vmax.f32 %v1503_v33, 0.0 }
 0x7cf   :  { %v3162_v21 = vpack.i.bf16 %v4016_v34, %v4018_v19 }
 0x7d1   :  { %3163 = vrot.lane.b32.xlu1 %v3162_v21, %s3266_s20  ;;  %3173 = vrot.lane.b32.xlu2 %v3162_v21, %s3265_s19  ;;  %v1834_v21 = vld [vmem:[%s4485_s1 + $0x248] sm:$0xff] }
 0x7d2   :  { %1605 = vrot.lane.b32.xlu0 %v4025_v22, %s3269_s21 }
 0x7d9   :  { %1513 = vrot.lane.b32.xlu1 %v3898_v41, %s3264_s14  ;;  %1599 = vrot.lane.b32.xlu2 %v3898_v41, %s3269_s21 }
 0x7e1   :  { %1560 = vrot.lane.b32.xlu1 %v3898_v41, %s3270_s28  ;;  %1603 = vrot.lane.b32.xlu2 %v3925_v57, %s3269_s21 }
 0x7e9   :  { %1562 = vrot.lane.b32.xlu1 %v3925_v57, %s3270_s28  ;;  %1659 = vperm.xlu2 %3178, %v4050_v31  }
 0x7f1   :  { %1654 = vperm.xlu1 %3177, %v4044_v46   ;;  %1747 = vrot.lane.b32.xlu2 %v4010_v18, %s3267_s11 }
 0x7f2   :  { %3189 = vset.pattern.permute.xlu2 %v3277_v36 }
 0x7f9   :  { %1749 = vrot.lane.b32.xlu2 %v4025_v22, %s3267_s11  ;;  %1707 = vrot.lane.b32.xlu1 %v4010_v18, %s3275_s22 }
 0x7fa   :  { %3190 = vset.pattern.permute.xlu1 %v3277_v36 }
 0x801   :  { %1709 = vrot.lane.b32.xlu1 %v4025_v22, %s3275_s22  ;;  %1818 = vperm.xlu2 %3189, %v4044_v46  }
 0x809   :  { %1780 = vrot.lane.b32.xlu1 %v4025_v22, %s3270_s28  ;;  %1840 = vrot.lane.b32.xlu2 %v4025_v22, %s3276_s23 }
 0x811   :  { %1822 = vperm.xlu1 %3190, %v4050_v31   ;;  %1938 = vrot.lane.b32.xlu2 %v4010_v18, %s3278_s24 }
 0x819   :  { %1940 = vrot.lane.b32.xlu2 %v4025_v22, %s3278_s24 }
 0x81b   :  { %v3159_v23 = vpop.permute.xlu2 %3158 }
 0x81c   :  { %v3160_v57 = vunpack.i.l.bf16 %v3159_v23  ;;  %v3161_v28 = vunpack.i.h.bf16 %v3159_v23  ;;  %v1833_v23 = vld [vmem:[%s4485_s1 + $0x240] sm:$0xff] }
 0x82b   :  { %v3174_v41 = vpop.permute.xlu2 %3173 }
 0x82c   :  { %v3175_v29 = vunpack.i.l.bf16 %v3174_v41  ;;  %v3176_v14 = vunpack.i.h.bf16 %v3174_v41 }
 0x833   :  { %v3169_v40 = vpop.permute.xlu0 %3168  ;;  %v1600_v12 = vpop.permute.xlu2 %1599 }
 0x834   :  { %v3170_v35 = vunpack.i.l.bf16 %v3169_v40  ;;  %v3171_v38 = vunpack.i.h.bf16 %v3169_v40  ;;  %v1831_v40 = vld [vmem:[%s4485_s1 + $0x230] sm:$0xff] }
 0x83b   :  { %v4055_v32 = vpop.permute.xlu0 %1601  ;;  %v1604_v48 = vpop.permute.xlu2 %1603 }
 0x83c   :  { %v1607_v42 = vsel %vm682_vm8, %v1600_v12, %v4055_v32 }
 0x843   :  { %v3164_v24 = vpop.permute.xlu1 %3163  ;;  %v1660_v8 = vpop.permute.xlu2 %1659 }
 0x844   :  { %v3165_v49 = vunpack.i.l.bf16 %v3164_v24  ;;  %v3166_v27 = vunpack.i.h.bf16 %v3164_v24  ;;  %v4080_v47 = vpop.permute.xlu0 %1605 }
 0x845   :  { %v1608_v51 = vsel %vm682_vm8, %v1604_v48, %v4080_v47 }
 0x846   :  { %1549 = vmatpush.msrb.mxu0 %v3165_v49  ;;  %3008 = vmatpush.msrb.mxu1 %v3165_v49  ;;  %v1832_v49 = vld [vmem:[%s4485_s1 + $0x238] sm:$0xff] }
 0x848   :  { %1550 = vmatpush.msrb.mxu0 %v3166_v27  ;;  %3009 = vmatpush.msrb.mxu1 %v3166_v27 }
 0x84a   :  { %1551 = vmatpush.msrb.mxu0 %v3160_v57  ;;  %3010 = vmatpush.msrb.mxu1 %v3160_v57 }
 0x84b   :  { %v1514_v30 = vpop.permute.xlu1 %1513 }
 0x84c   :  { %1552 = vmatpush.msrb.mxu0 %v3161_v28  ;;  %3011 = vmatpush.msrb.mxu1 %v3161_v28  ;;  %v1830_v28 = vld [vmem:[%s4485_s1 + $0x228] sm:$0xff] }
 0x84d   :  { %2946 = vmatmul.msk.f32.vlgmr.msrb.gmra.mxu1 %vm703_vm7, %v1516_v10  ;;  %2945 = vmatmul.msk.f32.vlgmr.msrb.gmra.mxu0 %vm703_vm7, %v1514_v30  ;;  %v1828_v30 = vld [vmem:[%s4485_s1 + $0x218] sm:$0xff] }
 0x84e   :  { %1637 = vmatpush.msra.mxu0 %v3175_v29  ;;  %1580 = vmatpush.msra.mxu1 %v4018_v19  ;;  %v1829_v29 = vld [vmem:[%s4485_s1 + $0x220] sm:$0xff] }
 0x850   :  { %1638 = vmatpush.msra.mxu0 %v3176_v14  ;;  %1581 = vmatpush.msra.mxu1 %v4016_v34  ;;  %v1827_v14 = vld [vmem:[%s4485_s1 + $0x210] sm:$0xff] }
 0x852   :  { %1639 = vmatpush.msra.mxu0 %v3170_v35  ;;  %1582 = vmatpush.msra.mxu1 %v4001_v15 }
 0x853   :  { %v1561_v39 = vpop.permute.xlu1 %1560 }
 0x854   :  { %1640 = vmatpush.msra.mxu0 %v3171_v38  ;;  %1583 = vmatpush.msra.mxu1 %v3999_v11 }
 0x855   :  { %2947 = vmatmul.msk.f32.vlgmr.msra.gmra.mxu1 %vm703_vm7, %v1561_v39  ;;  %2949 = vmatmul.msk.f32.vlgmr.msra.gmra.mxu0 %vm703_vm7, %v1607_v42 }
 0x856   :  { %2951 = vmatpush.msk.msrb.mxu1 %vm617_vm3, %v1674_v13 }
 0x858   :  { %1692 = vmatpush.msrb.mxu1 %v1673_v43 }
 0x85a   :  { %1693 = vmatpush.msrb.mxu1 %v1672_v44 }
 0x85b   :  { %v1563_v50 = vpop.permute.xlu1 %1562 }
 0x85c   :  { %1694 = vmatpush.msrb.mxu1 %v1671_v45 }
 0x85d   :  { %2948 = vmatmul.msk.f32.gmra.mxu1 %vm703_vm7, %v1563_v50  ;;  %2950 = vmatmul.msk.f32.gmra.mxu0 %vm703_vm7, %v1608_v51 }
 0x85e   :  { %1695 = vmatpush.msrb.mxu1 %v1670_v20 }
 0x860   :  { %1696 = vmatpush.msrb.mxu1 %v1669_v52 }
 0x862   :  { %1697 = vmatpush.msrb.mxu1 %v1668_v6 }
 0x863   :  { %v1655_v25 = vpop.permute.xlu1 %1654 }
 0x864   :  { %1698 = vmatpush.msrb.mxu1 %v1667_v53 }
 0x866   :  { %1699 = vmatpush.msrb.mxu1 %v1666_v54 }
 0x868   :  { %1858 = vmatpush.msra.mxu1 %v4018_v19  ;;  %v1835_v19 = vld [vmem:[%s4485_s1 + $0x250] sm:$0x3] }
 0x86a   :  { %1859 = vmatpush.msra.mxu1 %v4016_v34 }
 0x86b   :  { %v1708_v33 = vpop.permute.xlu1 %1707 }
 0x86c   :  { %1860 = vmatpush.msra.mxu1 %v4001_v15  ;;  %v1748_v15 = vpop.permute.xlu2 %1747 }
 0x86e   :  { %1861 = vmatpush.msra.mxu1 %v3999_v11 }
 0x873   :  { %v1710_v41 = vpop.permute.xlu1 %1709 }
 0x874   :  { %v1750_v16 = vpop.permute.xlu2 %1749 }
 0x87b   :  { %v1781_v57 = vpop.permute.xlu1 %1780 }
 0x87c   :  { %v1819_v12 = vpop.permute.xlu2 %1818 }
 0x883   :  { %v1823_v52 = vpop.permute.xlu1 %1822 }
 0x884   :  { %v1841_v38 = vpop.permute.xlu2 %1840 }
 0x8ca   :  { %v1557_v55 = vpop.f32.mrf.mxu1  ;;  %v1554_v9 = vpop.f32.mrf.mxu0 }
 0x8d2   :  { %v1585_v56 = vpop.f32.mrf.mxu1  ;;  %v1642_v58 = vpop.f32.mrf.mxu0 }
 0x8d3   :  { %v1586_v59 = vadd.f32 %v1585_v56, %v1554_v9  ;;  %v1837_v56 = vld [vmem:[%s4485_s1 + $0x260] sm:$0xff] }
 0x8d5   :  { %v1648_v60 = vadd.f32 %v1642_v58, %v1586_v59 }
 0x8d7   :  { %v1662_v61 = vadd.f32 %v1655_v25, %v1648_v60 }
 0x8d9   :  { %v1664_v62 = vmax.f32 %v1662_v61, 0.0 }
 0x8da   :  { %v1588_v63 = vpop.f32.mrf.mxu1  ;;  %v1645_v17 = vpop.f32.mrf.mxu0 }
 0x8db   :  { %v1589_v0 = vadd.f32 %v1588_v63, %v1557_v55  ;;  %2952 = vmatmul.msk.f32.vlgmr.msrb.gmra.mxu1 %vm604_vm6, %v1664_v62  ;;  %v1836_v55 = vld [vmem:[%s4485_s1 + $0x258] sm:$0xff] }
 0x8dd   :  { %v1649_v7 = vadd.f32 %v1645_v17, %v1589_v0 }
 0x8df   :  { %v1663_v2 = vadd.f32 %v1660_v8, %v1649_v7  ;;  %v4186_v8 = vld [vmem:[%s4484_s0 + $0x30] sm:$0xff] }
 0x8e0   :  { %v1972_v7 = vld [vmem:[%s4484_s0 + $0x70] sm:$0xff] }
 0x8e1   :  { %v1665_v26 = vmax.f32 %v1663_v2, 0.0  ;;  %v1939_v2 = vpop.permute.xlu2 %1938 }
 0x8e3   :  { %2953 = vmatmul.msk.f32.gmra.mxu1 %vm604_vm6, %v1665_v26 }
 0x8e9   :  { %v1941_v26 = vpop.permute.xlu2 %1940 }
 0x958   :  { %v1701_v4 = vpop.f32.mrf.mxu1 }
 0x960   :  { %v1704_v5 = vpop.f32.mrf.mxu1 }
 0x961   :  { %v3179_v11 = vpack.i.bf16 %v1701_v4, %v1704_v5  ;;  %1769 = vmatpush.msra.mxu3 %v1704_v5  ;;  %v2041_v5 = vld [vmem:[%s4485_s1 + $0x298] sm:$0xff] }
 0x963   :  { %3180 = vrot.lane.b32.xlu0 %v3179_v11, %s3266_s20  ;;  %1770 = vmatpush.msra.mxu3 %v1701_v4  ;;  %v2043_v4 = vld [vmem:[%s4485_s1 + $0x2a8] sm:$0x3] }
 0x964   :  { %2956 = vmatmul.msk.f32.vlgmr.msra.gmra.mxu3 %vm1719_vm9, %v1748_v15 }
 0x96b   :  { %3185 = vrot.lane.b32.xlu0 %v3179_v11, %s3265_s19  ;;  %v2040_v11 = vld [vmem:[%s4485_s1 + $0x290] sm:$0xff] }
 0x96c   :  { %2957 = vmatmul.msk.f32.gmra.mxu3 %vm1719_vm9, %v1750_v16 }
 0x973   :  { %1778 = vrot.lane.b32.xlu0 %v4010_v18, %s3270_s28 }
 0x97b   :  { %1838 = vrot.lane.b32.xlu0 %v4010_v18, %s3276_s23 }
 0x9d5   :  { %v3181_v1 = vpop.permute.xlu0 %3180 }
 0x9d6   :  { %v3182_v3 = vunpack.i.l.bf16 %v3181_v1  ;;  %v3183_v34 = vunpack.i.h.bf16 %v3181_v1 }
 0x9d8   :  { %1738 = vmatpush.msrb.mxu2 %v3182_v3 }
 0x9da   :  { %1739 = vmatpush.msrb.mxu2 %v3183_v34 }
 0x9db   :  { %2954 = vmatmul.msk.f32.vlgmr.msrb.gmra.mxu2 %vm1719_vm9, %v1708_v33 }
 0x9dc   :  { %2962 = vmatpush.msk.msra.mxu2 %vm617_vm3, %v1835_v19 }
 0x9dd   :  { %v3186_v10 = vpop.permute.xlu0 %3185 }
 0x9de   :  { %v3187_v24 = vunpack.i.l.bf16 %v3186_v10  ;;  %1886 = vmatpush.msra.mxu2 %v1834_v21  ;;  %v3188_v37 = vunpack.i.h.bf16 %v3186_v10 }
 0x9e0   :  { %1806 = vmatpush.msrb.mxu0 %v3187_v24  ;;  %1887 = vmatpush.msra.mxu2 %v1833_v23 }
 0x9e2   :  { %1807 = vmatpush.msrb.mxu0 %v3188_v37  ;;  %1888 = vmatpush.msra.mxu2 %v1832_v49  ;;  %v2038_v49 = vld [vmem:[%s4485_s1 + $0x280] sm:$0xff]  ;;  %v2036_v37 = vld [vmem:[%s4485_s1 + $0x270] sm:$0xff] }
 0x9e3   :  { %2955 = vmatmul.msk.f32.gmra.mxu2 %vm1719_vm9, %v1710_v41  ;;  %v2035_v41 = vld [vmem:[%s4485_s1 + $0x268] sm:$0xff] }
 0x9e4   :  { %1889 = vmatpush.msra.mxu2 %v1831_v40 }
 0x9e5   :  { %v1779_v27 = vpop.permute.xlu0 %1778 }
 0x9e6   :  { %2958 = vmatmul.msk.f32.vlgmr.msrb.gmra.mxu0 %vm1719_vm9, %v1779_v27  ;;  %1890 = vmatpush.msra.mxu2 %v1830_v28 }
 0x9e7   :  { %v1772_v13 = vpop.f32.mrf.mxu3 }
 0x9e8   :  { %1891 = vmatpush.msra.mxu2 %v1829_v29 }
 0x9ea   :  { %1892 = vmatpush.msra.mxu2 %v1828_v30 }
 0x9ec   :  { %1893 = vmatpush.msra.mxu2 %v1827_v14 }
 0x9ed   :  { %v1839_v35 = vpop.permute.xlu0 %1838 }
 0x9ee   :  { %2959 = vmatmul.msk.f32.gmra.mxu0 %vm1719_vm9, %v1781_v57  ;;  %2960 = vmatmul.msk.f32.vlgmr.msra.gmra.mxu1 %vm703_vm7, %v1839_v35 }
 0x9ef   :  { %v1775_v45 = vpop.f32.mrf.mxu3  ;;  %2971 = vmatpush.msk.msrb.mxu2 %vm617_vm3, %v2043_v4  ;;  %v2197_v4 = vld [vmem:[%s4485_s1 + $0x2c0] sm:$0xff] }
 0x9f6   :  { %2961 = vmatmul.msk.f32.gmra.mxu1 %vm703_vm7, %v1841_v38 }
 0xa5e   :  { %v1741_v39 = vpop.f32.mrf.mxu2 }
 0xa5f   :  { %v1773_v42 = vadd.f32 %v1772_v13, %v1741_v39 }
 0xa63   :  { %v1809_v43 = vpop.f32.mrf.mxu0 }
 0xa64   :  { %v1815_v44 = vadd.f32 %v1809_v43, %v1773_v42 }
 0xa66   :  { %v1825_v48 = vadd.f32 %v1819_v12, %v1815_v44  ;;  %v1744_v20 = vpop.f32.mrf.mxu2 }
 0xa67   :  { %v1776_v50 = vadd.f32 %v1775_v45, %v1744_v20 }
 0xa68   :  { %2963 = vmatmul.msk.f32.vlgmr.msra.gmra.mxu2 %vm604_vm6, %v1825_v48 }
 0xa6b   :  { %v1812_v51 = vpop.f32.mrf.mxu0  ;;  %v1863_v54 = vpop.f32.mrf.mxu1 }
 0xa6c   :  { %v1816_v6 = vadd.f32 %v1812_v51, %v1776_v50  ;;  %v1864_v59 = vadd.f32 %v1863_v54, %v1836_v55 }
 0xa6e   :  { %v1826_v53 = vadd.f32 %v1823_v52, %v1816_v6 }
 0xa70   :  { %2964 = vmatmul.msk.f32.gmra.mxu2 %vm604_vm6, %v1826_v53  ;;  %v3281_v53 = vmov 8  }
 0xa71   :  { %3213 = vset.pattern.permute.xlu1 %v3281_v53 }
 0xa73   :  { %v1866_v58 = vpop.f32.mrf.mxu1 }
 0xa74   :  { %v1867_v25 = vadd.f32 %v1866_v58, %v1837_v56  ;;  %v2203_v56 = vld [vmem:[%s4485_s1 + $0x2f0] sm:$0x3]  ;;  %v2202_v58 = vld [vmem:[%s4485_s1 + $0x2e8] sm:$0xff] }
 0xaeb   :  { %v1895_v9 = vpop.f32.mrf.mxu2 }
 0xaec   :  { %v1896_v60 = vadd.f32 %v1895_v9, %v1864_v59 }
 0xaee   :  { %v4173_v63 = vmax.f32 %v1896_v60, 0.0  ;;  %v2200_v60 = vld [vmem:[%s4485_s1 + $0x2d8] sm:$0xff] }
 0xaf3   :  { %v1898_v61 = vpop.f32.mrf.mxu2 }
 0xaf4   :  { %v1899_v62 = vadd.f32 %v1898_v61, %v1867_v25 }
 0xaf6   :  { %v4175_v17 = vmax.f32 %v1899_v62, 0.0 }
 0xaf8   :  { %v3191_v0 = vpack.i.bf16 %v4173_v63, %v4175_v17  ;;  %1960 = vmatpush.msra.mxu0 %v4175_v17 }
 0xafa   :  { %3192 = vrot.lane.b32.xlu0 %v3191_v0, %s3266_s20  ;;  %3197 = vrot.lane.b32.xlu1 %v3191_v0, %s3265_s19  ;;  %v2199_v0 = vld [vmem:[%s4485_s1 + $0x2d0] sm:$0xff] }
 0xafb   :  { %1961 = vmatpush.msra.mxu0 %v4173_v63 }
 0xafc   :  { %2967 = vmatmul.msk.f32.vlgmr.msra.gmra.mxu0 %vm1719_vm9, %v1939_v2 }
 0xb02   :  { %1979 = vrot.lane.b32.xlu1 %v4186_v8, %s3279_s4  ;;  %1977 = vrot.lane.b32.xlu0 %v4010_v18, %s3279_s4  ;;  %v3280_v18 = vmov 7  }
 0xb03   :  { %3202 = vset.pattern.permute.xlu0 %v3280_v18  ;;  %3201 = vset.pattern.permute.xlu2 %v3280_v18  ;;  %v2196_v18 = vld [vmem:[%s4485_s1 + $0x2b8] sm:$0xff] }
 0xb04   :  { %2968 = vmatmul.msk.f32.gmra.mxu0 %vm1719_vm9, %v1941_v26  ;;  %2024 = vperm.xlu2 %3201, %v4044_v46   ;;  %v2198_v26 = vld [vmem:[%s4485_s1 + $0x2c8] sm:$0xff] }
 0xb0a   :  { %1983 = vrot.lane.b32.xlu1 %v1972_v7, %s3279_s4  ;;  %1981 = vrot.lane.b32.xlu0 %v4025_v22, %s3279_s4  ;;  %v2042_v22 = vld [vmem:[%s4485_s1 + $0x2a0] sm:$0xff] }
 0xb0b   :  { %2061 = vmatpush.msrb.mxu2 %v2042_v22  ;;  %v2195_v22 = vld [vmem:[%s4485_s1 + $0x2b0] sm:$0xff] }
 0xb0c   :  { %2076 = vrot.lane.b32.xlu2 %v4186_v8, %s3275_s22 }
 0xb0d   :  { %2062 = vmatpush.msrb.mxu2 %v2041_v5  ;;  %3214 = vset.pattern.permute.xlu2 %v3281_v53 }
 0xb0f   :  { %2063 = vmatpush.msrb.mxu2 %v2040_v11 }
 0xb12   :  { %2028 = vperm.xlu0 %3202, %v4050_v31  }
 0xb14   :  { %2115 = vrot.lane.b32.xlu2 %v4186_v8, %s3267_s11 }
 0xb1a   :  { %2078 = vrot.lane.b32.xlu0 %v1972_v7, %s3275_s22 }
 0xb1c   :  { %2117 = vrot.lane.b32.xlu2 %v1972_v7, %s3267_s11  ;;  %s3292_s11 = smov [#allocation2]  }
 0xb1d   :  { %s2835_s27 = sshll.u32 %s3292_s11, 4  ;;  %s2836_s27 = int_to_ptr.vmem [resolvable:$true] %s2835_s27 }
 0xb22   :  { %2148 = vrot.lane.b32.xlu0 %v1972_v7, %s3270_s28 }
 0xb24   :  { %2190 = vperm.xlu2 %3214, %v4050_v31   ;;  %v2201_v31 = vld [vmem:[%s4485_s1 + $0x2e0] sm:$0xff] }
 0xb2a   :  { %2272 = vrot.lane.b32.xlu0 %v4186_v8, %s3276_s23 }
 0xb32   :  { %2240 = vrot.lane.b32.xlu0 %v4186_v8, %s3264_s14  ;;  %s3283_s14 = smov 10  }
 0xb5e   :  { %v2025_v29 = vpop.permute.xlu2 %2024 }
 0xb66   :  { %v2077_v51 = vpop.permute.xlu2 %2076 }
 0xb6c   :  { %v3193_v15 = vpop.permute.xlu0 %3192  ;;  %v3198_v16 = vpop.permute.xlu1 %3197 }
 0xb6d   :  { %v3194_v36 = vunpack.i.l.bf16 %v3193_v15  ;;  %v3199_v1 = vunpack.i.l.bf16 %v3198_v16  ;;  %v3195_v3 = vunpack.i.h.bf16 %v3193_v15  ;;  %v3200_v33 = vunpack.i.h.bf16 %v3198_v16 }
 0xb6e   :  { %v2116_v52 = vpop.permute.xlu2 %2115 }
 0xb6f   :  { %1929 = vmatpush.msrb.mxu3 %v3194_v36  ;;  %2012 = vmatpush.msrb.mxu1 %v3199_v1 }
 0xb71   :  { %1930 = vmatpush.msrb.mxu3 %v3195_v3  ;;  %2013 = vmatpush.msrb.mxu1 %v3200_v33 }
 0xb72   :  { %2965 = vmatmul.msk.f32.vlgmr.msrb.gmra.mxu3 %vm1719_vm9, %v4055_v32  ;;  %v2039_v32 = vld [vmem:[%s4485_s1 + $0x288] sm:$0xff] }
 0xb73   :  { %2064 = vmatpush.msrb.mxu2 %v2039_v32 }
 0xb74   :  { %v1980_v34 = vpop.permute.xlu1 %1979  ;;  %v1978_v19 = vpop.permute.xlu0 %1977 }
 0xb75   :  { %v1986_v21 = vsel %vm1985_vm10, %v1978_v19, %v1980_v34  ;;  %2065 = vmatpush.msrb.mxu2 %v2038_v49 }
 0xb76   :  { %2969 = vmatmul.msk.f32.vlgmr.msrb.gmra.mxu1 %vm1719_vm9, %v1986_v21  ;;  %v2118_v6 = vpop.permute.xlu2 %2117 }
 0xb79   :  { %v1963_v40 = vpop.f32.mrf.mxu0 }
 0xb7a   :  { %2966 = vmatmul.msk.f32.gmra.mxu3 %vm1719_vm9, %v4080_v47  ;;  %v2037_v47 = vld [vmem:[%s4485_s1 + $0x278] sm:$0xff] }
 0xb7b   :  { %2066 = vmatpush.msrb.mxu2 %v2037_v47 }
 0xb7c   :  { %v1984_v10 = vpop.permute.xlu1 %1983  ;;  %v1982_v23 = vpop.permute.xlu0 %1981 }
 0xb7d   :  { %v1987_v24 = vsel %vm1985_vm10, %v1982_v23, %v1984_v10  ;;  %2067 = vmatpush.msrb.mxu2 %v2036_v37 }
 0xb7e   :  { %2970 = vmatmul.msk.f32.gmra.mxu1 %vm1719_vm9, %v1987_v24  ;;  %v2191_v10 = vpop.permute.xlu2 %2190 }
 0xb7f   :  { %2068 = vmatpush.msrb.mxu2 %v2035_v41 }
 0xb81   :  { %v1966_v12 = vpop.f32.mrf.mxu0 }
 0xb84   :  { %v2029_v42 = vpop.permute.xlu0 %2028 }
 0xb8c   :  { %v2079_v62 = vpop.permute.xlu0 %2078 }
 0xb94   :  { %v2149_v2 = vpop.permute.xlu0 %2148 }
 0xbf3   :  { %v2015_v27 = vpop.f32.mrf.mxu1 }
 0xbf5   :  { %v1932_v57 = vpop.f32.mrf.mxu3 }
 0xbf6   :  { %v1964_v28 = vadd.f32 %v1963_v40, %v1932_v57  ;;  %v2273_v57 = vpop.permute.xlu0 %2272 }
 0xbf8   :  { %v2021_v30 = vadd.f32 %v2015_v27, %v1964_v28 }
 0xbfa   :  { %v2031_v14 = vadd.f32 %v2025_v29, %v2021_v30 }
 0xbfb   :  { %v2018_v13 = vpop.f32.mrf.mxu1 }
 0xbfc   :  { %v2033_v35 = vmax.f32 %v2031_v14, 0.0 }
 0xbfd   :  { %v1935_v38 = vpop.f32.mrf.mxu3 }
 0xbfe   :  { %v1967_v39 = vadd.f32 %v1966_v12, %v1935_v38  ;;  %2972 = vmatmul.msk.f32.vlgmr.msrb.gmra.mxu2 %vm604_vm6, %v2033_v35  ;;  %v2241_v35 = vpop.permute.xlu0 %2240  ;;  %v2343_v38 = vld [vmem:[%s4485_s1 + $0x338] sm:$0x3] }
 0xc00   :  { %v2022_v43 = vadd.f32 %v2018_v13, %v1967_v39  ;;  %v2342_v13 = vld [vmem:[%s4485_s1 + $0x330] sm:$0xff] }
 0xc02   :  { %v2032_v44 = vadd.f32 %v2029_v42, %v2022_v43  ;;  %v2341_v42 = vld [vmem:[%s4485_s1 + $0x328] sm:$0xff]  ;;  %v2340_v43 = vld [vmem:[%s4485_s1 + $0x320] sm:$0xff] }
 0xc04   :  { %v2034_v45 = vmax.f32 %v2032_v44, 0.0  ;;  %v2339_v44 = vld [vmem:[%s4485_s1 + $0x318] sm:$0xff] }
 0xc06   :  { %2973 = vmatmul.msk.f32.gmra.mxu2 %vm604_vm6, %v2034_v45  ;;  %v2338_v45 = vld [vmem:[%s4485_s1 + $0x310] sm:$0xff] }
 0xc81   :  { %v2070_v48 = vpop.f32.mrf.mxu2 }
 0xc89   :  { %v2073_v20 = vpop.f32.mrf.mxu2 }
 0xc8a   :  { %v3203_v50 = vpack.i.bf16 %v2070_v48, %v2073_v20  ;;  %2137 = vmatpush.msrb.mxu0 %v2073_v20  ;;  %v2336_v20 = vld [vmem:[%s4485_s1 + $0x300] sm:$0xff] }
 0xc8c   :  { %3204 = vrot.lane.b32.xlu1 %v3203_v50, %s3266_s20  ;;  %2138 = vmatpush.msrb.mxu0 %v2070_v48  ;;  %v2337_v48 = vld [vmem:[%s4485_s1 + $0x308] sm:$0xff] }
 0xc8d   :  { %2976 = vmatmul.msk.f32.vlgmr.msrb.gmra.mxu0 %vm1719_vm9, %v2116_v52 }
 0xc94   :  { %3209 = vrot.lane.b32.xlu1 %v3203_v50, %s3265_s19  ;;  %v2335_v50 = vld [vmem:[%s4485_s1 + $0x2f8] sm:$0xff] }
 0xc95   :  { %2977 = vmatmul.msk.f32.gmra.mxu0 %vm1719_vm9, %v2118_v6 }
 0xc9c   :  { %2146 = vrot.lane.b32.xlu1 %v4186_v8, %s3270_s28 }
 0xca4   :  { %2186 = vperm.xlu1 %3213, %v4044_v46  }
 0xcfe   :  { %v3205_v54 = vpop.permute.xlu1 %3204 }
 0xcff   :  { %v3206_v55 = vunpack.i.l.bf16 %v3205_v54  ;;  %v3207_v9 = vunpack.i.h.bf16 %v3205_v54 }
 0xd01   :  { %2106 = vmatpush.msra.mxu3 %v3206_v55 }
 0xd03   :  { %2107 = vmatpush.msra.mxu3 %v3207_v9 }
 0xd04   :  { %2974 = vmatmul.msk.f32.vlgmr.msra.gmra.mxu3 %vm1719_vm9, %v2077_v51 }
 0xd05   :  { %2980 = vmatpush.msk.msrb.mxu3 %vm617_vm3, %v2203_v56 }
 0xd06   :  { %v3210_v59 = vpop.permute.xlu1 %3209 }
 0xd07   :  { %v3211_v25 = vunpack.i.l.bf16 %v3210_v59  ;;  %2221 = vmatpush.msrb.mxu3 %v2202_v58  ;;  %v3212_v61 = vunpack.i.h.bf16 %v3210_v59  ;;  %v4342_v59 = vld [vmem:[%s4484_s0 + $0x38] sm:$0xff] }
 0xd09   :  { %2174 = vmatpush.msra.mxu1 %v3211_v25  ;;  %2222 = vmatpush.msrb.mxu3 %v2201_v31  ;;  %v3285_v25 = vmov 10  }
 0xd0a   :  { %v2140_v5 = vpop.f32.mrf.mxu0  ;;  %3226 = vset.pattern.permute.xlu1 %v3285_v25  ;;  %v2766_v25 = vld [vmem:[%s4485_s1 + $0x3f0] sm:$0xff] }
 0xd0b   :  { %2175 = vmatpush.msra.mxu1 %v3212_v61  ;;  %2223 = vmatpush.msrb.mxu3 %v2200_v60  ;;  %v3286_v60 = vmov 11  }
 0xd0c   :  { %2975 = vmatmul.msk.f32.gmra.mxu3 %vm1719_vm9, %v2079_v62 }
 0xd0d   :  { %2224 = vmatpush.msrb.mxu3 %v2199_v0 }
 0xd0e   :  { %v2147_v7 = vpop.permute.xlu1 %2146 }
 0xd0f   :  { %2978 = vmatmul.msk.f32.vlgmr.msra.gmra.mxu1 %vm1719_vm9, %v2147_v7  ;;  %2225 = vmatpush.msrb.mxu3 %v2198_v26 }
 0xd11   :  { %2226 = vmatpush.msrb.mxu3 %v2197_v4  ;;  %v2504_v4 = vld [vmem:[%s4485_s1 + $0x3a8] sm:$0xf] }
 0xd12   :  { %v2143_v3 = vpop.f32.mrf.mxu0 }
 0xd13   :  { %2227 = vmatpush.msrb.mxu3 %v2196_v18  ;;  %v2503_v18 = vld [vmem:[%s4485_s1 + $0x3a0] sm:$0xff] }
 0xd15   :  { %2228 = vmatpush.msrb.mxu3 %v2195_v22  ;;  %v2467_v22 = vld [vmem:[%s4485_s1 + $0x360] sm:$0x3] }
 0xd16   :  { %v2187_v36 = vpop.permute.xlu1 %2186 }
 0xd17   :  { %2979 = vmatmul.msk.f32.gmra.mxu1 %vm1719_vm9, %v2149_v2 }
 0xd87   :  { %v2109_v11 = vpop.f32.mrf.mxu3 }
 0xd88   :  { %v2141_v15 = vadd.f32 %v2140_v5, %v2109_v11  ;;  %v2466_v5 = vld [vmem:[%s4485_s1 + $0x358] sm:$0xff] }
 0xd89   :  { %v2502_v11 = vld [vmem:[%s4485_s1 + $0x398] sm:$0xff] }
 0xd8c   :  { %v2177_v16 = vpop.f32.mrf.mxu1 }
 0xd8d   :  { %v2183_v1 = vadd.f32 %v2177_v16, %v2141_v15  ;;  %v2501_v15 = vld [vmem:[%s4485_s1 + $0x390] sm:$0xff] }
 0xd8e   :  { %v2465_v16 = vld [vmem:[%s4485_s1 + $0x350] sm:$0xff] }
 0xd8f   :  { %v2193_v33 = vadd.f32 %v2187_v36, %v2183_v1  ;;  %v2112_v34 = vpop.f32.mrf.mxu3  ;;  %v2500_v36 = vld [vmem:[%s4485_s1 + $0x388] sm:$0xff] }
 0xd90   :  { %v2144_v19 = vadd.f32 %v2143_v3, %v2112_v34  ;;  %v2464_v1 = vld [vmem:[%s4485_s1 + $0x348] sm:$0xff]  ;;  %v2499_v3 = vld [vmem:[%s4485_s1 + $0x380] sm:$0xff]  ;;  %v2498_v34 = vld [vmem:[%s4485_s1 + $0x378] sm:$0xff] }
 0xd91   :  { %2981 = vmatmul.msk.f32.vlgmr.msrb.gmra.mxu3 %vm604_vm6, %v2193_v33  ;;  %v2463_v33 = vld [vmem:[%s4485_s1 + $0x340] sm:$0xff] }
 0xd94   :  { %v2180_v21 = vpop.f32.mrf.mxu1 }
 0xd95   :  { %v2184_v23 = vadd.f32 %v2180_v21, %v2144_v19  ;;  %v2497_v19 = vld [vmem:[%s4485_s1 + $0x370] sm:$0xff]  ;;  %v2496_v21 = vld [vmem:[%s4485_s1 + $0x368] sm:$0xff] }
 0xd97   :  { %v2194_v24 = vadd.f32 %v2191_v10, %v2184_v23 }
 0xd99   :  { %2982 = vmatmul.msk.f32.gmra.mxu3 %vm604_vm6, %v2194_v24 }
 0xe14   :  { %v2230_v32 = vpop.f32.mrf.mxu3 }
 0xe15   :  { %v2231_v49 = vadd.f32 %v2230_v32, %v4173_v63 }
 0xe17   :  { %v2236_v41 = vmax.f32 %v2231_v49, 0.0 }
 0xe1c   :  { %v2233_v47 = vpop.f32.mrf.mxu3 }
 0xe1d   :  { %v2234_v37 = vadd.f32 %v2233_v47, %v4175_v17  ;;  %v3282_v17 = vmov 9  }
 0xe1e   :  { %3225 = vset.pattern.permute.xlu2 %v3282_v17 }
 0xe1f   :  { %v2237_v40 = vmax.f32 %v2234_v37, 0.0 }
 0xe21   :  { %2290 = vmatpush.msra.mxu2 %v2237_v40  ;;  %2490 = vmatpush.msra.mxu3 %v2237_v40  ;;  %v3220_v27 = vpack.i.bf16 %v2236_v41, %v2237_v40 }
 0xe23   :  { %3221 = vrot.lane.b32.xlu2 %v3220_v27, %s3265_s19  ;;  %3216 = vrot.lane.b32.xlu1 %v3220_v27, %s3266_s20 }
 0xe24   :  { %2291 = vmatpush.msra.mxu2 %v2236_v41  ;;  %2491 = vmatpush.msra.mxu3 %v2236_v41 }
 0xe25   :  { %2984 = vmatmul.msk.f32.vlgmr.msra.gmra.mxu2 %vm1719_vm9, %v2273_v57 }
 0xe2b   :  { %2296 = vrot.lane.b32.xlu1 %v4186_v8, %s3278_s24  ;;  %2330 = vperm.xlu2 %3225, %v4044_v46  }
 0xe33   :  { %2427 = vrot.lane.b32.xlu2 %v4186_v8, %s3279_s4  ;;  %2370 = vrot.lane.b32.xlu1 %v4186_v8, %s3283_s14 }
 0xe34   :  { %3227 = vset.pattern.permute.xlu2 %v3286_v60  ;;  %v2765_v60 = vld [vmem:[%s4485_s1 + $0x3e8] sm:$0xff] }
 0xe3b   :  { %2399 = vrot.lane.b32.xlu2 %v4186_v8, %s3269_s21  ;;  %s3287_s21 = smov 106  }
 0xe43   :  { %2469 = vperm.xlu2 %3227, %v4044_v46  }
 0xe7d   :  { %v3222_v63 = vpop.permute.xlu2 %3221 }
 0xe7e   :  { %v3223_v28 = vunpack.i.l.bf16 %v3222_v63  ;;  %v3224_v29 = vunpack.i.h.bf16 %v3222_v63 }
 0xe80   :  { %2320 = vmatpush.msrb.mxu1 %v3223_v28 }
 0xe82   :  { %2321 = vmatpush.msrb.mxu1 %v3224_v29 }
 0xe85   :  { %v2331_v54 = vpop.permute.xlu2 %2330 }
 0xe8d   :  { %v2428_v8 = vpop.permute.xlu2 %2427 }
 0xe95   :  { %v3217_v30 = vpop.permute.xlu1 %3216  ;;  %v2400_v31 = vpop.permute.xlu2 %2399 }
 0xe96   :  { %v3218_v14 = vunpack.i.l.bf16 %v3217_v30  ;;  %v3219_v12 = vunpack.i.h.bf16 %v3217_v30 }
 0xe98   :  { %2266 = vmatpush.msra.mxu0 %v3218_v14  ;;  %v3289_v14 = vmov 12  }
 0xe99   :  { %3228 = vset.pattern.permute.xlu2 %v3289_v14 }
 0xe9a   :  { %2267 = vmatpush.msra.mxu0 %v3219_v12 }
 0xe9b   :  { %2983 = vmatmul.msk.f32.vlgmr.msra.gmra.mxu0 %vm1719_vm9, %v2241_v35 }
 0xe9c   :  { %2986 = vmatpush.msk.msrb.mxu0 %vm617_vm3, %v2343_v38 }
 0xe9d   :  { %v2297_v39 = vpop.permute.xlu1 %2296  ;;  %v2470_v41 = vpop.permute.xlu2 %2469 }
 0xe9e   :  { %2985 = vmatmul.msk.f32.vlgmr.msrb.gmra.mxu1 %vm1719_vm9, %v2297_v39  ;;  %2358 = vmatpush.msrb.mxu0 %v2342_v13  ;;  %v2651_v13 = vld [vmem:[%s4485_s1 + $0x3d0] sm:$0x3]  ;;  %v2650_v39 = vld [vmem:[%s4485_s1 + $0x3c8] sm:$0xff] }
 0xea0   :  { %2359 = vmatpush.msrb.mxu0 %v2341_v42  ;;  %v2648_v42 = vld [vmem:[%s4485_s1 + $0x3b8] sm:$0xff] }
 0xea2   :  { %2360 = vmatpush.msrb.mxu0 %v2340_v43  ;;  %v2647_v43 = vld [vmem:[%s4485_s1 + $0x3b0] sm:$0xff] }
 0xea4   :  { %2361 = vmatpush.msrb.mxu0 %v2339_v44 }
 0xea5   :  { %v2371_v61 = vpop.permute.xlu1 %2370 }
 0xea6   :  { %2362 = vmatpush.msrb.mxu0 %v2338_v45 }
 0xea8   :  { %2363 = vmatpush.msrb.mxu0 %v2337_v48  ;;  %v2293_v51 = vpop.f32.mrf.mxu2 }
 0xeaa   :  { %2364 = vmatpush.msrb.mxu0 %v2336_v20 }
 0xeac   :  { %2365 = vmatpush.msrb.mxu0 %v2335_v50 }
 0xf18   :  { %v2269_v52 = vpop.f32.mrf.mxu0 }
 0xf19   :  { %v2294_v6 = vadd.f32 %v2293_v51, %v2269_v52 }
 0xf1b   :  { %v2323_v53 = vpop.f32.mrf.mxu1 }
 0xf1c   :  { %v2326_v55 = vadd.f32 %v2323_v53, %v2294_v6 }
 0xf1e   :  { %v2333_v9 = vadd.f32 %v2331_v54, %v2326_v55 }
 0xf20   :  { %v2334_v56 = vmax.f32 %v2333_v9, 0.0 }
 0xf22   :  { %2987 = vmatmul.msk.f32.vlgmr.msrb.gmra.mxu0 %vm604_vm6, %v2334_v56  ;;  %v3291_v56 = vmov 13  }
 0xf23   :  { %3230 = vset.pattern.permute.xlu0 %v3291_v56 }
 0xf9f   :  { %v2367_v58 = vpop.f32.mrf.mxu0 }
 0xfa0   :  { %2373 = vrot.lane.b32.xlu0 %v2367_v58, %s3266_s20  ;;  %2432 = vrot.lane.b32.xlu1 %v2367_v58, %s3265_s19 }
 0xfa1   :  { %2418 = vmatpush.msra.mxu1 %v2367_v58  ;;  %v3236_v58 = vld [vmem:[%s4486_s2] sm:$0xff] }
 0xfa2   :  { %2989 = vmatmul.msk.f32.vlgmr.msra.gmra.mxu1 %vm2376_vm11, %v2400_v31  ;;  %v2767_v31 = vld [vmem:[%s4485_s1 + $0x3f8] sm:$0x3] }
 0xfa3   :  { %2992 = vmatpush.msk.msrb.mxu1 %vm2509_vm12, %v2504_v4 }
 0xfa5   :  { %2521 = vmatpush.msrb.mxu1 %v2503_v18 }
 0xfa7   :  { %2522 = vmatpush.msrb.mxu1 %v2502_v11 }
 0xfa8   :  { %2429 = vrot.lane.b32.xlu0 %v4342_v59, %s3279_s4  ;;  %2459 = vperm.xlu1 %3226, %v4044_v46  }
 0xfa9   :  { %2523 = vmatpush.msrb.mxu1 %v2501_v15  ;;  %v2797_v15 = vld [vmem:[%s4487_s3 + $0x10] sm:$0xff] }
 0xfab   :  { %2524 = vmatpush.msrb.mxu1 %v2500_v36  ;;  %v2795_v36 = vld [vmem:[%s4487_s3] sm:$0xff] }
 0xfad   :  { %2525 = vmatpush.msrb.mxu1 %v2499_v3 }
 0xfaf   :  { %2526 = vmatpush.msrb.mxu1 %v2498_v34  ;;  %v3231_v34 = vld [vmem:[%s4487_s3 + $0x24] ss:$0 sm:$0xff] }
 0xfb0   :  { %2472 = vrot.lane.b32.xlu0 %v4342_v59, %s3284_s9  ;;  %2561 = vrot.lane.b32.xlu1 %v4342_v59, %s3275_s22 }
 0xfb1   :  { %2527 = vmatpush.msrb.mxu1 %v2497_v19 }
 0xfb3   :  { %2528 = vmatpush.msrb.mxu1 %v2496_v21 }
 0xfb8   :  { %2589 = vrot.lane.b32.xlu1 %v4342_v59, %s3287_s21 }
 0xfc0   :  { %2678 = vrot.lane.b32.xlu1 %v4342_v59, %s3290_s6  ;;  %s2837_s6 = sshll.u32 %s4489_s5, 4  ;;  %s2838_s6 = int_to_ptr.hbm [resolvable:$true] %s2837_s6 }
 0xfc8   :  { %2706 = vrot.lane.b32.xlu1 %v4342_v59, %s3270_s28 }
0x1012   :  { %v2374_v62 = vpop.permute.xlu0 %2373  ;;  %v2433_v0 = vpop.permute.xlu1 %2432 }
0x1013   :  { %2394 = vmatpush.msrb.mxu2 %v2374_v62  ;;  %v2763_v62 = vld [vmem:[%s4485_s1 + $0x3d8] sm:$0xff] }
0x1014   :  { %2988 = vmatmul.msk.f32.vlgmr.msrb.gmra.mxu2 %vm2376_vm11, %v2371_v61  ;;  %v2764_v61 = vld [vmem:[%s4485_s1 + $0x3e0] sm:$0xff] }
0x1015   :  { %2452 = vmatpush.msra.mxu2 %v2433_v0  ;;  %v2799_v0 = vld [vmem:[%s4487_s3 + $0x20] sm:$0xf] }
0x1017   :  { %2994 = vmatpush.msk.msrb.mxu2 %vm617_vm3, %v2467_v22 }
0x1019   :  { %2552 = vmatpush.msrb.mxu2 %v2466_v5 }
0x101a   :  { %v2430_v7 = vpop.permute.xlu0 %2429  ;;  %v2460_v49 = vpop.permute.xlu1 %2459 }
0x101b   :  { %v2431_v2 = vsel %vm1985_vm10, %v2428_v8, %v2430_v7  ;;  %2553 = vmatpush.msrb.mxu2 %v2465_v16  ;;  %v2798_v7 = vld [vmem:[%s4487_s3 + $0x18] sm:$0xff]  ;;  %v2796_v16 = vld [vmem:[%s4487_s3 + $0x8] sm:$0xff] }
0x101c   :  { %2990 = vmatmul.msk.f32.vlgmr.msra.gmra.mxu2 %vm2376_vm11, %v2431_v2 }
0x101d   :  { %2554 = vmatpush.msrb.mxu2 %v2464_v1 }
0x101f   :  { %2555 = vmatpush.msrb.mxu2 %v2463_v33  ;;  %v2420_v23 = vpop.f32.mrf.mxu1 }
0x1022   :  { %v2473_v26 = vpop.permute.xlu0 %2472  ;;  %v2562_v29 = vpop.permute.xlu1 %2561 }
0x1023   :  { %2991 = vmatmul.msk.f32.vlgmr.msra.gmra.mxu3 %vm1719_vm9, %v2473_v26 }
0x102a   :  { %v2590_v30 = vpop.permute.xlu1 %2589 }
0x1032   :  { %v2679_v54 = vpop.permute.xlu1 %2678 }
0x103a   :  { %v2707_v9 = vpop.permute.xlu1 %2706 }
0x1097   :  { %v2396_v10 = vpop.f32.mrf.mxu2 }
0x1098   :  { %v2421_v24 = vadd.f32 %v2420_v23, %v2396_v10 }
0x109f   :  { %v2454_v32 = vpop.f32.mrf.mxu2 }
0x10a0   :  { %v2457_v47 = vadd.f32 %v2454_v32, %v2421_v24 }
0x10a2   :  { %v2462_v37 = vadd.f32 %v2460_v49, %v2457_v47 }
0x10a4   :  { %2995 = vmatmul.msk.f32.vlgmr.msrb.gmra.mxu2 %vm2533_vm13, %v2462_v37 }
0x10a6   :  { %v2493_v40 = vpop.f32.mrf.mxu3 }
0x10a7   :  { %v2494_v27 = vadd.f32 %v2493_v40, %v2470_v41 }
0x10a9   :  { %2993 = vmatmul.msk.f32.vlgmr.msrb.gmra.mxu1 %vm2505_vm14, %v2494_v27 }
0x1126   :  { %v2530_v57 = vpop.f32.mrf.mxu1 }
0x1127   :  { %v2557_v63 = vpop.f32.mrf.mxu2 }
0x1128   :  { %v2558_v28 = vadd.f32 %v2557_v63, %v2530_v57 }
0x112a   :  { %v4402_v17 = vmax.f32 %v2558_v28, 0.0 }
0x112c   :  { %2564 = vrot.lane.b32.xlu0 %v4402_v17, %s3266_s20  ;;  %2615 = vrot.lane.b32.xlu2 %v4402_v17, %s3265_s19 }
0x112d   :  { %2608 = vmatpush.msra.mxu0 %v4402_v17 }
0x112e   :  { %2997 = vmatmul.msk.f32.vlgmr.msra.gmra.mxu0 %vm2376_vm11, %v2590_v30 }
0x112f   :  { %2999 = vmatpush.msk.msrb.mxu0 %vm617_vm3, %v2651_v13 }
0x1131   :  { %2670 = vmatpush.msrb.mxu0 %v2650_v39 }
0x1134   :  { %2613 = vrot.lane.b32.xlu0 %v4342_v59, %s3288_s13  ;;  %2642 = vperm.xlu2 %3228, %v4044_v46   ;;  %v2649_v46 = vld [vmem:[%s4485_s1 + $0x3c0] sm:$0xff] }
0x1135   :  { %2671 = vmatpush.msrb.mxu0 %v2649_v46 }
0x1137   :  { %2672 = vmatpush.msrb.mxu0 %v2648_v42 }
0x1139   :  { %2673 = vmatpush.msrb.mxu0 %v2647_v43 }
0x113b   :  { %3006 = vmatpush.msk.msra.mxu0 %vm2509_vm12, %v2799_v0 }
0x113c   :  { %3229 = vset.pattern.permute.xlu2 %v3291_v56 }
0x113d   :  { %2821 = vmatpush.msra.mxu0 %v2798_v7 }
0x113f   :  { %2822 = vmatpush.msra.mxu0 %v2797_v15 }
0x1141   :  { %2823 = vmatpush.msra.mxu0 %v2796_v16 }
0x1143   :  { %2824 = vmatpush.msra.mxu0 %v2795_v36 }
0x1186   :  { %v2616_v35 = vpop.permute.xlu2 %2615 }
0x118e   :  { %v2643_v50 = vpop.permute.xlu2 %2642 }
0x119e   :  { %v2565_v12 = vpop.permute.xlu0 %2564 }
0x119f   :  { %2584 = vmatpush.msrb.mxu3 %v2565_v12 }
0x11a0   :  { %2996 = vmatmul.msk.f32.vlgmr.msrb.gmra.mxu3 %vm2376_vm11, %v2562_v29 }
0x11a1   :  { %2635 = vmatpush.msra.mxu3 %v2616_v35 }
0x11a6   :  { %v2614_v38 = vpop.permute.xlu0 %2613 }
0x11a8   :  { %2998 = vmatmul.msk.f32.vlgmr.msra.gmra.mxu3 %vm2376_vm11, %v2614_v38 }
0x11ab   :  { %v2610_v45 = vpop.f32.mrf.mxu0 }
0x1223   :  { %v2586_v44 = vpop.f32.mrf.mxu3 }
0x1224   :  { %v2611_v48 = vadd.f32 %v2610_v45, %v2586_v44 }
0x122b   :  { %v2637_v20 = vpop.f32.mrf.mxu3 }
0x122c   :  { %v2640_v51 = vadd.f32 %v2637_v20, %v2611_v48 }
0x122e   :  { %v2645_v52 = vadd.f32 %v2643_v50, %v2640_v51 }
0x1230   :  { %v2646_v6 = vmax.f32 %v2645_v52, 0.0 }
0x1232   :  { %3000 = vmatmul.msk.f32.vlgmr.msrb.gmra.mxu0 %vm2533_vm13, %v2646_v6 }
0x12af   :  { %v2675_v53 = vpop.f32.mrf.mxu0 }
0x12b0   :  { %2681 = vrot.lane.b32.xlu0 %v2675_v53, %s3266_s20  ;;  %2732 = vrot.lane.b32.xlu2 %v2675_v53, %s3265_s19 }
0x12b1   :  { %2725 = vmatpush.msra.mxu1 %v2675_v53 }
0x12b2   :  { %3002 = vmatmul.msk.f32.vlgmr.msra.gmra.mxu1 %vm2376_vm11, %v2707_v9 }
0x12b8   :  { %2730 = vrot.lane.b32.xlu0 %v4342_v59, %s3276_s23  ;;  %2759 = vperm.xlu2 %3229, %v3236_v58  }
0x130a   :  { %v2733_v55 = vpop.permute.xlu2 %2732 }
0x130b   :  { %2752 = vmatpush.msrb.mxu3 %v2733_v55 }
0x1312   :  { %v2760_v22 = vpop.permute.xlu2 %2759 }
0x1322   :  { %v2682_v8 = vpop.permute.xlu0 %2681 }
0x1323   :  { %2701 = vmatpush.msra.mxu2 %v2682_v8 }
0x1324   :  { %3001 = vmatmul.msk.f32.vlgmr.msra.gmra.mxu2 %vm2376_vm11, %v2679_v54 }
0x1325   :  { %3004 = vmatpush.msk.msrb.mxu2 %vm617_vm3, %v2767_v31 }
0x1327   :  { %2786 = vmatpush.msrb.mxu2 %v2766_v25 }
0x1329   :  { %2787 = vmatpush.msrb.mxu2 %v2765_v60 }
0x132a   :  { %v2731_v59 = vpop.permute.xlu0 %2730 }
0x132b   :  { %3003 = vmatmul.msk.f32.vlgmr.msrb.gmra.mxu3 %vm2376_vm11, %v2731_v59  ;;  %2788 = vmatpush.msrb.mxu2 %v2764_v61 }
0x132d   :  { %2789 = vmatpush.msrb.mxu2 %v2763_v62 }
0x132f   :  { %v2727_v26 = vpop.f32.mrf.mxu1 }
0x13a7   :  { %v2703_v2 = vpop.f32.mrf.mxu2 }
0x13a8   :  { %v2728_v4 = vadd.f32 %v2727_v26, %v2703_v2 }
0x13ae   :  { %v2754_v18 = vpop.f32.mrf.mxu3 }
0x13af   :  { %v2757_v5 = vadd.f32 %v2754_v18, %v2728_v4 }
0x13b1   :  { %v2762_v11 = vadd.f32 %v2760_v22, %v2757_v5 }
0x13b3   :  { %3005 = vmatmul.msk.f32.vlgmr.msrb.gmra.mxu2 %vm2533_vm13, %v2762_v11 }
0x1436   :  { %v2791_v1 = vpop.f32.mrf.mxu2 }
0x1437   :  { %v2792_v3 = vadd.f32 %v2791_v1, %v4402_v17 }
0x1439   :  { %v2794_v33 = vmax.f32 %v2792_v3, 0.0 }
0x143b   :  { %3007 = vmatmul.msk.f32.vlgmr.msra.gmra.mxu0 %vm2802_vm15, %v2794_v33 }
0x14b8   :  { %v2826_v19 = vpop.f32.mrf.mxu0 }
0x14b9   :  { %v2827_v21 = vadd.f32 %v3231_v34, %v2826_v19 }
0x14bb   :  { %2829 = vst [vmem:[#allocation2] sm:$0xff] %v2827_v21 }
0x14bc   :  { %2840 = dma.vmem_to_hbm [thread:$0]  %s2836_s27, 128, %s2838_s6, [#allocation3]  }
0x14bd   :  { %3261 = dma.done.wait [#allocation3], 128  }
0x14be   :  { %3262 = vsyncadd [#allocation3], 4294967168 }
0x14bf   :  { %2845 = vsyncpa [#allocation3], 1 }

</bundles_post_ra>
